<compile_context>
chip_gen: v6e
topology: v6e:2x2x1
jax: 0.10.0
libtpu: 0.0.40
codegen_flags: <defaults>
</compile_context>

<pallas_src>
import numpy as np
import jax
import jax.numpy as jnp
from jax import lax
from jax.experimental import pallas as pl
from jax.experimental.pallas import tpu as pltpu

# ----------------------------- model dims -----------------------------------
CONV_IN_LEN = 24                              # X[:, 2:] length
CONV_K = 3
CONV_OUT_CH = 3
CONV_OUT_LEN = CONV_IN_LEN - CONV_K + 1       # 22
CONV_FLAT = CONV_OUT_CH * CONV_OUT_LEN        # 66
IN_FEATURES = 2 + CONV_IN_LEN                 # 26
STAGE0_OUT = 2 + CONV_FLAT + 1                # 69 = [s(2) | conv(66) | carrier(1)]
CARRIER = STAGE0_OUT - 1                      # 68
DENSE_DIMS = [(68, 34), (34, 16), (16, 8), (8, 4), (4, 1)]   # torch (fin, fout)

# Carrier-extended dense dims (extra bias row + carrier passthrough column).
D1_IN, D1_OUT = 69, 35
D2_IN, D2_OUT = 35, 17
D3_IN, D3_OUT = 17, 9
D4_IN, D4_OUT = 9, 5

# ----------------------------- weight slab layouts ---------------------------
SLAB_COLS = 128

# f32 slab: stage-0 band matrix + misc row block (stage-0 bias/carrier, dense5).
ROW_A = 0          # (26, 69)  stage-0 matrix
ROW_MISC = 32      # row 32: ab (69, incl. carrier=1); row 33: [w5(4) | b5]
SLAB0_ROWS = 40

# bf16 slab: carrier-extended dense1..dense4, each 16-row (bf16 tile) aligned.
ROW_W1 = 0         # (69, 35)
ROW_W2 = 80        # (35, 17)
ROW_W3 = 128       # (17, 9)
ROW_W4 = 160       # (9, 5)
SLABD_ROWS = 176


# ----------------------------- Pallas kernel --------------------------------
def irr_kernel(x_ref, w0_ref, wd_ref, o_ref):
    f32 = jnp.float32
    bf16 = jnp.bfloat16
    x = x_ref[...]                                            # (tb, 26) f32

    # One aligned (8, 128) f32 load for stage-0 bias/carrier + dense5 params.
    misc = w0_ref[ROW_MISC:ROW_MISC + 8, :]
    ab = misc[0:1, :STAGE0_OUT]                               # (1, 69), ab[68]=1
    w5e = misc[1:2, :D4_OUT]                                  # (1, 5) = [w5 | b5]

    # Stage 0 (f32, exact s passthrough): fused [I(s) | Conv1d band | 0] matmul,
    # bias add injects conv bias + the +1 bias-carrier column.  ReLU is applied
    # only to lanes >= 2 (conv outputs + carrier; ReLU(1)=1 keeps the carrier).
    u = jnp.dot(x, w0_ref[ROW_A:ROW_A + IN_FEATURES, :STAGE0_OUT],
                preferred_element_type=f32) + ab              # (tb, 69)
    lane = lax.broadcasted_iota(jnp.int32, u.shape, 1)
    v = jnp.where(lane >= 2, jnp.maximum(u, 0.0), u)

    # Dense stack 69 -> 35 -> 17 -> 9 -> 5 (carrier-extended): bf16 operands,
    # f32 accumulation, biases folded into the bias row of each Wi.
    h = jnp.maximum(
        jnp.dot(v.astype(bf16), wd_ref[ROW_W1:ROW_W1 + D1_IN, :D1_OUT],
                preferred_element_type=f32), 0.0)
    h = jnp.maximum(
        jnp.dot(h.astype(bf16), wd_ref[ROW_W2:ROW_W2 + D2_IN, :D2_OUT],
                preferred_element_type=f32), 0.0)
    h = jnp.maximum(
        jnp.dot(h.astype(bf16), wd_ref[ROW_W3:ROW_W3 + D3_IN, :D3_OUT],
                preferred_element_type=f32), 0.0)
    h = jnp.maximum(
        jnp.dot(h.astype(bf16), wd_ref[ROW_W4:ROW_W4 + D4_IN, :D4_OUT],
                preferred_element_type=f32), 0.0)             # (tb, 5), col 4 == 1

    # dense5 (5 -> 1, b5 folded at col 4): VPU broadcast-mul + lane reduction.
    o_ref[...] = jnp.sum(h * w5e, axis=1, keepdims=True)      # (tb, 1) f32


# ----------------------------- wrapper ---------------------------------------
def irr_net_forward(X, w0_slab, wd_slab, *, tb=1024):
    """X: (B, 26) float32.  Returns (B, 1) float32."""
    B = X.shape[0]
    B_pad = ((B + tb - 1) // tb) * tb
    if B_pad != B:
        X = jnp.pad(X, ((0, B_pad - B), (0, 0)))

    grid = (B_pad // tb,)
    out = pl.pallas_call(
        irr_kernel,
        out_shape=jax.ShapeDtypeStruct((B_pad, 1), jnp.float32),
        grid_spec=pltpu.PrefetchScalarGridSpec(
            num_scalar_prefetch=0,
            grid=grid,
            in_specs=[
                pl.BlockSpec((tb, IN_FEATURES), lambda i: (i, 0)),
                pl.BlockSpec((SLAB0_ROWS, SLAB_COLS), lambda i: (0, 0)),
                pl.BlockSpec((SLABD_ROWS, SLAB_COLS), lambda i: (0, 0)),
            ],
            out_specs=pl.BlockSpec((tb, 1), lambda i: (i, 0)),
        ),
        compiler_params=pltpu.CompilerParams(
            dimension_semantics=("parallel",),
            vmem_limit_bytes=32 * 1024 * 1024),   # v5e default is 16 MiB
    )(X, w0_slab, wd_slab)
    return out[:B]


# ----------------------------- parameter setup -------------------------------
def init_params(key):
    """Deterministic synthetic parameters matching irr_net.__init__ shapes."""
    ks = jax.random.split(key, 12)
    u = lambda k, shape, scale: jax.random.uniform(
        k, shape, jnp.float32, -scale, scale)

    conv_w = u(ks[0], (CONV_OUT_CH, 1, CONV_K), 0.5)     # Conv1d weight
    conv_b = u(ks[1], (CONV_OUT_CH,), 0.5)               # Conv1d bias

    dense_w, dense_b = [], []
    for idx, (fin, fout) in enumerate(DENSE_DIMS):
        scale = 1.0 / np.sqrt(fin)
        dense_w.append(u(ks[2 + 2 * idx], (fout, fin), scale))   # torch layout
        dense_b.append(u(ks[3 + 2 * idx], (fout,), scale))

    return conv_w, conv_b, dense_w, dense_b


def pack_params_for_kernel(conv_w, conv_b, dense_w, dense_b):
    """Pack params into a (40,128) f32 slab + a (176,128) bf16 slab."""
    cw = np.asarray(conv_w, np.float32)                  # (3, 1, 3)
    cb = np.asarray(conv_b, np.float32)                  # (3,)

    # ---- f32 slab: stage-0 band matrix + misc rows -------------------------
    w0 = np.zeros((SLAB0_ROWS, SLAB_COLS), np.float32)
    A = np.zeros((IN_FEATURES, STAGE0_OUT), np.float32)
    ab = np.zeros((STAGE0_OUT,), np.float32)
    A[0, 0] = 1.0
    A[1, 1] = 1.0
    for c in range(CONV_OUT_CH):
        for j in range(CONV_OUT_LEN):
            col = 2 + c * CONV_OUT_LEN + j               # torch.flatten order
            for k in range(CONV_K):
                A[2 + j + k, col] = cw[c, 0, k]
            ab[col] = cb[c]
    ab[CARRIER] = 1.0                                    # +1 bias-carrier column
    w0[ROW_A:ROW_A + IN_FEATURES, :STAGE0_OUT] = A
    w0[ROW_MISC, :STAGE0_OUT] = ab
    w5 = np.asarray(dense_w[4], np.float32)[0]           # (4,)
    b5 = float(np.asarray(dense_b[4], np.float32)[0])
    w0[ROW_MISC + 1, :4] = w5
    w0[ROW_MISC + 1, 4] = b5                             # b5 folded via carrier

    # ---- bf16 slab: carrier-extended dense1..dense4 ------------------------
    def ext(w, b):
        """torch (fout, fin) -> (fin+1, fout+1): W^T, bias row, carrier col."""
        w = np.asarray(w, np.float32)
        b = np.asarray(b, np.float32)
        fout, fin = w.shape
        e = np.zeros((fin + 1, fout + 1), np.float32)
        e[:fin, :fout] = w.T
        e[fin, :fout] = b                                # bias row (x carrier=1)
        e[fin, fout] = 1.0                               # carrier passthrough
        return e

    wd = np.zeros((SLABD_ROWS, SLAB_COLS), np.float32)
    for row, w, b in zip((ROW_W1, ROW_W2, ROW_W3, ROW_W4),
                         dense_w[:4], dense_b[:4]):
        e = ext(w, b)
        wd[row:row + e.shape[0], :e.shape[1]] = e

    return jnp.asarray(w0), jnp.asarray(wd, dtype=jnp.bfloat16)


# ----------------------------- pure-JAX references ---------------------------
def _stage0_ref(X, conv_w, conv_b):
    s = X[:, :2]
    t = X[:, 2:]                                          # (B, 24)
    chans = []
    for c in range(CONV_OUT_CH):
        oc = sum(conv_w[c, 0, k] * t[:, k:k + CONV_OUT_LEN]
                 for k in range(CONV_K)) + conv_b[c]
        chans.append(jnp.maximum(oc, 0.0))
    return jnp.concatenate([s] + chans, axis=1)           # (B, 68)


def ref_forward_f32(X, conv_w, conv_b, dense_w, dense_b):
    """Exact f32 reference of the PyTorch module."""
    h = _stage0_ref(X, conv_w, conv_b)
    for i in range(4):
        h = jnp.maximum(h @ dense_w[i].T + dense_b[i], 0.0)
    return h @ dense_w[4].T + dense_b[4]


def ref_forward_matched(X, conv_w, conv_b, dense_w, dense_b):
    """Reference mirroring the kernel numerics (bf16 operands, f32 accumulate)."""
    h = _stage0_ref(X, conv_w, conv_b)
    for i in range(4):
        hb = h.astype(jnp.bfloat16)
        wb = dense_w[i].T.astype(jnp.bfloat16)
        bb = dense_b[i].astype(jnp.bfloat16).astype(jnp.float32)
        h = jnp.maximum(
            jnp.dot(hb, wb, preferred_element_type=jnp.float32) + bb, 0.0)
    return jnp.sum(h * dense_w[4][0], axis=1, keepdims=True) + dense_b[4][0]


# ----------------------------- main ------------------------------------------
if __name__ == "__main__":
    key = jax.random.PRNGKey(0)
    k_in, k_par = jax.random.split(key)

    B = 4096                                   # -> grid of 4 steps at tb=1024
    X = jax.random.normal(k_in, (B, IN_FEATURES), jnp.float32)

    conv_w, conv_b, dense_w, dense_b = init_params(k_par)
    w0_slab, wd_slab = pack_params_for_kernel(conv_w, conv_b, dense_w, dense_b)

    out = jax.block_until_ready(irr_net_forward(X, w0_slab, wd_slab, tb=1024))
    ref_m = jax.block_until_ready(
        ref_forward_matched(X, conv_w, conv_b, dense_w, dense_b))
    ref_f = jax.block_until_ready(
        ref_forward_f32(X, conv_w, conv_b, dense_w, dense_b))

    # Tight structural check vs a reference with matching bf16 operand rounding,
    # plus a loose semantic check vs the exact f32 model (tolerance loosened per
    # the perf review's bf16 recommendation).
    np.testing.assert_allclose(np.asarray(out), np.asarray(ref_m),
                               rtol=2e-3, atol=2e-3)
    np.testing.assert_allclose(np.asarray(out), np.asarray(ref_f),
                               rtol=5e-2, atol=5e-2)
    print("KERNEL_OK")
</pallas_src>

<mosaic_0001>
module attributes {stable_mosaic.version = 11 : i64} {
  func.func @irr_kernel(%arg0: i32, %arg1: memref<1024x26xf32, #tpu.memory_space<vmem>>, %arg2: memref<40x128xf32, #tpu.memory_space<vmem>>, %arg3: memref<176x128xbf16, #tpu.memory_space<vmem>>, %arg4: memref<1024x1xf32, #tpu.memory_space<vmem>>) attributes {dimension_semantics = [#tpu.dimension_semantics<parallel>], iteration_bounds = array<i64: 4>, scalar_prefetch = 0 : i64, scratch_operands = 0 : i64, tpu.core_type = #tpu.core_type<tc>, window_params = [{transform_indices = @transform_0, window_bounds = array<i64: 1024, 26>}, {pipeline_mode = #tpu.pipeline_mode<synchronous>, transform_indices = @transform_1, window_bounds = array<i64: 40, 128>}, {pipeline_mode = #tpu.pipeline_mode<synchronous>, transform_indices = @transform_2, window_bounds = array<i64: 176, 128>}, {transform_indices = @transform_3, window_bounds = array<i64: 1024, 1>}]} {
    %c0 = arith.constant 0 : index
    %c0_0 = arith.constant 0 : index
    %0 = vector.load %arg1[%c0, %c0_0] : memref<1024x26xf32, #tpu.memory_space<vmem>>, vector<1024x26xf32>
    %c32 = arith.constant 32 : index
    %c0_1 = arith.constant 0 : index
    %1 = vector.load %arg2[%c32, %c0_1] : memref<40x128xf32, #tpu.memory_space<vmem>>, vector<8x128xf32>
    %2 = vector.extract_strided_slice %1 {offsets = [0, 0], sizes = [1, 69], strides = [1, 1]} : vector<8x128xf32> to vector<1x69xf32>
    %3 = vector.extract_strided_slice %1 {offsets = [1, 0], sizes = [1, 5], strides = [1, 1]} : vector<8x128xf32> to vector<1x5xf32>
    %c0_2 = arith.constant 0 : index
    %c0_3 = arith.constant 0 : index
    %4 = vector.load %arg2[%c0_2, %c0_3] : memref<40x128xf32, #tpu.memory_space<vmem>>, vector<26x69xf32>
    %cst = arith.constant dense<0.000000e+00> : vector<1024x69xf32>
    %5 = tpu.matmul %0, %4, %cst {dimension_numbers = #tpu.dot_dimension_numbers<[1], [0], [0], [1], [0, 0, 1, 1], [], []>} : vector<1024x26xf32>, vector<26x69xf32>, vector<1024x69xf32> -> vector<1024x69xf32>
    %6 = vector.broadcast %2 : vector<1x69xf32> to vector<1024x69xf32>
    %7 = arith.addf %5, %6 : vector<1024x69xf32>
    %8 = tpu.iota {dimensions = array<i32: 1>} : vector<1024x69xi32>
    %c2_i32 = arith.constant 2 : i32
    %9 = vector.broadcast %c2_i32 : i32 to vector<1024x69xi32>
    %10 = arith.cmpi sge, %8, %9 : vector<1024x69xi32>
    %cst_4 = arith.constant 0.000000e+00 : f32
    %11 = vector.broadcast %cst_4 : f32 to vector<1024x69xf32>
    %12 = arith.maximumf %7, %11 : vector<1024x69xf32>
    %13 = arith.select %10, %12, %7 : vector<1024x69xi1>, vector<1024x69xf32>
    %14 = arith.truncf %13 : vector<1024x69xf32> to vector<1024x69xbf16>
    %c0_5 = arith.constant 0 : index
    %c0_6 = arith.constant 0 : index
    %15 = vector.load %arg3[%c0_5, %c0_6] : memref<176x128xbf16, #tpu.memory_space<vmem>>, vector<69x35xbf16>
    %cst_7 = arith.constant dense<0.000000e+00> : vector<1024x35xf32>
    %16 = tpu.matmul %14, %15, %cst_7 {dimension_numbers = #tpu.dot_dimension_numbers<[1], [0], [0], [1], [0, 0, 1, 1], [], []>} : vector<1024x69xbf16>, vector<69x35xbf16>, vector<1024x35xf32> -> vector<1024x35xf32>
    %cst_8 = arith.constant 0.000000e+00 : f32
    %17 = vector.broadcast %cst_8 : f32 to vector<1024x35xf32>
    %18 = arith.maximumf %16, %17 : vector<1024x35xf32>
    %19 = arith.truncf %18 : vector<1024x35xf32> to vector<1024x35xbf16>
    %c80 = arith.constant 80 : index
    %c0_9 = arith.constant 0 : index
    %20 = vector.load %arg3[%c80, %c0_9] : memref<176x128xbf16, #tpu.memory_space<vmem>>, vector<35x17xbf16>
    %cst_10 = arith.constant dense<0.000000e+00> : vector<1024x17xf32>
    %21 = tpu.matmul %19, %20, %cst_10 {dimension_numbers = #tpu.dot_dimension_numbers<[1], [0], [0], [1], [0, 0, 1, 1], [], []>} : vector<1024x35xbf16>, vector<35x17xbf16>, vector<1024x17xf32> -> vector<1024x17xf32>
    %cst_11 = arith.constant 0.000000e+00 : f32
    %22 = vector.broadcast %cst_11 : f32 to vector<1024x17xf32>
    %23 = arith.maximumf %21, %22 : vector<1024x17xf32>
    %24 = arith.truncf %23 : vector<1024x17xf32> to vector<1024x17xbf16>
    %c128 = arith.constant 128 : index
    %c0_12 = arith.constant 0 : index
    %25 = vector.load %arg3[%c128, %c0_12] : memref<176x128xbf16, #tpu.memory_space<vmem>>, vector<17x9xbf16>
    %cst_13 = arith.constant dense<0.000000e+00> : vector<1024x9xf32>
    %26 = tpu.matmul %24, %25, %cst_13 {dimension_numbers = #tpu.dot_dimension_numbers<[1], [0], [0], [1], [0, 0, 1, 1], [], []>} : vector<1024x17xbf16>, vector<17x9xbf16>, vector<1024x9xf32> -> vector<1024x9xf32>
    %cst_14 = arith.constant 0.000000e+00 : f32
    %27 = vector.broadcast %cst_14 : f32 to vector<1024x9xf32>
    %28 = arith.maximumf %26, %27 : vector<1024x9xf32>
    %29 = arith.truncf %28 : vector<1024x9xf32> to vector<1024x9xbf16>
    %c160 = arith.constant 160 : index
    %c0_15 = arith.constant 0 : index
    %30 = vector.load %arg3[%c160, %c0_15] : memref<176x128xbf16, #tpu.memory_space<vmem>>, vector<9x5xbf16>
    %cst_16 = arith.constant dense<0.000000e+00> : vector<1024x5xf32>
    %31 = tpu.matmul %29, %30, %cst_16 {dimension_numbers = #tpu.dot_dimension_numbers<[1], [0], [0], [1], [0, 0, 1, 1], [], []>} : vector<1024x9xbf16>, vector<9x5xbf16>, vector<1024x5xf32> -> vector<1024x5xf32>
    %cst_17 = arith.constant 0.000000e+00 : f32
    %32 = vector.broadcast %cst_17 : f32 to vector<1024x5xf32>
    %33 = arith.maximumf %31, %32 : vector<1024x5xf32>
    %34 = vector.broadcast %3 : vector<1x5xf32> to vector<1024x5xf32>
    %35 = arith.mulf %33, %34 : vector<1024x5xf32>
    %cst_18 = arith.constant dense<0.000000e+00> : vector<1024xf32>
    %36 = vector.multi_reduction <add>, %35, %cst_18 [1] : vector<1024x5xf32> to vector<1024xf32>
    %37 = vector.shape_cast %36 : vector<1024xf32> to vector<1024x1xf32>
    %c0_19 = arith.constant 0 : index
    %c0_20 = arith.constant 0 : index
    %38 = vector.load %arg4[%c0_19, %c0_20] : memref<1024x1xf32, #tpu.memory_space<vmem>>, vector<1024x1xf32>
    tpu.vector_store %arg4[%c0_19, %c0_20], %37 {strides = array<i32>} : memref<1024x1xf32, #tpu.memory_space<vmem>>, vector<1024x1xf32>,
    return
  }
  func.func @transform_0(%arg0: i32) -> (i32, i32) {
    %c0_i32 = arith.constant 0 : i32
    %c0_i32_0 = arith.constant 0 : i32
    return %arg0, %c0_i32 : i32, i32
  }
  func.func @transform_1(%arg0: i32) -> (i32, i32) {
    %c0_i32 = arith.constant 0 : i32
    %c0_i32_0 = arith.constant 0 : i32
    %c0_i32_1 = arith.constant 0 : i32
    return %c0_i32, %c0_i32_0 : i32, i32
  }
  func.func @transform_2(%arg0: i32) -> (i32, i32) {
    %c0_i32 = arith.constant 0 : i32
    %c0_i32_0 = arith.constant 0 : i32
    %c0_i32_1 = arith.constant 0 : i32
    return %c0_i32, %c0_i32_0 : i32, i32
  }
  func.func @transform_3(%arg0: i32) -> (i32, i32) {
    %c0_i32 = arith.constant 0 : i32
    %c0_i32_0 = arith.constant 0 : i32
    return %arg0, %c0_i32 : i32, i32
  }
}

</mosaic_0001>

<bundles_post_ra>
// kernel: tpu_custom_call.1
= control target key start
LH: loop header
LB: loop body
LE: loop exit
PB: predicated region body
PF: predicated region fallthrough
CT: control target
= control target key end

     0   :  { %s7786_s12 = smov 0   ;;  %s9487_s0 = inlined_call_operand.vmem [shape: f32[4096,26], index: 0, kind: input, shape index: {}]   ;;  %s9488_s1 = inlined_call_operand.vmem [shape: f32[40,128], index: 1, kind: input, shape index: {}]   ;;  %s9489_s2 = inlined_call_operand.vmem [shape: bf16[176,128], index: 2, kind: input, shape index: {}]   ;;  %s9490_s3 = inlined_call_operand.vmem [shape: f32[4096,1], index: 3, kind: output, shape index: {}]  }
   0x1 LB: > { %s6186_s13 = sadd.s32 4294967295, %s7762_s12   ;;  %p6190_p0 = scmp.ge.s32.totalorder %s7762_s12, 1  ;;  %s7762_s12 = sphi %s7786_s12, %s13_s12  }
   0x2   : > { %p138_p1 = scmp.lt.s32.totalorder %s7762_s12, 5 }
   0x4   : > { %p139_p2 = pnand %p6190_p0, %p138_p1 }
   0x6   : > { %142 = sbr.rel (%p139_p2) target bundleno = 1433 (0x599), region = 32 }
   0xb   : > { %v307_v0 = vld [vmem:[%s9488_s1 + $0x18] sm:$0x3]  ;;  %vm697_vm0 = vcmask 1041408   ;;  %v306_v1 = vld [vmem:[%s9488_s1 + $0x10] sm:$0xff]  ;;  %s6191_s18 = sshll.u32 %s6186_s13, 7  ;;  %v305_v2 = vld [vmem:[%s9488_s1 + $0x8] sm:$0xff] }
   0xc   : > { %6992 = vmatprep.subr.msk.mxu0 %vm697_vm0, %v307_v0  ;;  %p163_p3 = scmp.lt.s32.totalorder %s6191_s18, 511  ;;  %7726 = vmatprep.subr.msk.mxu1 %vm697_vm0, %v307_v0  ;;  %vm1958_vm1 = vcmask 1042432   ;;  %v7744_v3 = vld [vmem:[%s9489_s2 + $0x20] ss:$0 sps:$4 sm:$0x77]   ;;  %v9491_v4 = vmov 65535  }
   0xd   : > { %6993 = vmatpush3.msk.msra.mxu0 %vm697_vm0, %v307_v0  ;;  %7730 = vmatpush3.msk.msra.mxu1 %vm697_vm0, %v307_v0  ;;  %v1959_v5 = vsel %vm697_vm0, 4294967295, %v9491_v4  ;;  %v304_v6 = vld [vmem:[%s9488_s1] sm:$0xff]  ;;  %vm312_vm2 = vcmask 211968   ;;  %v7745_v20 = vld [vmem:[%s9489_s2 + $0x18] sm:$0xff]   ;;  %v7746_v26 = vld [vmem:[%s9489_s2 + $0x10] sm:$0xff]   ;;  %vm2914_vm3 = vcmask 1040384  }
   0xe   : > { %6994 = vmatprep.subr.mxu0 %v306_v1  ;;  %s9497_s18 = smov (!%p163_p3, %s6191_s18), 511  ;;  %7727 = vmatprep.subr.mxu1 %v306_v1  ;;  %v1960_v7 = vsel %vm1958_vm1, %v1959_v5, 0  ;;  %v7747_v31 = vld [vmem:[%s9489_s2 + $0x8] sm:$0xff]   ;;  %v7748_v50 = vld [vmem:[%s9489_s2] sm:$0xff]   ;;  %vm1765_vm5 = vcmask 564224   ;;  %vm2721_vm6 = vcmask 285696  }
   0xf   : > { %6995 = vmatpush3.msra.mxu0 %v306_v1  ;;  %7731 = vmatpush3.msra.mxu1 %v306_v1  ;;  %s6192_s25 = sshll.u32 %s9497_s18, 3  ;;  %v1962_v8 = vand.u32 %v7744_v3, %v1960_v7  ;;  %vm4804_vm7 = vcmask 1043456   ;;  %vm4805_vm8 = vcmask 1044480   ;;  %vm3669_vm9 = vcmask 138240  }
  0x10   : > { %6996 = vmatprep.subr.mxu0 %v305_v2  ;;  %7728 = vmatprep.subr.mxu1 %v305_v2  ;;  %s7823_s28 = scalar_lea.vmem %s9487_s0, %s6192_s25  ;;  %vm4611_vm10 = vcmask 72704   ;;  %vm5616_vm11 = vcmask 39936   ;;  %s9107_s4 = scalar_lea.vmem %s9490_s3, %s6192_s25  ;;  %vm6001_vm12 = vcmask 7168  }
  0x11   : > { %6997 = vmatpush3.msra.mxu0 %v305_v2  ;;  %7732 = vmatpush3.msra.mxu1 %v305_v2  ;;  %v175_v9 = vld [vmem:[%s7823_s28] sm:$0xff]  ;;  %v176_v10 = vld [vmem:[%s7823_s28 + $0x8] sm:$0xff]  ;;  %v177_v11 = vld [vmem:[%s7823_s28 + $0x10] sm:$0xff] }
  0x12   : > { %6998 = vmatprep.subr.mxu0 %v304_v6  ;;  %7729 = vmatprep.subr.mxu1 %v304_v6  ;;  %v178_v12 = vld [vmem:[%s7823_s28 + $0x18] sm:$0xff]  ;;  %v179_v13 = vld [vmem:[%s7823_s28 + $0x20] sm:$0xff]  ;;  %v180_v14 = vld [vmem:[%s7823_s28 + $0x28] sm:$0xff] }
  0x13   : > { %6999 = vmatpush3.msra.mxu0 %v304_v6  ;;  %7000 = vmatprep.mubr.msk.f32.mxu0 %vm312_vm2, %v175_v9  ;;  %v181_v15 = vld [vmem:[%s7823_s28 + $0x30] sm:$0xff]  ;;  %v182_v16 = vld [vmem:[%s7823_s28 + $0x38] sm:$0xff]  ;;  %v183_v17 = vld [vmem:[%s7823_s28 + $0x40] sm:$0xff] }
  0x14   : > { %7001 = vmatmul.mubr.msk.f32.vlgmr.msra.gmra.mxu0 %vm312_vm2, %v176_v10  ;;  %7733 = vmatpush3.msra.mxu1 %v304_v6  ;;  %v239_v18 = vld [vmem:[%s7823_s28 + $0x200] sm:$0xff]  ;;  %v240_v19 = vld [vmem:[%s7823_s28 + $0x208] sm:$0xff]  ;;  %v241_v21 = vld [vmem:[%s7823_s28 + $0x210] sm:$0xff] }
  0x15   : > { %7003 = vmatprep.mubr.msk.f32.mxu0 %vm312_vm2, %v177_v11  ;;  %7192 = vmatprep.subr.bf16.mxu1 %v1962_v8  ;;  %v184_v22 = vld [vmem:[%s7823_s28 + $0x48] sm:$0xff]  ;;  %v242_v23 = vld [vmem:[%s7823_s28 + $0x218] sm:$0xff]  ;;  %v185_v24 = vld [vmem:[%s7823_s28 + $0x50] sm:$0xff] }
  0x16   : > { %7096 = vmatprep.mubr.msk.f32.mxu1 %vm312_vm2, %v239_v18  ;;  %v243_v25 = vld [vmem:[%s7823_s28 + $0x220] sm:$0xff]  ;;  %v186_v27 = vld [vmem:[%s7823_s28 + $0x58] sm:$0xff]  ;;  %v244_v28 = vld [vmem:[%s7823_s28 + $0x228] sm:$0xff] }
  0x17   : > { %7097 = vmatmul.mubr.msk.f32.vlgmr.msra.gmra.mxu1 %vm312_vm2, %v240_v19  ;;  %v187_v29 = vld [vmem:[%s7823_s28 + $0x60] sm:$0xff]  ;;  %v245_v30 = vld [vmem:[%s7823_s28 + $0x230] sm:$0xff]  ;;  %v188_v32 = vld [vmem:[%s7823_s28 + $0x68] sm:$0xff] }
  0x18   : > { %7004 = vmatmul.mubr.msk.f32.gmra.mxu0 %vm312_vm2, %v178_v12  ;;  %7099 = vmatprep.mubr.msk.f32.mxu1 %vm312_vm2, %v241_v21  ;;  %v246_v33 = vld [vmem:[%s7823_s28 + $0x238] sm:$0xff]  ;;  %v189_v34 = vld [vmem:[%s7823_s28 + $0x70] sm:$0xff]  ;;  %v247_v35 = vld [vmem:[%s7823_s28 + $0x240] sm:$0xff] }
  0x19   : > { %7006 = vmatprep.mubr.msk.f32.mxu0 %vm312_vm2, %v179_v13  ;;  %7193 = vmatpush3.bf16.msra.mxu1 %v1962_v8  ;;  %v190_v36 = vld [vmem:[%s7823_s28 + $0x78] sm:$0xff]  ;;  %v248_v37 = vld [vmem:[%s7823_s28 + $0x248] sm:$0xff]  ;;  %v191_v38 = vld [vmem:[%s7823_s28 + $0x80] sm:$0xff] }
  0x1a   : > { %7194 = vmatprep.subr.bf16.mxu1 %v7745_v20  ;;  %v249_v39 = vld [vmem:[%s7823_s28 + $0x250] sm:$0xff]  ;;  %v192_v40 = vld [vmem:[%s7823_s28 + $0x88] sm:$0xff]  ;;  %v250_v41 = vld [vmem:[%s7823_s28 + $0x258] sm:$0xff] }
  0x1b   : > { %7100 = vmatmul.mubr.msk.f32.gmra.mxu1 %vm312_vm2, %v242_v23  ;;  %v193_v42 = vld [vmem:[%s7823_s28 + $0x90] sm:$0xff]  ;;  %v251_v43 = vld [vmem:[%s7823_s28 + $0x260] sm:$0xff]  ;;  %v194_v44 = vld [vmem:[%s7823_s28 + $0x98] sm:$0xff] }
  0x1c   : > { %7007 = vmatmul.mubr.msk.f32.gmra.mxu0 %vm312_vm2, %v180_v14  ;;  %7102 = vmatprep.mubr.msk.f32.mxu1 %vm312_vm2, %v243_v25  ;;  %v252_v45 = vld [vmem:[%s7823_s28 + $0x268] sm:$0xff]  ;;  %v195_v46 = vld [vmem:[%s7823_s28 + $0xa0] sm:$0xff]  ;;  %v253_v47 = vld [vmem:[%s7823_s28 + $0x270] sm:$0xff] }
  0x1d   : > { %7009 = vmatprep.mubr.msk.f32.mxu0 %vm312_vm2, %v181_v15  ;;  %7195 = vmatpush3.bf16.msra.mxu1 %v7745_v20  ;;  %v196_v48 = vld [vmem:[%s7823_s28 + $0xa8] sm:$0xff]  ;;  %v254_v49 = vld [vmem:[%s7823_s28 + $0x278] sm:$0xff]  ;;  %v197_v51 = vld [vmem:[%s7823_s28 + $0xb0] sm:$0xff] }
  0x1e   : > { %7196 = vmatprep.subr.bf16.mxu1 %v7746_v26  ;;  %v255_v52 = vld [vmem:[%s7823_s28 + $0x280] sm:$0xff]  ;;  %v198_v53 = vld [vmem:[%s7823_s28 + $0xb8] sm:$0xff]  ;;  %v256_v54 = vld [vmem:[%s7823_s28 + $0x288] sm:$0xff] }
  0x1f   : > { %7103 = vmatmul.mubr.msk.f32.gmra.mxu1 %vm312_vm2, %v244_v28  ;;  %v199_v55 = vld [vmem:[%s7823_s28 + $0xc0] sm:$0xff]  ;;  %v257_v56 = vld [vmem:[%s7823_s28 + $0x290] sm:$0xff]  ;;  %v200_v57 = vld [vmem:[%s7823_s28 + $0xc8] sm:$0xff] }
  0x20   : > { %7010 = vmatmul.mubr.msk.f32.gmra.mxu0 %vm312_vm2, %v182_v16  ;;  %7105 = vmatprep.mubr.msk.f32.mxu1 %vm312_vm2, %v245_v30  ;;  %v258_v58 = vld [vmem:[%s7823_s28 + $0x298] sm:$0xff]  ;;  %v201_v59 = vld [vmem:[%s7823_s28 + $0xd0] sm:$0xff]  ;;  %v259_v60 = vld [vmem:[%s7823_s28 + $0x2a0] sm:$0xff] }
  0x21   : > { %7012 = vmatprep.mubr.msk.f32.mxu0 %vm312_vm2, %v183_v17  ;;  %7197 = vmatpush3.bf16.msra.mxu1 %v7746_v26  ;;  %v202_v61 = vld [vmem:[%s7823_s28 + $0xd8] sm:$0xff]  ;;  %v260_v62 = vld [vmem:[%s7823_s28 + $0x2a8] sm:$0xff]  ;;  %v203_v63 = vld [vmem:[%s7823_s28 + $0xe0] sm:$0xff] }
  0x22   : > { %7198 = vmatprep.subr.bf16.mxu1 %v7747_v31  ;;  %v261_v0 = vld [vmem:[%s7823_s28 + $0x2b0] sm:$0xff]  ;;  %v204_v1 = vld [vmem:[%s7823_s28 + $0xe8] sm:$0xff]  ;;  %v262_v2 = vld [vmem:[%s7823_s28 + $0x2b8] sm:$0xff] }
  0x23   : > { %7106 = vmatmul.mubr.msk.f32.gmra.mxu1 %vm312_vm2, %v246_v33  ;;  %v205_v3 = vld [vmem:[%s7823_s28 + $0xf0] sm:$0xff]  ;;  %v263_v5 = vld [vmem:[%s7823_s28 + $0x2c0] sm:$0xff]  ;;  %v206_v6 = vld [vmem:[%s7823_s28 + $0xf8] sm:$0xff] }
  0x24   : > { %7013 = vmatmul.mubr.msk.f32.gmra.mxu0 %vm312_vm2, %v184_v22  ;;  %7108 = vmatprep.mubr.msk.f32.mxu1 %vm312_vm2, %v247_v35  ;;  %v264_v7 = vld [vmem:[%s7823_s28 + $0x2c8] sm:$0xff]  ;;  %v207_v8 = vld [vmem:[%s7823_s28 + $0x100] sm:$0xff]  ;;  %v265_v9 = vld [vmem:[%s7823_s28 + $0x2d0] sm:$0xff] }
  0x25   : > { %7015 = vmatprep.mubr.msk.f32.mxu0 %vm312_vm2, %v185_v24  ;;  %7199 = vmatpush3.bf16.msra.mxu1 %v7747_v31  ;;  %v208_v10 = vld [vmem:[%s7823_s28 + $0x108] sm:$0xff]  ;;  %v266_v11 = vld [vmem:[%s7823_s28 + $0x2d8] sm:$0xff]  ;;  %v209_v12 = vld [vmem:[%s7823_s28 + $0x110] sm:$0xff] }
  0x26   : > { %7200 = vmatprep.subr.bf16.mxu1 %v7748_v50  ;;  %v267_v13 = vld [vmem:[%s7823_s28 + $0x2e0] sm:$0xff]  ;;  %v210_v14 = vld [vmem:[%s7823_s28 + $0x118] sm:$0xff]  ;;  %v268_v15 = vld [vmem:[%s7823_s28 + $0x2e8] sm:$0xff] }
  0x27   : > { %7109 = vmatmul.mubr.msk.f32.gmra.mxu1 %vm312_vm2, %v248_v37  ;;  %v211_v16 = vld [vmem:[%s7823_s28 + $0x120] sm:$0xff]  ;;  %v269_v17 = vld [vmem:[%s7823_s28 + $0x2f0] sm:$0xff]  ;;  %v212_v18 = vld [vmem:[%s7823_s28 + $0x128] sm:$0xff] }
  0x28   : > { %7016 = vmatmul.mubr.msk.f32.gmra.mxu0 %vm312_vm2, %v186_v27  ;;  %7111 = vmatprep.mubr.msk.f32.mxu1 %vm312_vm2, %v249_v39  ;;  %v270_v19 = vld [vmem:[%s7823_s28 + $0x2f8] sm:$0xff]  ;;  %v213_v20 = vld [vmem:[%s7823_s28 + $0x130] sm:$0xff]  ;;  %v271_v21 = vld [vmem:[%s7823_s28 + $0x300] sm:$0xff] }
  0x29   : > { %7018 = vmatprep.mubr.msk.f32.mxu0 %vm312_vm2, %v187_v29  ;;  %7201 = vmatpush3.bf16.msra.mxu1 %v7748_v50  ;;  %v214_v22 = vld [vmem:[%s7823_s28 + $0x138] sm:$0xff]  ;;  %v272_v23 = vld [vmem:[%s7823_s28 + $0x308] sm:$0xff]  ;;  %v215_v24 = vld [vmem:[%s7823_s28 + $0x140] sm:$0xff] }
  0x2a   : > { %v273_v25 = vld [vmem:[%s7823_s28 + $0x310] sm:$0xff]  ;;  %v216_v26 = vld [vmem:[%s7823_s28 + $0x148] sm:$0xff]  ;;  %v274_v27 = vld [vmem:[%s7823_s28 + $0x318] sm:$0xff] }
  0x2b   : > { %7112 = vmatmul.mubr.msk.f32.gmra.mxu1 %vm312_vm2, %v250_v41  ;;  %v217_v28 = vld [vmem:[%s7823_s28 + $0x150] sm:$0xff]  ;;  %v275_v29 = vld [vmem:[%s7823_s28 + $0x320] sm:$0xff]  ;;  %v218_v30 = vld [vmem:[%s7823_s28 + $0x158] sm:$0xff] }
  0x2c   : > { %7019 = vmatmul.mubr.msk.f32.gmra.mxu0 %vm312_vm2, %v188_v32  ;;  %7114 = vmatprep.mubr.msk.f32.mxu1 %vm312_vm2, %v251_v43  ;;  %v276_v31 = vld [vmem:[%s7823_s28 + $0x328] sm:$0xff]  ;;  %v219_v32 = vld [vmem:[%s7823_s28 + $0x160] sm:$0xff]  ;;  %v277_v33 = vld [vmem:[%s7823_s28 + $0x330] sm:$0xff] }
  0x2d   : > { %7021 = vmatprep.mubr.msk.f32.mxu0 %vm312_vm2, %v189_v34  ;;  %v220_v34 = vld [vmem:[%s7823_s28 + $0x168] sm:$0xff]  ;;  %v278_v35 = vld [vmem:[%s7823_s28 + $0x338] sm:$0xff]  ;;  %v279_v37 = vld [vmem:[%s7823_s28 + $0x340] sm:$0xff] }
  0x2e   : > { %v280_v39 = vld [vmem:[%s7823_s28 + $0x348] sm:$0xff]  ;;  %v281_v41 = vld [vmem:[%s7823_s28 + $0x350] sm:$0xff]  ;;  %v282_v43 = vld [vmem:[%s7823_s28 + $0x358] sm:$0xff] }
  0x2f   : > { %7115 = vmatmul.mubr.msk.f32.gmra.mxu1 %vm312_vm2, %v252_v45  ;;  %v283_v45 = vld [vmem:[%s7823_s28 + $0x360] sm:$0xff]  ;;  %v228_v50 = vld [vmem:[%s7823_s28 + $0x1a8] sm:$0xff] }
  0x30   : > { %7022 = vmatmul.mubr.msk.f32.gmra.mxu0 %vm312_vm2, %v190_v36  ;;  %7117 = vmatprep.mubr.msk.f32.mxu1 %vm312_vm2, %v253_v47  ;;  %v221_v36 = vld [vmem:[%s7823_s28 + $0x170] sm:$0xff]  ;;  %v284_v47 = vld [vmem:[%s7823_s28 + $0x368] sm:$0xff] }
  0x31   : > { %7024 = vmatprep.mubr.msk.f32.mxu0 %vm312_vm2, %v191_v38  ;;  %v222_v38 = vld [vmem:[%s7823_s28 + $0x178] sm:$0xff] }
  0x33   : > { %7118 = vmatmul.mubr.msk.f32.gmra.mxu1 %vm312_vm2, %v254_v49  ;;  %v285_v49 = vld [vmem:[%s7823_s28 + $0x370] sm:$0xff] }
  0x34   : > { %7025 = vmatmul.mubr.msk.f32.gmra.mxu0 %vm312_vm2, %v192_v40  ;;  %7120 = vmatprep.mubr.msk.f32.mxu1 %vm312_vm2, %v255_v52  ;;  %v223_v40 = vld [vmem:[%s7823_s28 + $0x180] sm:$0xff]  ;;  %v229_v52 = vld [vmem:[%s7823_s28 + $0x1b0] sm:$0xff] }
  0x35   : > { %7027 = vmatprep.mubr.msk.f32.mxu0 %vm312_vm2, %v193_v42  ;;  %v224_v42 = vld [vmem:[%s7823_s28 + $0x188] sm:$0xff] }
  0x37   : > { %7121 = vmatmul.mubr.msk.f32.gmra.mxu1 %vm312_vm2, %v256_v54  ;;  %v230_v54 = vld [vmem:[%s7823_s28 + $0x1b8] sm:$0xff] }
  0x38   : > { %7028 = vmatmul.mubr.msk.f32.gmra.mxu0 %vm312_vm2, %v194_v44  ;;  %7123 = vmatprep.mubr.msk.f32.mxu1 %vm312_vm2, %v257_v56  ;;  %v225_v44 = vld [vmem:[%s7823_s28 + $0x190] sm:$0xff]  ;;  %v231_v56 = vld [vmem:[%s7823_s28 + $0x1c0] sm:$0xff] }
  0x39   : > { %7030 = vmatprep.mubr.msk.f32.mxu0 %vm312_vm2, %v195_v46  ;;  %v226_v46 = vld [vmem:[%s7823_s28 + $0x198] sm:$0xff] }
  0x3b   : > { %7124 = vmatmul.mubr.msk.f32.gmra.mxu1 %vm312_vm2, %v258_v58  ;;  %v232_v58 = vld [vmem:[%s7823_s28 + $0x1c8] sm:$0xff] }
  0x3c   : > { %7031 = vmatmul.mubr.msk.f32.gmra.mxu0 %vm312_vm2, %v196_v48  ;;  %7126 = vmatprep.mubr.msk.f32.mxu1 %vm312_vm2, %v259_v60  ;;  %v227_v48 = vld [vmem:[%s7823_s28 + $0x1a0] sm:$0xff]  ;;  %v233_v60 = vld [vmem:[%s7823_s28 + $0x1d0] sm:$0xff] }
  0x3d   : > { %7033 = vmatprep.mubr.msk.f32.mxu0 %vm312_vm2, %v197_v51  ;;  %v286_v51 = vld [vmem:[%s7823_s28 + $0x378] sm:$0xff] }
  0x3f   : > { %7127 = vmatmul.mubr.msk.f32.gmra.mxu1 %vm312_vm2, %v260_v62  ;;  %v234_v62 = vld [vmem:[%s7823_s28 + $0x1d8] sm:$0xff] }
  0x40   : > { %7034 = vmatmul.mubr.msk.f32.gmra.mxu0 %vm312_vm2, %v198_v53  ;;  %7129 = vmatprep.mubr.msk.f32.mxu1 %vm312_vm2, %v261_v0  ;;  %v287_v53 = vld [vmem:[%s7823_s28 + $0x380] sm:$0xff] }
  0x41   : > { %7036 = vmatprep.mubr.msk.f32.mxu0 %vm312_vm2, %v199_v55  ;;  %v288_v55 = vld [vmem:[%s7823_s28 + $0x388] sm:$0xff]  ;;  %v235_v0 = vld [vmem:[%s7823_s28 + $0x1e0] sm:$0xff] }
  0x43   : > { %7130 = vmatmul.mubr.msk.f32.gmra.mxu1 %vm312_vm2, %v262_v2  ;;  %v236_v2 = vld [vmem:[%s7823_s28 + $0x1e8] sm:$0xff] }
  0x44   : > { %7037 = vmatmul.mubr.msk.f32.gmra.mxu0 %vm312_vm2, %v200_v57  ;;  %7132 = vmatprep.mubr.msk.f32.mxu1 %vm312_vm2, %v263_v5  ;;  %v289_v57 = vld [vmem:[%s7823_s28 + $0x390] sm:$0xff] }
  0x45   : > { %7039 = vmatprep.mubr.msk.f32.mxu0 %vm312_vm2, %v201_v59  ;;  %v290_v59 = vld [vmem:[%s7823_s28 + $0x398] sm:$0xff]  ;;  %v237_v5 = vld [vmem:[%s7823_s28 + $0x1f0] sm:$0xff] }
  0x47   : > { %7133 = vmatmul.mubr.msk.f32.gmra.mxu1 %vm312_vm2, %v264_v7  ;;  %v238_v7 = vld [vmem:[%s7823_s28 + $0x1f8] sm:$0xff] }
  0x48   : > { %7040 = vmatmul.mubr.msk.f32.gmra.mxu0 %vm312_vm2, %v202_v61  ;;  %7135 = vmatprep.mubr.msk.f32.mxu1 %vm312_vm2, %v265_v9  ;;  %v291_v61 = vld [vmem:[%s7823_s28 + $0x3a0] sm:$0xff]  ;;  %v297_v9 = vld [vmem:[%s7823_s28 + $0x3d0] sm:$0xff] }
  0x49   : > { %7042 = vmatprep.mubr.msk.f32.mxu0 %vm312_vm2, %v203_v63  ;;  %v292_v63 = vld [vmem:[%s7823_s28 + $0x3a8] sm:$0xff] }
  0x4b   : > { %7136 = vmatmul.mubr.msk.f32.gmra.mxu1 %vm312_vm2, %v266_v11  ;;  %v299_v11 = vld [vmem:[%s7823_s28 + $0x3e0] sm:$0xff] }
  0x4c   : > { %7043 = vmatmul.mubr.msk.f32.gmra.mxu0 %vm312_vm2, %v204_v1  ;;  %7138 = vmatprep.mubr.msk.f32.mxu1 %vm312_vm2, %v267_v13  ;;  %v293_v1 = vld [vmem:[%s7823_s28 + $0x3b0] sm:$0xff] }
  0x4d   : > { %7045 = vmatprep.mubr.msk.f32.mxu0 %vm312_vm2, %v205_v3  ;;  %v294_v3 = vld [vmem:[%s7823_s28 + $0x3b8] sm:$0xff]  ;;  %v301_v13 = vld [vmem:[%s7823_s28 + $0x3f0] sm:$0xff] }
  0x4f   : > { %7139 = vmatmul.mubr.msk.f32.gmra.mxu1 %vm312_vm2, %v268_v15  ;;  %v7749_v15 = vld [vmem:[%s9489_s2 + $0x38] ss:$0 sps:$4 sm:$0x33]  }
  0x50   : > { %7046 = vmatmul.mubr.msk.f32.gmra.mxu0 %vm312_vm2, %v206_v6  ;;  %7141 = vmatprep.mubr.msk.f32.mxu1 %vm312_vm2, %v269_v17  ;;  %v295_v6 = vld [vmem:[%s7823_s28 + $0x3c0] sm:$0xff] }
  0x51   : > { %7048 = vmatprep.mubr.msk.f32.mxu0 %vm312_vm2, %v207_v8  ;;  %v296_v8 = vld [vmem:[%s7823_s28 + $0x3c8] sm:$0xff] }
  0x53   : > { %7142 = vmatmul.mubr.msk.f32.gmra.mxu1 %vm312_vm2, %v270_v19  ;;  %v308_v19 = vlaneseq }
  0x54   : > { %7049 = vmatmul.mubr.msk.f32.gmra.mxu0 %vm312_vm2, %v208_v10  ;;  %7144 = vmatprep.mubr.msk.f32.mxu1 %vm312_vm2, %v271_v21  ;;  %v298_v10 = vld [vmem:[%s7823_s28 + $0x3d8] sm:$0xff] }
  0x55   : > { %7051 = vmatprep.mubr.msk.f32.mxu0 %vm312_vm2, %v209_v12  ;;  %v300_v12 = vld [vmem:[%s7823_s28 + $0x3e8] sm:$0xff] }
  0x57   : > { %7145 = vmatmul.mubr.msk.f32.gmra.mxu1 %vm312_vm2, %v272_v23 }
  0x58   : > { %7052 = vmatmul.mubr.msk.f32.gmra.mxu0 %vm312_vm2, %v210_v14  ;;  %7147 = vmatprep.mubr.msk.f32.mxu1 %vm312_vm2, %v273_v25  ;;  %v302_v14 = vld [vmem:[%s7823_s28 + $0x3f8] sm:$0xff]  ;;  %v8107_v25 = vand.u32 127, %v308_v19 }
  0x59   : > { %7054 = vmatprep.mubr.msk.f32.mxu0 %vm312_vm2, %v211_v16  ;;  %v2915_v16 = vsel %vm2914_vm3, 4294967295, %v9491_v4 }
  0x5a   : > { %v2916_v17 = vsel %vm697_vm0, %v2915_v16, 0  ;;  %vm1408_vm4 = vcmp.ge.s32.totalorder %v8107_v25, 2 }
  0x5b   : > { %7148 = vmatmul.mubr.msk.f32.gmra.mxu1 %vm312_vm2, %v274_v27 }
  0x5c   : > { %7055 = vmatmul.mubr.msk.f32.gmra.mxu0 %vm312_vm2, %v212_v18  ;;  %7150 = vmatprep.mubr.msk.f32.mxu1 %vm312_vm2, %v275_v29  ;;  %v2918_v18 = vand.u32 %v7749_v15, %v2916_v17 }
  0x5d   : > { %7057 = vmatprep.mubr.msk.f32.mxu0 %vm312_vm2, %v213_v20  ;;  %v8099_v20 = vshrl.u32 %v308_v19, 7 }
  0x5e   : > { %7330 = vmatprep.subr.bf16.mxu0 %v2918_v18 }
  0x5f   : > { %7151 = vmatmul.mubr.msk.f32.gmra.mxu1 %vm312_vm2, %v276_v31  ;;  %7331 = vmatpush3.bf16.msra.mxu0 %v2918_v18  ;;  %9493 = vst [vmem:[#allocation2_spill] sm:$0xff] %v8099_v20  ;;  %v310_v21 = vsub.s32 0, %v8099_v20  ;;  %v7750_v31 = vld [vmem:[%s9489_s2 + $0x30] sm:$0xff]  }
  0x60   : > { %7058 = vmatmul.mubr.msk.f32.gmra.mxu0 %vm312_vm2, %v214_v22  ;;  %7153 = vmatprep.mubr.msk.f32.mxu1 %vm312_vm2, %v277_v33  ;;  %v303_v22 = vld [vmem:[%s9488_s1 + $0x20] sm:$0xff] }
  0x61   : > { %7060 = vmatprep.mubr.msk.f32.mxu0 %vm312_vm2, %v215_v24  ;;  %v8105_v23 = vrot.slane %v303_v22, %v310_v21  ;;  %7332 = vmatprep.subr.bf16.mxu0 %v7750_v31 }
  0x63   : > { %7154 = vmatmul.mubr.msk.f32.gmra.mxu1 %vm312_vm2, %v278_v35  ;;  %7333 = vmatpush3.bf16.msra.mxu0 %v7750_v31 }
  0x64   : > { %7061 = vmatmul.mubr.msk.f32.gmra.mxu0 %vm312_vm2, %v216_v26  ;;  %7156 = vmatprep.mubr.msk.f32.mxu1 %vm312_vm2, %v279_v37 }
  0x65   : > { %7063 = vmatprep.mubr.msk.f32.mxu0 %vm312_vm2, %v217_v28 }
  0x67   : > { %7157 = vmatmul.mubr.msk.f32.gmra.mxu1 %vm312_vm2, %v280_v39 }
  0x68   : > { %7064 = vmatmul.mubr.msk.f32.gmra.mxu0 %vm312_vm2, %v218_v30  ;;  %7159 = vmatprep.mubr.msk.f32.mxu1 %vm312_vm2, %v281_v41 }
  0x69   : > { %7066 = vmatprep.mubr.msk.f32.mxu0 %vm312_vm2, %v219_v32 }
  0x6b   : > { %7160 = vmatmul.mubr.msk.f32.gmra.mxu1 %vm312_vm2, %v282_v43 }
  0x6c   : > { %7067 = vmatmul.mubr.msk.f32.gmra.mxu0 %vm312_vm2, %v220_v34  ;;  %7162 = vmatprep.mubr.msk.f32.mxu1 %vm312_vm2, %v283_v45 }
  0x6d   : > { %7069 = vmatprep.mubr.msk.f32.mxu0 %vm312_vm2, %v221_v36 }
  0x6f   : > { %7163 = vmatmul.mubr.msk.f32.gmra.mxu1 %vm312_vm2, %v284_v47 }
  0x70   : > { %7070 = vmatmul.mubr.msk.f32.gmra.mxu0 %vm312_vm2, %v222_v38  ;;  %7165 = vmatprep.mubr.msk.f32.mxu1 %vm312_vm2, %v285_v49 }
  0x71   : > { %7072 = vmatprep.mubr.msk.f32.mxu0 %vm312_vm2, %v223_v40 }
  0x73   : > { %7166 = vmatmul.mubr.msk.f32.gmra.mxu1 %vm312_vm2, %v286_v51 }
  0x74   : > { %7073 = vmatmul.mubr.msk.f32.gmra.mxu0 %vm312_vm2, %v224_v42  ;;  %7168 = vmatprep.mubr.msk.f32.mxu1 %vm312_vm2, %v287_v53 }
  0x75   : > { %7075 = vmatprep.mubr.msk.f32.mxu0 %vm312_vm2, %v225_v44 }
  0x77   : > { %7169 = vmatmul.mubr.msk.f32.gmra.mxu1 %vm312_vm2, %v288_v55 }
  0x78   : > { %7076 = vmatmul.mubr.msk.f32.gmra.mxu0 %vm312_vm2, %v226_v46  ;;  %7171 = vmatprep.mubr.msk.f32.mxu1 %vm312_vm2, %v289_v57 }
  0x79   : > { %7078 = vmatprep.mubr.msk.f32.mxu0 %vm312_vm2, %v227_v48 }
  0x7b   : > { %7172 = vmatmul.mubr.msk.f32.gmra.mxu1 %vm312_vm2, %v290_v59 }
  0x7c   : > { %7079 = vmatmul.mubr.msk.f32.gmra.mxu0 %vm312_vm2, %v228_v50  ;;  %7174 = vmatprep.mubr.msk.f32.mxu1 %vm312_vm2, %v291_v61 }
  0x7d   : > { %7081 = vmatprep.mubr.msk.f32.mxu0 %vm312_vm2, %v229_v52 }
  0x7f   : > { %7175 = vmatmul.mubr.msk.f32.gmra.mxu1 %vm312_vm2, %v292_v63 }
  0x80   : > { %7082 = vmatmul.mubr.msk.f32.gmra.mxu0 %vm312_vm2, %v230_v54  ;;  %7177 = vmatprep.mubr.msk.f32.mxu1 %vm312_vm2, %v293_v1 }
  0x81   : > { %7084 = vmatprep.mubr.msk.f32.mxu0 %vm312_vm2, %v231_v56 }
  0x83   : > { %7178 = vmatmul.mubr.msk.f32.gmra.mxu1 %vm312_vm2, %v294_v3 }
  0x84   : > { %7085 = vmatmul.mubr.msk.f32.gmra.mxu0 %vm312_vm2, %v232_v58  ;;  %7180 = vmatprep.mubr.msk.f32.mxu1 %vm312_vm2, %v295_v6 }
  0x85   : > { %7087 = vmatprep.mubr.msk.f32.mxu0 %vm312_vm2, %v233_v60 }
  0x87   : > { %7181 = vmatmul.mubr.msk.f32.gmra.mxu1 %vm312_vm2, %v296_v8 }
  0x88   : > { %7088 = vmatmul.mubr.msk.f32.gmra.mxu0 %vm312_vm2, %v234_v62  ;;  %7183 = vmatprep.mubr.msk.f32.mxu1 %vm312_vm2, %v297_v9 }
  0x89   : > { %7090 = vmatprep.mubr.msk.f32.mxu0 %vm312_vm2, %v235_v0 }
  0x8b   : > { %7184 = vmatmul.mubr.msk.f32.gmra.mxu1 %vm312_vm2, %v298_v10 }
  0x8c   : > { %7091 = vmatmul.mubr.msk.f32.gmra.mxu0 %vm312_vm2, %v236_v2  ;;  %7186 = vmatprep.mubr.msk.f32.mxu1 %vm312_vm2, %v299_v11 }
  0x8d   : > { %7093 = vmatprep.mubr.msk.f32.mxu0 %vm312_vm2, %v237_v5 }
  0x8f   : > { %7187 = vmatmul.mubr.msk.f32.gmra.mxu1 %vm312_vm2, %v300_v12 }
  0x90   : > { %7094 = vmatmul.mubr.msk.f32.gmra.mxu0 %vm312_vm2, %v238_v7  ;;  %7189 = vmatprep.mubr.msk.f32.mxu1 %vm312_vm2, %v301_v13 }
  0x93   : > { %7190 = vmatmul.mubr.msk.f32.gmra.mxu1 %vm312_vm2, %v302_v14 }
  0xd4   : > { %v7002_v24 = vpop.f32.mrf.mxu0 }
  0xd5   : > { %v773_v26 = vadd.f32 %v7002_v24, %v8105_v23 }
  0xd6   : > { %v767_v27 = vpop.f32.mrf.mxu0 }
  0xd7   : > { %v1410_v28 = vmax.f32 %v773_v26, 0.0  ;;  %v768_v29 = vadd.f32 %v767_v27, %v8105_v23  ;;  %v8128_v50 = vpop.f32.mrf.mxu1 }
  0xd8   : > { %v7005_v30 = vpop.f32.mrf.mxu0 }
  0xd9   : > { %v1409_v32 = vmax.f32 %v768_v29, 0.0  ;;  %v783_v33 = vadd.f32 %v7005_v30, %v8105_v23  ;;  %v1538_v35 = vsel %vm1408_vm4, %v1410_v28, %v773_v26  ;;  %v8132_v54 = vpop.f32.mrf.mxu1 }
  0xda   : > { %v777_v34 = vpop.f32.mrf.mxu0 }
  0xdb   : > { %v1537_v36 = vsel %vm1408_vm4, %v1409_v32, %v768_v29  ;;  %v1412_v37 = vmax.f32 %v783_v33, 0.0  ;;  %v778_v38 = vadd.f32 %v777_v34, %v8105_v23  ;;  %v8139_v61 = vpop.f32.mrf.mxu1 }
  0xdc   : > { %v1665_v39 = vpack.c.bf16 %v1538_v35, %v1537_v36  ;;  %v7008_v40 = vpop.f32.mrf.mxu0 }
  0xdd   : > { %v1411_v41 = vmax.f32 %v778_v38, 0.0  ;;  %v793_v42 = vadd.f32 %v7008_v40, %v8105_v23  ;;  %v1540_v44 = vsel %vm1408_vm4, %v1412_v37, %v783_v33  ;;  %v8143_v1 = vpop.f32.mrf.mxu1 }
  0xde   : > { %v787_v43 = vpop.f32.mrf.mxu0  ;;  %7202 = vmatprep.mubr.msk.bf16.mxu1 %vm1765_vm5, %v1665_v39 }
  0xdf   : > { %v1539_v45 = vsel %vm1408_vm4, %v1411_v41, %v778_v38  ;;  %v1414_v46 = vmax.f32 %v793_v42, 0.0  ;;  %v788_v47 = vadd.f32 %v787_v43, %v8105_v23  ;;  %v8150_v9 = vpop.f32.mrf.mxu1 }
  0xe0   : > { %v1666_v48 = vpack.c.bf16 %v1540_v44, %v1539_v45  ;;  %v7011_v49 = vpop.f32.mrf.mxu0 }
  0xe1   : > { %v1413_v51 = vmax.f32 %v788_v47, 0.0  ;;  %v803_v52 = vadd.f32 %v7011_v49, %v8105_v23  ;;  %v1542_v55 = vsel %vm1408_vm4, %v1414_v46, %v793_v42  ;;  %v8154_v13 = vpop.f32.mrf.mxu1  ;;  %v7751_v46 = vld [vmem:[%s9489_s2 + $0x48] ss:$0 sps:$4 sm:$0x11]  }
  0xe2   : > { %v797_v53 = vpop.f32.mrf.mxu0  ;;  %7203 = vmatmul.mubr.msk.bf16.vlgmr.msra.gmra.mxu1 %vm1765_vm5, %v1666_v48 }
  0xe3   : > { %v1541_v56 = vsel %vm1408_vm4, %v1413_v51, %v788_v47  ;;  %v1416_v57 = vmax.f32 %v803_v52, 0.0  ;;  %v798_v58 = vadd.f32 %v797_v53, %v8105_v23  ;;  %v8161_v21 = vpop.f32.mrf.mxu1 }
  0xe4   : > { %v1667_v59 = vpack.c.bf16 %v1542_v55, %v1541_v56  ;;  %v7014_v60 = vpop.f32.mrf.mxu0 }
  0xe5   : > { %v1415_v62 = vmax.f32 %v798_v58, 0.0  ;;  %v813_v63 = vadd.f32 %v7014_v60, %v8105_v23  ;;  %v1544_v2 = vsel %vm1408_vm4, %v1416_v57, %v803_v52  ;;  %v8165_v27 = vpop.f32.mrf.mxu1  ;;  %v7765_v52 = vmov 0  }
  0xe6   : > { %v807_v0 = vpop.f32.mrf.mxu0  ;;  %7206 = vmatprep.mubr.msk.bf16.mxu1 %vm1765_vm5, %v1667_v59  ;;  %v3863_v53 = vsel %vm2914_vm3, 65535, %v7765_v52 }
  0xe7   : > { %v1543_v3 = vsel %vm1408_vm4, %v1415_v62, %v798_v58  ;;  %v1418_v5 = vmax.f32 %v813_v63, 0.0  ;;  %v808_v6 = vadd.f32 %v807_v0, %v8105_v23  ;;  %v8172_v34 = vpop.f32.mrf.mxu1 }
  0xe8   : > { %v1668_v7 = vpack.c.bf16 %v1544_v2, %v1543_v3  ;;  %v7017_v8 = vpop.f32.mrf.mxu0 }
  0xe9   : > { %v1417_v10 = vmax.f32 %v808_v6, 0.0  ;;  %v823_v11 = vadd.f32 %v7017_v8, %v8105_v23  ;;  %v1546_v14 = vsel %vm1408_vm4, %v1418_v5, %v813_v63  ;;  %v8176_v38 = vpop.f32.mrf.mxu1  ;;  %v3865_v63 = vand.u32 %v7751_v46, %v3863_v53 }
  0xea   : > { %v817_v12 = vpop.f32.mrf.mxu0  ;;  %7207 = vmatmul.mubr.msk.bf16.gmra.mxu1 %vm1765_vm5, %v1668_v7 }
  0xeb   : > { %v1545_v15 = vsel %vm1408_vm4, %v1417_v10, %v808_v6  ;;  %v1420_v16 = vmax.f32 %v823_v11, 0.0  ;;  %v818_v17 = vadd.f32 %v817_v12, %v8105_v23  ;;  %v8183_v45 = vpop.f32.mrf.mxu1  ;;  %7464 = vmatprep.subr.bf16.mxu1 %v3865_v63 }
  0xec   : > { %v1669_v18 = vpack.c.bf16 %v1546_v14, %v1545_v15  ;;  %v7020_v19 = vpop.f32.mrf.mxu0  ;;  %7465 = vmatpush3.bf16.msra.mxu1 %v3865_v63 }
  0xed   : > { %v1419_v22 = vmax.f32 %v818_v17, 0.0  ;;  %v833_v24 = vadd.f32 %v7020_v19, %v8105_v23  ;;  %v1548_v28 = vsel %vm1408_vm4, %v1420_v16, %v823_v11  ;;  %v8190_v51 = vpop.f32.mrf.mxu1 }
  0xee   : > { %v827_v26 = vpop.f32.mrf.mxu0  ;;  %7210 = vmatprep.mubr.msk.bf16.mxu1 %vm1765_vm5, %v1669_v18 }
  0xef   : > { %v1547_v29 = vsel %vm1408_vm4, %v1419_v22, %v818_v17  ;;  %v1422_v30 = vmax.f32 %v833_v24, 0.0  ;;  %v828_v31 = vadd.f32 %v827_v26, %v8105_v23  ;;  %v8198_v62 = vpop.f32.mrf.mxu1 }
  0xf0   : > { %v1670_v32 = vpack.c.bf16 %v1548_v28, %v1547_v29  ;;  %v7023_v33 = vpop.f32.mrf.mxu0 }
  0xf1   : > { %v1421_v35 = vmax.f32 %v828_v31, 0.0  ;;  %v843_v36 = vadd.f32 %v7023_v33, %v8105_v23  ;;  %v1550_v39 = vsel %vm1408_vm4, %v1422_v30, %v833_v24  ;;  %v8202_v5 = vpop.f32.mrf.mxu1 }
  0xf2   : > { %v837_v37 = vpop.f32.mrf.mxu0  ;;  %7211 = vmatmul.mubr.msk.bf16.gmra.mxu1 %vm1765_vm5, %v1670_v32 }
  0xf3   : > { %v1549_v40 = vsel %vm1408_vm4, %v1421_v35, %v828_v31  ;;  %v1424_v41 = vmax.f32 %v843_v36, 0.0  ;;  %v838_v42 = vadd.f32 %v837_v37, %v8105_v23  ;;  %v8209_v14 = vpop.f32.mrf.mxu1 }
  0xf4   : > { %v1671_v43 = vpack.c.bf16 %v1550_v39, %v1549_v40  ;;  %v7026_v44 = vpop.f32.mrf.mxu0 }
  0xf5   : > { %v1423_v47 = vmax.f32 %v838_v42, 0.0  ;;  %v853_v48 = vadd.f32 %v7026_v44, %v8105_v23  ;;  %v1552_v55 = vsel %vm1408_vm4, %v1424_v41, %v843_v36  ;;  %v8213_v18 = vpop.f32.mrf.mxu1  ;;  %v7752_v41 = vld [vmem:[%s9489_s2 + $0x28] sm:$0xff]  }
  0xf6   : > { %v847_v49 = vpop.f32.mrf.mxu0  ;;  %7214 = vmatprep.mubr.msk.bf16.mxu1 %vm1765_vm5, %v1671_v43  ;;  %7334 = vmatprep.subr.bf16.mxu0 %v7752_v41 }
  0xf7   : > { %v1551_v56 = vsel %vm1408_vm4, %v1423_v47, %v838_v42  ;;  %v1426_v57 = vmax.f32 %v853_v48, 0.0  ;;  %v848_v58 = vadd.f32 %v847_v49, %v8105_v23  ;;  %v8220_v30 = vpop.f32.mrf.mxu1  ;;  %7335 = vmatpush3.bf16.msra.mxu0 %v7752_v41 }
  0xf8   : > { %v1672_v59 = vpack.c.bf16 %v1552_v55, %v1551_v56  ;;  %v7029_v60 = vpop.f32.mrf.mxu0 }
  0xf9   : > { %v1425_v0 = vmax.f32 %v848_v58, 0.0  ;;  %v863_v2 = vadd.f32 %v7029_v60, %v8105_v23  ;;  %v1554_v6 = vsel %vm1408_vm4, %v1426_v57, %v853_v48  ;;  %v8224_v35 = vpop.f32.mrf.mxu1 }
  0xfa   : > { %v857_v3 = vpop.f32.mrf.mxu0  ;;  %7215 = vmatmul.mubr.msk.bf16.gmra.mxu1 %vm1765_vm5, %v1672_v59 }
  0xfb   : > { %v1553_v7 = vsel %vm1408_vm4, %v1425_v0, %v848_v58  ;;  %v1428_v8 = vmax.f32 %v863_v2, 0.0  ;;  %v858_v10 = vadd.f32 %v857_v3, %v8105_v23  ;;  %v8234_v44 = vpop.f32.mrf.mxu1 }
  0xfc   : > { %v1673_v11 = vpack.c.bf16 %v1554_v6, %v1553_v7  ;;  %v7032_v12 = vpop.f32.mrf.mxu0 }
  0xfd   : > { %v1427_v15 = vmax.f32 %v858_v10, 0.0  ;;  %v873_v16 = vadd.f32 %v7032_v12, %v8105_v23  ;;  %v1556_v19 = vsel %vm1408_vm4, %v1428_v8, %v863_v2  ;;  %v8238_v49 = vpop.f32.mrf.mxu1 }
  0xfe   : > { %v867_v17 = vpop.f32.mrf.mxu0  ;;  %7218 = vmatprep.mubr.msk.bf16.mxu1 %vm1765_vm5, %v1673_v11 }
  0xff   : > { %v1555_v22 = vsel %vm1408_vm4, %v1427_v15, %v858_v10  ;;  %v1430_v24 = vmax.f32 %v873_v16, 0.0  ;;  %v868_v26 = vadd.f32 %v867_v17, %v8105_v23  ;;  %v8245_v59 = vpop.f32.mrf.mxu1 }
 0x100   : > { %v1674_v28 = vpack.c.bf16 %v1556_v19, %v1555_v22  ;;  %v7035_v29 = vpop.f32.mrf.mxu0 }
 0x101   : > { %v1429_v31 = vmax.f32 %v868_v26, 0.0  ;;  %v883_v32 = vadd.f32 %v7035_v29, %v8105_v23  ;;  %v1558_v36 = vsel %vm1408_vm4, %v1430_v24, %v873_v16  ;;  %v8249_v2 = vpop.f32.mrf.mxu1 }
 0x102   : > { %v877_v33 = vpop.f32.mrf.mxu0  ;;  %7219 = vmatmul.mubr.msk.bf16.gmra.mxu1 %vm1765_vm5, %v1674_v28 }
 0x103   : > { %v1557_v37 = vsel %vm1408_vm4, %v1429_v31, %v868_v26  ;;  %v1432_v39 = vmax.f32 %v883_v32, 0.0  ;;  %v878_v40 = vadd.f32 %v877_v33, %v8105_v23  ;;  %v8256_v12 = vpop.f32.mrf.mxu1 }
 0x104   : > { %v1675_v42 = vpack.c.bf16 %v1558_v36, %v1557_v37  ;;  %v7038_v43 = vpop.f32.mrf.mxu0 }
 0x105   : > { %v1431_v46 = vmax.f32 %v878_v40, 0.0  ;;  %v893_v47 = vadd.f32 %v7038_v43, %v8105_v23  ;;  %v1560_v52 = vsel %vm1408_vm4, %v1432_v39, %v883_v32  ;;  %v8260_v19 = vpop.f32.mrf.mxu1 }
 0x106   : > { %v887_v48 = vpop.f32.mrf.mxu0  ;;  %7222 = vmatprep.mubr.msk.bf16.mxu1 %vm1765_vm5, %v1675_v42 }
 0x107   : > { %v1559_v53 = vsel %vm1408_vm4, %v1431_v46, %v878_v40  ;;  %v1434_v55 = vmax.f32 %v893_v47, 0.0  ;;  %v888_v56 = vadd.f32 %v887_v48, %v8105_v23  ;;  %v8267_v32 = vpop.f32.mrf.mxu1 }
 0x108   : > { %v1676_v57 = vpack.c.bf16 %v1560_v52, %v1559_v53  ;;  %v7041_v58 = vpop.f32.mrf.mxu0 }
 0x109   : > { %v1433_v60 = vmax.f32 %v888_v56, 0.0  ;;  %v903_v63 = vadd.f32 %v7041_v58, %v8105_v23  ;;  %v1562_v3 = vsel %vm1408_vm4, %v1434_v55, %v893_v47  ;;  %v8271_v39 = vpop.f32.mrf.mxu1 }
 0x10a   : > { %v897_v0 = vpop.f32.mrf.mxu0  ;;  %7223 = vmatmul.mubr.msk.bf16.gmra.mxu1 %vm1765_vm5, %v1676_v57 }
 0x10b   : > { %v1561_v6 = vsel %vm1408_vm4, %v1433_v60, %v888_v56  ;;  %v1436_v7 = vmax.f32 %v903_v63, 0.0  ;;  %v898_v8 = vadd.f32 %v897_v0, %v8105_v23  ;;  %v8278_v48 = vpop.f32.mrf.mxu1 }
 0x10c   : > { %v1677_v10 = vpack.c.bf16 %v1562_v3, %v1561_v6  ;;  %v7044_v11 = vpop.f32.mrf.mxu0 }
 0x10d   : > { %v1435_v15 = vmax.f32 %v898_v8, 0.0  ;;  %v913_v16 = vadd.f32 %v7044_v11, %v8105_v23  ;;  %v1564_v22 = vsel %vm1408_vm4, %v1436_v7, %v903_v63  ;;  %v8282_v56 = vpop.f32.mrf.mxu1 }
 0x10e   : > { %v907_v17 = vpop.f32.mrf.mxu0  ;;  %7226 = vmatprep.mubr.msk.bf16.mxu1 %vm1765_vm5, %v1677_v10 }
 0x10f   : > { %v1563_v24 = vsel %vm1408_vm4, %v1435_v15, %v898_v8  ;;  %v1438_v26 = vmax.f32 %v913_v16, 0.0  ;;  %v908_v28 = vadd.f32 %v907_v17, %v8105_v23  ;;  %v8289_v6 = vpop.f32.mrf.mxu1 }
 0x110   : > { %v1678_v29 = vpack.c.bf16 %v1564_v22, %v1563_v24  ;;  %v7047_v31 = vpop.f32.mrf.mxu0 }
 0x111   : > { %v1437_v33 = vmax.f32 %v908_v28, 0.0  ;;  %v923_v36 = vadd.f32 %v7047_v31, %v8105_v23  ;;  %v1566_v40 = vsel %vm1408_vm4, %v1438_v26, %v913_v16  ;;  %v8293_v11 = vpop.f32.mrf.mxu1 }
 0x112   : > { %v917_v37 = vpop.f32.mrf.mxu0  ;;  %7227 = vmatmul.mubr.msk.bf16.gmra.mxu1 %vm1765_vm5, %v1678_v29 }
 0x113   : > { %v1565_v41 = vsel %vm1408_vm4, %v1437_v33, %v908_v28  ;;  %v1440_v42 = vmax.f32 %v923_v36, 0.0  ;;  %v918_v43 = vadd.f32 %v917_v37, %v8105_v23  ;;  %v8300_v28 = vpop.f32.mrf.mxu1 }
 0x114   : > { %v1679_v46 = vpack.c.bf16 %v1566_v40, %v1565_v41  ;;  %v7050_v47 = vpop.f32.mrf.mxu0 }
 0x115   : > { %v1439_v52 = vmax.f32 %v918_v43, 0.0  ;;  %v933_v53 = vadd.f32 %v7050_v47, %v8105_v23  ;;  %v1568_v57 = vsel %vm1408_vm4, %v1440_v42, %v923_v36 }
 0x116   : > { %v927_v55 = vpop.f32.mrf.mxu0  ;;  %7230 = vmatprep.mubr.msk.bf16.mxu1 %vm1765_vm5, %v1679_v46  ;;  %v8309_v46 = vpop.f32.mrf.mxu1 }
 0x117   : > { %v1567_v58 = vsel %vm1408_vm4, %v1439_v52, %v918_v43  ;;  %v1442_v60 = vmax.f32 %v933_v53, 0.0  ;;  %v928_v63 = vadd.f32 %v927_v55, %v8105_v23 }
 0x118   : > { %v1680_v0 = vpack.c.bf16 %v1568_v57, %v1567_v58  ;;  %v7053_v3 = vpop.f32.mrf.mxu0 }
 0x119   : > { %v1441_v7 = vmax.f32 %v928_v63, 0.0  ;;  %v943_v8 = vadd.f32 %v7053_v3, %v8105_v23  ;;  %v1570_v15 = vsel %vm1408_vm4, %v1442_v60, %v933_v53  ;;  %v8318_v3 = vpop.f32.mrf.mxu1 }
 0x11a   : > { %v937_v10 = vpop.f32.mrf.mxu0  ;;  %7231 = vmatmul.mubr.msk.bf16.gmra.mxu1 %vm1765_vm5, %v1680_v0 }
 0x11b   : > { %v1569_v16 = vsel %vm1408_vm4, %v1441_v7, %v928_v63  ;;  %v1444_v17 = vmax.f32 %v943_v8, 0.0  ;;  %v938_v22 = vadd.f32 %v937_v10, %v8105_v23 }
 0x11c   : > { %v1681_v24 = vpack.c.bf16 %v1570_v15, %v1569_v16  ;;  %v7056_v26 = vpop.f32.mrf.mxu0 }
 0x11d   : > { %v1443_v29 = vmax.f32 %v938_v22, 0.0  ;;  %v953_v31 = vadd.f32 %v7056_v26, %v8105_v23  ;;  %v1572_v36 = vsel %vm1408_vm4, %v1444_v17, %v943_v8 }
 0x11e   : > { %v947_v33 = vpop.f32.mrf.mxu0  ;;  %7234 = vmatprep.mubr.msk.bf16.mxu1 %vm1765_vm5, %v1681_v24 }
 0x11f   : > { %v1571_v37 = vsel %vm1408_vm4, %v1443_v29, %v938_v22  ;;  %v1446_v40 = vmax.f32 %v953_v31, 0.0  ;;  %v948_v41 = vadd.f32 %v947_v33, %v8105_v23  ;;  %v8327_v29 = vpop.f32.mrf.mxu1 }
 0x120   : > { %v1682_v42 = vpack.c.bf16 %v1572_v36, %v1571_v37  ;;  %v7059_v43 = vpop.f32.mrf.mxu0 }
 0x121   : > { %v1445_v47 = vmax.f32 %v948_v41, 0.0  ;;  %v963_v52 = vadd.f32 %v7059_v43, %v8105_v23  ;;  %v1574_v55 = vsel %vm1408_vm4, %v1446_v40, %v953_v31 }
 0x122   : > { %v957_v53 = vpop.f32.mrf.mxu0  ;;  %7235 = vmatmul.mubr.msk.bf16.gmra.mxu1 %vm1765_vm5, %v1682_v42 }
 0x123   : > { %v1573_v57 = vsel %vm1408_vm4, %v1445_v47, %v948_v41  ;;  %v1448_v58 = vmax.f32 %v963_v52, 0.0  ;;  %v958_v60 = vadd.f32 %v957_v53, %v8105_v23 }
 0x124   : > { %v1683_v63 = vpack.c.bf16 %v1574_v55, %v1573_v57  ;;  %v7062_v0 = vpop.f32.mrf.mxu0 }
 0x125   : > { %v1447_v7 = vmax.f32 %v958_v60, 0.0  ;;  %v973_v8 = vadd.f32 %v7062_v0, %v8105_v23  ;;  %v1576_v15 = vsel %vm1408_vm4, %v1448_v58, %v963_v52  ;;  %v8336_v52 = vpop.f32.mrf.mxu1 }
 0x126   : > { %v967_v10 = vpop.f32.mrf.mxu0  ;;  %7238 = vmatprep.mubr.msk.bf16.mxu1 %vm1765_vm5, %v1683_v63 }
 0x127   : > { %v1575_v16 = vsel %vm1408_vm4, %v1447_v7, %v958_v60  ;;  %v1450_v17 = vmax.f32 %v973_v8, 0.0  ;;  %v968_v22 = vadd.f32 %v967_v10, %v8105_v23  ;;  %v8345_v10 = vpop.f32.mrf.mxu1 }
 0x128   : > { %v1684_v24 = vpack.c.bf16 %v1576_v15, %v1575_v16  ;;  %v7065_v26 = vpop.f32.mrf.mxu0 }
 0x129   : > { %v1449_v31 = vmax.f32 %v968_v22, 0.0  ;;  %v983_v33 = vadd.f32 %v7065_v26, %v8105_v23  ;;  %v1578_v37 = vsel %vm1408_vm4, %v1450_v17, %v973_v8 }
 0x12a   : > { %v977_v36 = vpop.f32.mrf.mxu0  ;;  %7239 = vmatmul.mubr.msk.bf16.gmra.mxu1 %vm1765_vm5, %v1684_v24 }
 0x12b   : > { %v1577_v40 = vsel %vm1408_vm4, %v1449_v31, %v968_v22  ;;  %v1452_v41 = vmax.f32 %v983_v33, 0.0  ;;  %v978_v42 = vadd.f32 %v977_v36, %v8105_v23 }
 0x12c   : > { %v1685_v43 = vpack.c.bf16 %v1578_v37, %v1577_v40  ;;  %v7068_v47 = vpop.f32.mrf.mxu0  ;;  %v8354_v37 = vpop.f32.mrf.mxu1 }
 0x12d   : > { %v1451_v53 = vmax.f32 %v978_v42, 0.0  ;;  %v993_v55 = vadd.f32 %v7068_v47, %v8105_v23  ;;  %v1580_v58 = vsel %vm1408_vm4, %v1452_v41, %v983_v33 }
 0x12e   : > { %v987_v57 = vpop.f32.mrf.mxu0  ;;  %7242 = vmatprep.mubr.msk.bf16.mxu1 %vm1765_vm5, %v1685_v43 }
 0x12f   : > { %v1579_v60 = vsel %vm1408_vm4, %v1451_v53, %v978_v42  ;;  %v1454_v63 = vmax.f32 %v993_v55, 0.0  ;;  %v988_v0 = vadd.f32 %v987_v57, %v8105_v23 }
 0x130   : > { %v1686_v7 = vpack.c.bf16 %v1580_v58, %v1579_v60  ;;  %v7071_v8 = vpop.f32.mrf.mxu0  ;;  %v8363_v60 = vpop.f32.mrf.mxu1 }
 0x131   : > { %v1453_v15 = vmax.f32 %v988_v0, 0.0  ;;  %v1003_v16 = vadd.f32 %v7071_v8, %v8105_v23  ;;  %v1582_v22 = vsel %vm1408_vm4, %v1454_v63, %v993_v55 }
 0x132   : > { %v997_v17 = vpop.f32.mrf.mxu0  ;;  %7243 = vmatmul.mubr.msk.bf16.gmra.mxu1 %vm1765_vm5, %v1686_v7 }
 0x133   : > { %v1581_v24 = vsel %vm1408_vm4, %v1453_v15, %v988_v0  ;;  %v1456_v26 = vmax.f32 %v1003_v16, 0.0  ;;  %v998_v31 = vadd.f32 %v997_v17, %v8105_v23 }
 0x134   : > { %v1687_v33 = vpack.c.bf16 %v1582_v22, %v1581_v24  ;;  %v7074_v36 = vpop.f32.mrf.mxu0 }
 0x135   : > { %v1455_v40 = vmax.f32 %v998_v31, 0.0  ;;  %v1013_v41 = vadd.f32 %v7074_v36, %v8105_v23  ;;  %v1584_v43 = vsel %vm1408_vm4, %v1456_v26, %v1003_v16  ;;  %v8372_v26 = vpop.f32.mrf.mxu1 }
 0x136   : > { %v1007_v42 = vpop.f32.mrf.mxu0  ;;  %7246 = vmatprep.mubr.msk.bf16.mxu1 %vm1765_vm5, %v1687_v33 }
 0x137   : > { %v1583_v47 = vsel %vm1408_vm4, %v1455_v40, %v998_v31  ;;  %v1458_v53 = vmax.f32 %v1013_v41, 0.0  ;;  %v1008_v55 = vadd.f32 %v1007_v42, %v8105_v23 }
 0x138   : > { %v1688_v57 = vpack.c.bf16 %v1584_v43, %v1583_v47  ;;  %v7077_v58 = vpop.f32.mrf.mxu0 }
 0x139   : > { %v1457_v63 = vmax.f32 %v1008_v55, 0.0  ;;  %v1023_v0 = vadd.f32 %v7077_v58, %v8105_v23  ;;  %v1586_v8 = vsel %vm1408_vm4, %v1458_v53, %v1013_v41 }
 0x13a   : > { %v1017_v7 = vpop.f32.mrf.mxu0  ;;  %7247 = vmatmul.mubr.msk.bf16.gmra.mxu1 %vm1765_vm5, %v1688_v57 }
 0x13b   : > { %v1585_v15 = vsel %vm1408_vm4, %v1457_v63, %v1008_v55  ;;  %v1460_v16 = vmax.f32 %v1023_v0, 0.0  ;;  %v1018_v17 = vadd.f32 %v1017_v7, %v8105_v23  ;;  %v8381_v55 = vpop.f32.mrf.mxu1 }
 0x13c   : > { %v1689_v22 = vpack.c.bf16 %v1586_v8, %v1585_v15  ;;  %v7080_v24 = vpop.f32.mrf.mxu0 }
 0x13d   : > { %v1459_v31 = vmax.f32 %v1018_v17, 0.0  ;;  %v1033_v33 = vadd.f32 %v7080_v24, %v8105_v23  ;;  %v1588_v40 = vsel %vm1408_vm4, %v1460_v16, %v1023_v0 }
 0x13e   : > { %v1027_v36 = vpop.f32.mrf.mxu0  ;;  %7250 = vmatprep.mubr.msk.bf16.mxu1 %vm1765_vm5, %v1689_v22  ;;  %v8390_v22 = vpop.f32.mrf.mxu1 }
 0x13f   : > { %v1587_v41 = vsel %vm1408_vm4, %v1459_v31, %v1018_v17  ;;  %v1462_v42 = vmax.f32 %v1033_v33, 0.0  ;;  %v1028_v43 = vadd.f32 %v1027_v36, %v8105_v23 }
 0x140   : > { %v1690_v47 = vpack.c.bf16 %v1588_v40, %v1587_v41  ;;  %v7083_v53 = vpop.f32.mrf.mxu0 }
 0x141   : > { %v1461_v57 = vmax.f32 %v1028_v43, 0.0  ;;  %v1043_v58 = vadd.f32 %v7083_v53, %v8105_v23  ;;  %v1590_v7 = vsel %vm1408_vm4, %v1462_v42, %v1033_v33  ;;  %v8399_v53 = vpop.f32.mrf.mxu1 }
 0x142   : > { %v1037_v63 = vpop.f32.mrf.mxu0  ;;  %7251 = vmatmul.mubr.msk.bf16.gmra.mxu1 %vm1765_vm5, %v1690_v47 }
 0x143   : > { %v1589_v0 = vsel %vm1408_vm4, %v1461_v57, %v1028_v43  ;;  %v1464_v8 = vmax.f32 %v1043_v58, 0.0  ;;  %v1038_v15 = vadd.f32 %v1037_v63, %v8105_v23 }
 0x144   : > { %v1691_v16 = vpack.c.bf16 %v1590_v7, %v1589_v0  ;;  %v7086_v17 = vpop.f32.mrf.mxu0 }
 0x145   : > { %v1463_v24 = vmax.f32 %v1038_v15, 0.0  ;;  %v1053_v31 = vadd.f32 %v7086_v17, %v8105_v23  ;;  %v1592_v40 = vsel %vm1408_vm4, %v1464_v8, %v1043_v58 }
 0x146   : > { %v1047_v36 = vpop.f32.mrf.mxu0  ;;  %7254 = vmatprep.mubr.msk.bf16.mxu1 %vm1765_vm5, %v1691_v16 }
 0x147   : > { %v1591_v33 = vsel %vm1408_vm4, %v1463_v24, %v1038_v15  ;;  %v1466_v41 = vmax.f32 %v1053_v31, 0.0  ;;  %v1048_v42 = vadd.f32 %v1047_v36, %v8105_v23  ;;  %v8408_v24 = vpop.f32.mrf.mxu1 }
 0x148   : > { %v1692_v43 = vpack.c.bf16 %v1592_v40, %v1591_v33  ;;  %v7089_v47 = vpop.f32.mrf.mxu0  ;;  %v1093_v33 = vadd.f32 %v8128_v50, %v8105_v23 }
 0x149   : > { %v1465_v57 = vmax.f32 %v1048_v42, 0.0  ;;  %v1063_v63 = vadd.f32 %v7089_v47, %v8105_v23  ;;  %v1594_v0 = vsel %vm1408_vm4, %v1466_v41, %v1053_v31 }
 0x14a   : > { %v1057_v7 = vpop.f32.mrf.mxu0  ;;  %7255 = vmatmul.mubr.msk.bf16.gmra.mxu1 %vm1765_vm5, %v1692_v43  ;;  %v1088_v43 = vadd.f32 %v8132_v54, %v8105_v23  ;;  %v1474_v54 = vmax.f32 %v1093_v33, 0.0 }
 0x14b   : > { %v1593_v58 = vsel %vm1408_vm4, %v1465_v57, %v1048_v42  ;;  %v1468_v8 = vmax.f32 %v1063_v63, 0.0  ;;  %v1058_v15 = vadd.f32 %v1057_v7, %v8105_v23 }
 0x14c   : > { %v1693_v16 = vpack.c.bf16 %v1594_v0, %v1593_v58  ;;  %v7092_v17 = vpop.f32.mrf.mxu0  ;;  %v8421_v58 = vpop.f32.mrf.mxu1  ;;  %v1473_v4 = vmax.f32 %v1088_v43, 0.0 }
 0x14d   : > { %v1467_v36 = vmax.f32 %v1058_v15, 0.0  ;;  %v1073_v40 = vadd.f32 %v7092_v17, %v8105_v23  ;;  %v1596_v41 = vsel %vm1408_vm4, %v1468_v8, %v1063_v63 }
 0x14e   : > { %v1067_v31 = vpop.f32.mrf.mxu0  ;;  %7258 = vmatprep.mubr.msk.bf16.mxu1 %vm1765_vm5, %v1693_v16 }
 0x14f   : > { %v1595_v42 = vsel %vm1408_vm4, %v1467_v36, %v1058_v15  ;;  %v1470_v47 = vmax.f32 %v1073_v40, 0.0  ;;  %v1068_v57 = vadd.f32 %v1067_v31, %v8105_v23  ;;  %v8430_v31 = vpop.f32.mrf.mxu1 }
 0x150   : > { %v1694_v7 = vpack.c.bf16 %v1596_v41, %v1595_v42  ;;  %v7095_v0 = vpop.f32.mrf.mxu0  ;;  %v1103_v41 = vadd.f32 %v8139_v61, %v8105_v23  ;;  %v1098_v42 = vadd.f32 %v8143_v1, %v8105_v23 }
 0x151   : > { %v1469_v50 = vmax.f32 %v1068_v57, 0.0  ;;  %v1083_v17 = vadd.f32 %v7095_v0, %v8105_v23  ;;  %v1598_v63 = vsel %vm1408_vm4, %v1470_v47, %v1073_v40  ;;  %v1601_v40 = vsel %vm1408_vm4, %v1473_v4, %v1088_v43 }
 0x152   : > { %v1077_v20 = vpop.f32.mrf.mxu0  ;;  %7259 = vmatmul.mubr.msk.bf16.gmra.mxu1 %vm1765_vm5, %v1694_v7  ;;  %v1602_v7 = vsel %vm1408_vm4, %v1474_v54, %v1093_v33  ;;  %v1113_v47 = vadd.f32 %v8150_v9, %v8105_v23  ;;  %v1476_v54 = vmax.f32 %v1103_v41, 0.0  ;;  %v1475_v4 = vmax.f32 %v1098_v42, 0.0 }
 0x153   : > { %v1597_v8 = vsel %vm1408_vm4, %v1469_v50, %v1068_v57  ;;  %v1472_v15 = vmax.f32 %v1083_v17, 0.0  ;;  %v1078_v16 = vadd.f32 %v1077_v20, %v8105_v23  ;;  %v1108_v20 = vadd.f32 %v8154_v13, %v8105_v23  ;;  %v8449_v50 = vpop.f32.mrf.mxu1 }
 0x154   : > { %v1695_v36 = vpack.c.bf16 %v1598_v63, %v1597_v8  ;;  %v1697_v33 = vpack.c.bf16 %v1602_v7, %v1601_v40  ;;  %v1478_v43 = vmax.f32 %v1113_v47, 0.0  ;;  %v1604_v13 = vsel %vm1408_vm4, %v1476_v54, %v1103_v41 }
 0x155   : > { %v1471_v0 = vmax.f32 %v1078_v16, 0.0  ;;  %v1600_v61 = vsel %vm1408_vm4, %v1472_v15, %v1083_v17  ;;  %v1477_v63 = vmax.f32 %v1108_v20, 0.0  ;;  %v8453_v9 = vpop.f32.mrf.mxu1  ;;  %v1603_v17 = vsel %vm1408_vm4, %v1475_v4, %v1098_v42 }
 0x156   : > { %7262 = vmatprep.mubr.msk.bf16.mxu1 %vm1765_vm5, %v1695_v36  ;;  %v1123_v8 = vadd.f32 %v8161_v21, %v8105_v23  ;;  %v1118_v15 = vadd.f32 %v8165_v27, %v8105_v23  ;;  %v1128_v41 = vadd.f32 %v8176_v38, %v8105_v23  ;;  %v1698_v7 = vpack.c.bf16 %v1604_v13, %v1603_v17 }
 0x157   : > { %v1599_v1 = vsel %vm1408_vm4, %v1471_v0, %v1078_v16  ;;  %v1606_v16 = vsel %vm1408_vm4, %v1478_v43, %v1113_v47  ;;  %v1605_v36 = vsel %vm1408_vm4, %v1477_v63, %v1108_v20  ;;  %v1133_v0 = vadd.f32 %v8172_v34, %v8105_v23  ;;  %v8471_v42 = vpop.f32.mrf.mxu1 }
 0x158   : > { %v1696_v57 = vpack.c.bf16 %v1600_v61, %v1599_v1  ;;  %v1699_v40 = vpack.c.bf16 %v1606_v16, %v1605_v36  ;;  %v1480_v21 = vmax.f32 %v1123_v8, 0.0  ;;  %v1479_v61 = vmax.f32 %v1118_v15, 0.0 }
 0x159   : > { %v1482_v1 = vmax.f32 %v1133_v0, 0.0  ;;  %v1481_v27 = vmax.f32 %v1128_v41, 0.0  ;;  %v8475_v47 = vpop.f32.mrf.mxu1  ;;  %v1143_v20 = vadd.f32 %v8183_v45, %v8105_v23  ;;  %v1153_v4 = vadd.f32 %v8198_v62, %v8105_v23 }
 0x15a   : > { %7263 = vmatmul.mubr.msk.bf16.gmra.mxu1 %vm1765_vm5, %v1696_v57  ;;  %v1608_v34 = vsel %vm1408_vm4, %v1480_v21, %v1123_v8  ;;  %v1607_v38 = vsel %vm1408_vm4, %v1479_v61, %v1118_v15  ;;  %v1138_v57 = vadd.f32 %v8190_v51, %v8105_v23  ;;  %v1148_v43 = vadd.f32 %v8202_v5, %v8105_v23 }
 0x15b   : > { %7266 = vmatprep.mubr.msk.bf16.mxu1 %vm1765_vm5, %v1697_v33  ;;  %v1610_v33 = vsel %vm1408_vm4, %v1482_v1, %v1133_v0  ;;  %v1609_v54 = vsel %vm1408_vm4, %v1481_v27, %v1128_v41  ;;  %v1700_v63 = vpack.c.bf16 %v1608_v34, %v1607_v38  ;;  %v8493_v13 = vpop.f32.mrf.mxu1  ;;  %v1484_v45 = vmax.f32 %v1143_v20, 0.0 }
 0x15c   : > { %v1701_v17 = vpack.c.bf16 %v1610_v33, %v1609_v54  ;;  %v1483_v8 = vmax.f32 %v1138_v57, 0.0  ;;  %v1486_v15 = vmax.f32 %v1153_v4, 0.0  ;;  %v1485_v51 = vmax.f32 %v1148_v43, 0.0 }
 0x15d   : > { %v8497_v16 = vpop.f32.mrf.mxu1  ;;  %v1612_v62 = vsel %vm1408_vm4, %v1484_v45, %v1143_v20  ;;  %v1163_v36 = vadd.f32 %v8209_v14, %v8105_v23  ;;  %v1158_v0 = vadd.f32 %v8213_v18, %v8105_v23  ;;  %v1168_v21 = vadd.f32 %v8224_v35, %v8105_v23 }
 0x15e   : > { %v1611_v5 = vsel %vm1408_vm4, %v1483_v8, %v1138_v57  ;;  %v1614_v41 = vsel %vm1408_vm4, %v1486_v15, %v1153_v4  ;;  %v1183_v57 = vadd.f32 %v8234_v44, %v8105_v23  ;;  %v1178_v33 = vadd.f32 %v8238_v49, %v8105_v23 }
 0x15f   : > { %v1702_v61 = vpack.c.bf16 %v1612_v62, %v1611_v5  ;;  %v8515_v1 = vpop.f32.mrf.mxu1  ;;  %v1488_v14 = vmax.f32 %v1163_v36, 0.0  ;;  %v1487_v34 = vmax.f32 %v1158_v0, 0.0  ;;  %v1489_v18 = vmax.f32 %v1168_v21, 0.0  ;;  %v7753_v62 = vld [vmem:[%s9489_s2 + $0x40] sm:$0xff]  }
 0x160   : > { %v1492_v44 = vmax.f32 %v1183_v57, 0.0  ;;  %v1491_v15 = vmax.f32 %v1178_v33, 0.0  ;;  %7466 = vmatprep.subr.bf16.mxu1 %v7753_v62 }
 0x161   : > { %v8519_v20 = vpop.f32.mrf.mxu1  ;;  %v1615_v35 = vsel %vm1408_vm4, %v1487_v34, %v1158_v0  ;;  %v1617_v4 = vsel %vm1408_vm4, %v1489_v18, %v1168_v21  ;;  %v1198_v0 = vadd.f32 %v8260_v19, %v8105_v23  ;;  %v1208_v21 = vadd.f32 %v8271_v39, %v8105_v23  ;;  %7467 = vmatpush3.bf16.msra.mxu1 %v7753_v62 }
 0x162   : > { %7267 = vmatmul.mubr.msk.bf16.gmra.mxu1 %vm1765_vm5, %v1698_v7  ;;  %v1613_v7 = vsel %vm1408_vm4, %v1485_v51, %v1148_v43  ;;  %v1193_v43 = vadd.f32 %v8245_v59, %v8105_v23  ;;  %v1619_v5 = vsel %vm1408_vm4, %v1491_v15, %v1178_v33 }
 0x163   : > { %7270 = vmatprep.mubr.msk.bf16.mxu1 %vm1765_vm5, %v1699_v40  ;;  %v1173_v40 = vadd.f32 %v8220_v30, %v8105_v23  ;;  %v1703_v27 = vpack.c.bf16 %v1614_v41, %v1613_v7  ;;  %v1616_v30 = vsel %vm1408_vm4, %v1488_v14, %v1163_v36  ;;  %v8537_v45 = vpop.f32.mrf.mxu1  ;;  %v1203_v36 = vadd.f32 %v8256_v12, %v8105_v23 }
 0x164   : > { %v1494_v51 = vmax.f32 %v1193_v43, 0.0  ;;  %v1495_v19 = vmax.f32 %v1198_v0, 0.0 }
 0x165   : > { %v1490_v38 = vmax.f32 %v1173_v40, 0.0  ;;  %v8544_v59 = vpop.f32.mrf.mxu1  ;;  %v1496_v14 = vmax.f32 %v1203_v36, 0.0 }
 0x166   : > { %v1622_v41 = vsel %vm1408_vm4, %v1494_v51, %v1193_v43  ;;  %v1623_v39 = vsel %vm1408_vm4, %v1495_v19, %v1198_v0  ;;  %v1243_v51 = vadd.f32 %v8300_v28, %v8105_v23 }
 0x167   : > { %v1618_v54 = vsel %vm1408_vm4, %v1490_v38, %v1173_v40  ;;  %v1213_v40 = vadd.f32 %v8267_v32, %v8105_v23  ;;  %v1497_v38 = vmax.f32 %v1208_v21, 0.0  ;;  %v1624_v32 = vsel %vm1408_vm4, %v1496_v14, %v1203_v36 }
 0x168   : > { %v1705_v8 = vpack.c.bf16 %v1618_v54, %v1617_v4  ;;  %v1233_v54 = vadd.f32 %v8289_v6, %v8105_v23  ;;  %v1228_v4 = vadd.f32 %v8293_v11, %v8105_v23  ;;  %v1708_v43 = vpack.c.bf16 %v1624_v32, %v1623_v39 }
 0x169   : > { %v1498_v34 = vmax.f32 %v1213_v40, 0.0  ;;  %v1625_v33 = vsel %vm1408_vm4, %v1497_v38, %v1208_v21  ;;  %v1248_v36 = vadd.f32 %v8327_v29, %v8105_v23  ;;  %v1504_v28 = vmax.f32 %v1243_v51, 0.0 }
 0x16a   : > { %7271 = vmatmul.mubr.msk.bf16.gmra.mxu1 %vm1765_vm5, %v1700_v63  ;;  %v1188_v63 = vadd.f32 %v8249_v2, %v8105_v23  ;;  %v1620_v2 = vsel %vm1408_vm4, %v1492_v44, %v1183_v57  ;;  %v1502_v44 = vmax.f32 %v1233_v54, 0.0  ;;  %v1258_v14 = vadd.f32 %v8345_v10, %v8105_v23 }
 0x16b   : > { %7274 = vmatprep.mubr.msk.bf16.mxu1 %vm1765_vm5, %v1701_v17  ;;  %v1704_v17 = vpack.c.bf16 %v1616_v30, %v1615_v35  ;;  %v1223_v30 = vadd.f32 %v8278_v48, %v8105_v23  ;;  %v1218_v35 = vadd.f32 %v8282_v56, %v8105_v23  ;;  %v1626_v57 = vsel %vm1408_vm4, %v1498_v34, %v1213_v40 }
 0x16c   : > { %v1493_v49 = vmax.f32 %v1188_v63, 0.0  ;;  %v1501_v56 = vmax.f32 %v1228_v4, 0.0  ;;  %v1630_v62 = vsel %vm1408_vm4, %v1502_v44, %v1233_v54  ;;  %v1273_v38 = vadd.f32 %v8354_v37, %v8105_v23 }
 0x16d   : > { %v1500_v48 = vmax.f32 %v1223_v30, 0.0  ;;  %v1268_v32 = vadd.f32 %v8363_v60, %v8105_v23  ;;  %v1288_v44 = vadd.f32 %v8399_v53, %v8105_v23 }
 0x16e   : > { %v1621_v7 = vsel %vm1408_vm4, %v1493_v49, %v1188_v63  ;;  %v1238_v49 = vadd.f32 %v8309_v46, %v8105_v23  ;;  %v1505_v46 = vmax.f32 %v1248_v36, 0.0 }
 0x16f   : > { %v1707_v12 = vpack.c.bf16 %v1622_v41, %v1621_v7  ;;  %v1628_v6 = vsel %vm1408_vm4, %v1500_v48, %v1223_v30  ;;  %v1509_v10 = vmax.f32 %v1268_v32, 0.0 }
 0x170   : > { %v1503_v40 = vmax.f32 %v1238_v49, 0.0  ;;  %v1633_v34 = vsel %vm1408_vm4, %v1505_v46, %v1248_v36  ;;  %v1298_v36 = vadd.f32 %v8421_v58, %v8105_v23 }
 0x171   : > { %v1637_v48 = vsel %vm1408_vm4, %v1509_v10, %v1268_v32  ;;  %v1318_v10 = vadd.f32 %v8471_v42, %v8105_v23 }
 0x172   : > { %7275 = vmatmul.mubr.msk.bf16.gmra.mxu1 %vm1765_vm5, %v1702_v61  ;;  %v1706_v61 = vpack.c.bf16 %v1620_v2, %v1619_v5  ;;  %v1629_v2 = vsel %vm1408_vm4, %v1501_v56, %v1228_v4  ;;  %v1253_v5 = vadd.f32 %v8318_v3, %v8105_v23  ;;  %v1632_v3 = vsel %vm1408_vm4, %v1504_v28, %v1243_v51 }
 0x173   : > { %7278 = vmatprep.mubr.msk.bf16.mxu1 %vm1765_vm5, %v1703_v27  ;;  %v8562_v27 = vpop.f32.mrf.mxu1  ;;  %v1711_v7 = vpack.c.bf16 %v1630_v62, %v1629_v2  ;;  %v1631_v29 = vsel %vm1408_vm4, %v1503_v40, %v1238_v49  ;;  %v1283_v4 = vadd.f32 %v8372_v26, %v8105_v23  ;;  %v1303_v2 = vadd.f32 %v8408_v24, %v8105_v23 }
 0x174   : > { %v1506_v21 = vmax.f32 %v1253_v5, 0.0  ;;  %v1712_v39 = vpack.c.bf16 %v1632_v3, %v1631_v29  ;;  %v1313_v28 = vadd.f32 %v8430_v31, %v8105_v23  ;;  %v1308_v24 = vadd.f32 %v8449_v50, %v8105_v23 }
 0x175   : > { %v8566_v18 = vpop.f32.mrf.mxu1  ;;  %v1512_v26 = vmax.f32 %v1283_v4, 0.0  ;;  %v1516_v46 = vmax.f32 %v1303_v2, 0.0  ;;  %v1323_v50 = vadd.f32 %v8453_v9, %v8105_v23  ;;  %v1333_v9 = vadd.f32 %v8475_v47, %v8105_v23 }
 0x176   : > { %v1634_v19 = vsel %vm1408_vm4, %v1506_v21, %v1253_v5 }
 0x177   : > { %v8584_v63 = vpop.f32.mrf.mxu1  ;;  %v1640_v53 = vsel %vm1408_vm4, %v1512_v26, %v1283_v4  ;;  %v1328_v4 = vadd.f32 %v8493_v13, %v8105_v23  ;;  %v1343_v13 = vadd.f32 %v8497_v16, %v8105_v23  ;;  %v1353_v16 = vadd.f32 %v8519_v20, %v8105_v23 }
 0x178   : > { %v1363_v20 = vadd.f32 %v8544_v59, %v8105_v23  ;;  %v1368_v59 = vadd.f32 %v8584_v63, %v8105_v23 }
 0x179   : > { %v8588_v15 = vpop.f32.mrf.mxu1 }
 0x17a   : > { %7279 = vmatmul.mubr.msk.bf16.gmra.mxu1 %vm1765_vm5, %v1704_v17  ;;  %v1709_v17 = vpack.c.bf16 %v1626_v57, %v1625_v33  ;;  %v1507_v57 = vmax.f32 %v1258_v14, 0.0  ;;  %v1510_v33 = vmax.f32 %v1273_v38, 0.0 }
 0x17b   : > { %7282 = vmatprep.mubr.msk.bf16.mxu1 %vm1765_vm5, %v1705_v8  ;;  %v1499_v8 = vmax.f32 %v1218_v35, 0.0  ;;  %v8606_v41 = vpop.f32.mrf.mxu1 }
 0x17c   : > { %v1635_v60 = vsel %vm1408_vm4, %v1507_v57, %v1258_v14  ;;  %v1515_v14 = vmax.f32 %v1298_v36, 0.0  ;;  %v1644_v57 = vsel %vm1408_vm4, %v1516_v46, %v1303_v2 }
 0x17d   : > { %v1627_v11 = vsel %vm1408_vm4, %v1499_v8, %v1218_v35  ;;  %v1713_v35 = vpack.c.bf16 %v1634_v19, %v1633_v34  ;;  %v1293_v8 = vadd.f32 %v8390_v22, %v8105_v23  ;;  %v1518_v34 = vmax.f32 %v1313_v28, 0.0 }
 0x17e   : > { %v1710_v0 = vpack.c.bf16 %v1628_v6, %v1627_v11 }
 0x17f   : > { %v1514_v49 = vmax.f32 %v1293_v8, 0.0 }
 0x182   : > { %7283 = vmatmul.mubr.msk.bf16.gmra.mxu1 %vm1765_vm5, %v1706_v61  ;;  %v8610_v61 = vpop.f32.mrf.mxu1 }
 0x183   : > { %7286 = vmatprep.mubr.msk.bf16.mxu1 %vm1765_vm5, %v1707_v12  ;;  %v1263_v12 = vadd.f32 %v8336_v52, %v8105_v23 }
 0x184   : > { %v8628_v30 = vpop.f32.mrf.mxu1 }
 0x185   : > { %v1508_v52 = vmax.f32 %v1263_v12, 0.0 }
 0x186   : > { %v8632_v54 = vpop.f32.mrf.mxu1 }
 0x187   : > { %v1636_v37 = vsel %vm1408_vm4, %v1508_v52, %v1263_v12 }
 0x188   : > { %v1714_v56 = vpack.c.bf16 %v1636_v37, %v1635_v60  ;;  %v8650_v6 = vpop.f32.mrf.mxu1  ;;  %v1646_v37 = vsel %vm1408_vm4, %v1518_v34, %v1313_v28  ;;  %v1348_v28 = vadd.f32 %v8537_v45, %v8105_v23 }
 0x18a   : > { %7287 = vmatmul.mubr.msk.bf16.gmra.mxu1 %vm1765_vm5, %v1708_v43  ;;  %v1278_v43 = vadd.f32 %v8381_v55, %v8105_v23  ;;  %v1513_v55 = vmax.f32 %v1288_v44, 0.0 }
 0x18b   : > { %7290 = vmatprep.mubr.msk.bf16.mxu1 %vm1765_vm5, %v1709_v17  ;;  %v1638_v17 = vsel %vm1408_vm4, %v1510_v33, %v1273_v38  ;;  %v1517_v38 = vmax.f32 %v1308_v24, 0.0  ;;  %v1643_v33 = vsel %vm1408_vm4, %v1515_v14, %v1298_v36  ;;  %v1338_v36 = vadd.f32 %v8515_v1, %v8105_v23 }
 0x18c   : > { %v1715_v11 = vpack.c.bf16 %v1638_v17, %v1637_v48  ;;  %v1511_v51 = vmax.f32 %v1278_v43, 0.0  ;;  %v1718_v17 = vpack.c.bf16 %v1644_v57, %v1643_v33  ;;  %v1520_v48 = vmax.f32 %v1323_v50, 0.0 }
 0x18d   : > { %v1645_v60 = vsel %vm1408_vm4, %v1517_v38, %v1308_v24  ;;  %v1528_v33 = vmax.f32 %v1363_v20, 0.0 }
 0x18e   : > { %v1639_v5 = vsel %vm1408_vm4, %v1511_v51, %v1278_v43  ;;  %v1522_v51 = vmax.f32 %v1333_v9, 0.0 }
 0x18f   : > { %v1716_v21 = vpack.c.bf16 %v1640_v53, %v1639_v5  ;;  %v1648_v53 = vsel %vm1408_vm4, %v1520_v48, %v1323_v50 }
 0x192   : > { %7291 = vmatmul.mubr.msk.bf16.gmra.mxu1 %vm1765_vm5, %v1710_v0  ;;  %v1642_v0 = vsel %vm1408_vm4, %v1514_v49, %v1293_v8  ;;  %v1521_v49 = vmax.f32 %v1328_v4, 0.0 }
 0x193   : > { %7294 = vmatprep.mubr.msk.bf16.mxu1 %vm1765_vm5, %v1711_v7  ;;  %v1641_v7 = vsel %vm1408_vm4, %v1513_v55, %v1288_v44  ;;  %v1719_v44 = vpack.c.bf16 %v1646_v37, %v1645_v60 }
 0x194   : > { %v1717_v12 = vpack.c.bf16 %v1642_v0, %v1641_v7  ;;  %v1650_v0 = vsel %vm1408_vm4, %v1522_v51, %v1333_v9  ;;  %v1649_v7 = vsel %vm1408_vm4, %v1521_v49, %v1328_v4  ;;  %v1383_v51 = vadd.f32 %v8588_v15, %v8105_v23 }
 0x195   : > { %v1388_v15 = vadd.f32 %v8628_v30, %v8105_v23 }
 0x19a   : > { %7295 = vmatmul.mubr.msk.bf16.gmra.mxu1 %vm1765_vm5, %v1712_v39 }
 0x19b   : > { %7298 = vmatprep.mubr.msk.bf16.mxu1 %vm1765_vm5, %v1713_v35 }
 0x1a2   : > { %v7204_v62 = vpop.f32.mrf.mxu1  ;;  %7299 = vmatmul.mubr.msk.bf16.gmra.mxu1 %vm1765_vm5, %v1714_v56  ;;  %v1519_v56 = vmax.f32 %v1318_v10, 0.0 }
 0x1a3   : > { %7302 = vmatprep.mubr.msk.bf16.mxu1 %vm1765_vm5, %v1715_v11  ;;  %v2511_v32 = vmax.f32 %v7204_v62, 0.0 }
 0x1a4   : > { %v1998_v22 = vpop.f32.mrf.mxu1  ;;  %v1647_v5 = vsel %vm1408_vm4, %v1519_v56, %v1318_v10 }
 0x1a5   : > { %v2509_v58 = vmax.f32 %v1998_v22, 0.0 }
 0x1a6   : > { %v7205_v40 = vpop.f32.mrf.mxu1 }
 0x1a7   : > { %v2512_v3 = vmax.f32 %v7205_v40, 0.0  ;;  %v1720_v40 = vpack.c.bf16 %v1648_v53, %v1647_v5  ;;  %v9494_v53 = vmov 65535  }
 0x1a8   : > { %v2001_v29 = vpop.f32.mrf.mxu1  ;;  %v4806_v5 = vsel %vm4804_vm7, 4294967295, %v9494_v53 }
 0x1a9   : > { %v2510_v19 = vmax.f32 %v2001_v29, 0.0  ;;  %v2638_v35 = vpack.c.bf16 %v2512_v3, %v2511_v32  ;;  %v1721_v3 = vpack.c.bf16 %v1650_v0, %v1649_v7  ;;  %v1523_v29 = vmax.f32 %v1338_v36, 0.0 }
 0x1aa   : > { %v7208_v39 = vpop.f32.mrf.mxu1  ;;  %7303 = vmatmul.mubr.msk.bf16.gmra.mxu1 %vm1765_vm5, %v1716_v21  ;;  %v1524_v21 = vmax.f32 %v1343_v13, 0.0  ;;  %v1358_v32 = vadd.f32 %v8562_v27, %v8105_v23 }
 0x1ab   : > { %v2637_v31 = vpack.c.bf16 %v2510_v19, %v2509_v58  ;;  %7306 = vmatprep.mubr.msk.bf16.mxu1 %vm1765_vm5, %v1717_v12  ;;  %v2515_v55 = vmax.f32 %v7208_v39, 0.0  ;;  %v1526_v58 = vmax.f32 %v1353_v16, 0.0  ;;  %v1525_v19 = vmax.f32 %v1348_v28, 0.0 }
 0x1ac   : > { %v2014_v52 = vpop.f32.mrf.mxu1  ;;  %v1373_v39 = vadd.f32 %v8566_v18, %v8105_v23  ;;  %v1527_v37 = vmax.f32 %v1358_v32, 0.0 }
 0x1ad   : > { %7336 = vmatprep.mubr.msk.bf16.mxu0 %vm2721_vm6, %v2637_v31  ;;  %v2513_v11 = vmax.f32 %v2014_v52, 0.0  ;;  %v1651_v52 = vsel %vm1408_vm4, %v1523_v29, %v1338_v36  ;;  %v1654_v57 = vsel %vm1408_vm4, %v1526_v58, %v1353_v16  ;;  %v1653_v27 = vsel %vm1408_vm4, %v1525_v19, %v1348_v28 }
 0x1ae   : > { %v7209_v43 = vpop.f32.mrf.mxu1  ;;  %7337 = vmatmul.mubr.msk.bf16.vlgmr.msra.gmra.mxu0 %vm2721_vm6, %v2638_v35  ;;  %v1652_v35 = vsel %vm1408_vm4, %v1524_v21, %v1343_v13  ;;  %v1530_v60 = vmax.f32 %v1373_v39, 0.0  ;;  %v7754_v13 = vld [vmem:[%s9489_s2 + $0x50] sm:$0x1f]  }
 0x1af   : > { %v2516_v42 = vmax.f32 %v7209_v43, 0.0  ;;  %v1722_v10 = vpack.c.bf16 %v1652_v35, %v1651_v52  ;;  %v1723_v43 = vpack.c.bf16 %v1654_v57, %v1653_v27 }
 0x1b0   : > { %v2017_v8 = vpop.f32.mrf.mxu1 }
 0x1b1   : > { %v2514_v26 = vmax.f32 %v2017_v8, 0.0  ;;  %v2640_v2 = vpack.c.bf16 %v2516_v42, %v2515_v55 }
 0x1b2   : > { %v7212_v62 = vpop.f32.mrf.mxu1  ;;  %7307 = vmatmul.mubr.msk.bf16.gmra.mxu1 %vm1765_vm5, %v1718_v17  ;;  %v1529_v17 = vmax.f32 %v1368_v59, 0.0 }
 0x1b3   : > { %v2639_v47 = vpack.c.bf16 %v2514_v26, %v2513_v11  ;;  %7310 = vmatprep.mubr.msk.bf16.mxu1 %vm1765_vm5, %v1719_v44  ;;  %v2519_v34 = vmax.f32 %v7212_v62, 0.0  ;;  %v1656_v44 = vsel %vm1408_vm4, %v1528_v33, %v1363_v20  ;;  %v1655_v11 = vsel %vm1408_vm4, %v1527_v37, %v1358_v32 }
 0x1b4   : > { %v2030_v22 = vpop.f32.mrf.mxu1  ;;  %v1658_v26 = vsel %vm1408_vm4, %v1530_v60, %v1373_v39  ;;  %v1657_v62 = vsel %vm1408_vm4, %v1529_v17, %v1368_v59  ;;  %v1724_v36 = vpack.c.bf16 %v1656_v44, %v1655_v11 }
 0x1b5   : > { %7340 = vmatprep.mubr.msk.bf16.mxu0 %vm2721_vm6, %v2639_v47  ;;  %v2517_v12 = vmax.f32 %v2030_v22, 0.0  ;;  %v1378_v47 = vadd.f32 %v8606_v41, %v8105_v23  ;;  %v4807_v41 = vsel %vm4805_vm8, %v4806_v5, 0  ;;  %v1725_v0 = vpack.c.bf16 %v1658_v26, %v1657_v62 }
 0x1b6   : > { %v7213_v24 = vpop.f32.mrf.mxu1  ;;  %7341 = vmatmul.mubr.msk.bf16.gmra.mxu0 %vm2721_vm6, %v2640_v2  ;;  %v1393_v2 = vadd.f32 %v8610_v61, %v8105_v23  ;;  %v4809_v28 = vand.u32 %v7754_v13, %v4807_v41  ;;  %v1533_v61 = vmax.f32 %v1388_v15, 0.0 }
 0x1b7   : > { %v2520_v1 = vmax.f32 %v7213_v24, 0.0  ;;  %v1532_v24 = vmax.f32 %v1383_v51, 0.0 }
 0x1b8   : > { %v2033_v46 = vpop.f32.mrf.mxu1  ;;  %7596 = vmatprep.subr.bf16.mxu0 %v4809_v28 }
 0x1b9   : > { %v2518_v14 = vmax.f32 %v2033_v46, 0.0  ;;  %v2642_v31 = vpack.c.bf16 %v2520_v1, %v2519_v34  ;;  %v1534_v46 = vmax.f32 %v1393_v2, 0.0  ;;  %7597 = vmatpush3.bf16.msra.mxu0 %v4809_v28  ;;  %v1660_v19 = vsel %vm1408_vm4, %v1532_v24, %v1383_v51 }
 0x1ba   : > { %v7216_v38 = vpop.f32.mrf.mxu1  ;;  %7311 = vmatmul.mubr.msk.bf16.gmra.mxu1 %vm1765_vm5, %v1720_v40  ;;  %v1531_v40 = vmax.f32 %v1378_v47, 0.0 }
 0x1bb   : > { %v2641_v45 = vpack.c.bf16 %v2518_v14, %v2517_v12  ;;  %7314 = vmatprep.mubr.msk.bf16.mxu1 %vm1765_vm5, %v1721_v3  ;;  %v2523_v42 = vmax.f32 %v7216_v38, 0.0  ;;  %v1403_v12 = vadd.f32 %v8632_v54, %v8105_v23  ;;  %v1398_v38 = vadd.f32 %v8650_v6, %v8105_v23 }
 0x1bc   : > { %v2046_v50 = vpop.f32.mrf.mxu1  ;;  %v1659_v34 = vsel %vm1408_vm4, %v1531_v40, %v1378_v47  ;;  %v1662_v20 = vsel %vm1408_vm4, %v1534_v46, %v1393_v2 }
 0x1bd   : > { %7344 = vmatprep.mubr.msk.bf16.mxu0 %vm2721_vm6, %v2641_v45  ;;  %v2521_v63 = vmax.f32 %v2046_v50, 0.0  ;;  %v1661_v45 = vsel %vm1408_vm4, %v1533_v61, %v1388_v15  ;;  %v1726_v32 = vpack.c.bf16 %v1660_v19, %v1659_v34  ;;  %v1536_v39 = vmax.f32 %v1403_v12, 0.0 }
 0x1be   : > { %v7217_v18 = vpop.f32.mrf.mxu1  ;;  %7345 = vmatmul.mubr.msk.bf16.gmra.mxu0 %vm2721_vm6, %v2642_v31  ;;  %v1727_v35 = vpack.c.bf16 %v1662_v20, %v1661_v45  ;;  %v1535_v52 = vmax.f32 %v1398_v38, 0.0 }
 0x1bf   : > { %v2524_v9 = vmax.f32 %v7217_v18, 0.0 }
 0x1c0   : > { %v2049_v4 = vpop.f32.mrf.mxu1  ;;  %v1663_v37 = vsel %vm1408_vm4, %v1535_v52, %v1398_v38 }
 0x1c1   : > { %v2522_v48 = vmax.f32 %v2049_v4, 0.0  ;;  %v2644_v49 = vpack.c.bf16 %v2524_v9, %v2523_v42 }
 0x1c2   : > { %v7220_v8 = vpop.f32.mrf.mxu1  ;;  %7315 = vmatmul.mubr.msk.bf16.gmra.mxu1 %vm1765_vm5, %v1722_v10  ;;  %v1664_v10 = vsel %vm1408_vm4, %v1536_v39, %v1403_v12 }
 0x1c3   : > { %v2643_v56 = vpack.c.bf16 %v2522_v48, %v2521_v63  ;;  %7318 = vmatprep.mubr.msk.bf16.mxu1 %vm1765_vm5, %v1723_v43  ;;  %v2527_v3 = vmax.f32 %v7220_v8, 0.0  ;;  %v1728_v9 = vpack.c.bf16 %v1664_v10, %v1663_v37 }
 0x1c4   : > { %v2062_v55 = vpop.f32.mrf.mxu1 }
 0x1c5   : > { %7348 = vmatprep.mubr.msk.bf16.mxu0 %vm2721_vm6, %v2643_v56  ;;  %v2525_v21 = vmax.f32 %v2062_v55, 0.0 }
 0x1c6   : > { %v7221_v22 = vpop.f32.mrf.mxu1  ;;  %7349 = vmatmul.mubr.msk.bf16.gmra.mxu0 %vm2721_vm6, %v2644_v49 }
 0x1c7   : > { %v2528_v7 = vmax.f32 %v7221_v22, 0.0 }
 0x1c8   : > { %v2065_v16 = vpop.f32.mrf.mxu1 }
 0x1c9   : > { %v2526_v1 = vmax.f32 %v2065_v16, 0.0  ;;  %v2646_v14 = vpack.c.bf16 %v2528_v7, %v2527_v3 }
 0x1ca   : > { %v7224_v29 = vpop.f32.mrf.mxu1  ;;  %7319 = vmatmul.mubr.msk.bf16.gmra.mxu1 %vm1765_vm5, %v1724_v36 }
 0x1cb   : > { %v2645_v30 = vpack.c.bf16 %v2526_v1, %v2525_v21  ;;  %7322 = vmatprep.mubr.msk.bf16.mxu1 %vm1765_vm5, %v1725_v0  ;;  %v2531_v23 = vmax.f32 %v7224_v29, 0.0 }
 0x1cc   : > { %v2078_v58 = vpop.f32.mrf.mxu1 }
 0x1cd   : > { %7352 = vmatprep.mubr.msk.bf16.mxu0 %vm2721_vm6, %v2645_v30  ;;  %v2529_v59 = vmax.f32 %v2078_v58, 0.0 }
 0x1ce   : > { %v7225_v54 = vpop.f32.mrf.mxu1  ;;  %7353 = vmatmul.mubr.msk.bf16.gmra.mxu0 %vm2721_vm6, %v2646_v14 }
 0x1cf   : > { %v2532_v31 = vmax.f32 %v7225_v54, 0.0 }
 0x1d0   : > { %v2081_v50 = vpop.f32.mrf.mxu1 }
 0x1d1   : > { %v2530_v57 = vmax.f32 %v2081_v50, 0.0  ;;  %v2648_v18 = vpack.c.bf16 %v2532_v31, %v2531_v23 }
 0x1d2   : > { %v7228_v6 = vpop.f32.mrf.mxu1  ;;  %7323 = vmatmul.mubr.msk.bf16.gmra.mxu1 %vm1765_vm5, %v1726_v32 }
 0x1d3   : > { %v2647_v27 = vpack.c.bf16 %v2530_v57, %v2529_v59  ;;  %7326 = vmatprep.mubr.msk.bf16.mxu1 %vm1765_vm5, %v1727_v35  ;;  %v2535_v48 = vmax.f32 %v7228_v6, 0.0 }
 0x1d4   : > { %v2094_v33 = vpop.f32.mrf.mxu1 }
 0x1d5   : > { %7356 = vmatprep.mubr.msk.bf16.mxu0 %vm2721_vm6, %v2647_v27  ;;  %v2533_v17 = vmax.f32 %v2094_v33, 0.0 }
 0x1d6   : > { %v7229_v60 = vpop.f32.mrf.mxu1  ;;  %7357 = vmatmul.mubr.msk.bf16.gmra.mxu0 %vm2721_vm6, %v2648_v18 }
 0x1d7   : > { %v2536_v4 = vmax.f32 %v7229_v60, 0.0 }
 0x1d8   : > { %v2097_v43 = vpop.f32.mrf.mxu1 }
 0x1d9   : > { %v2534_v63 = vmax.f32 %v2097_v43, 0.0  ;;  %v2650_v44 = vpack.c.bf16 %v2536_v4, %v2535_v48 }
 0x1da   : > { %v7232_v42 = vpop.f32.mrf.mxu1  ;;  %7327 = vmatmul.mubr.msk.bf16.gmra.mxu1 %vm1765_vm5, %v1728_v9 }
 0x1db   : > { %v2649_v8 = vpack.c.bf16 %v2534_v63, %v2533_v17  ;;  %v2539_v55 = vmax.f32 %v7232_v42, 0.0 }
 0x1dc   : > { %v2110_v56 = vpop.f32.mrf.mxu1 }
 0x1dd   : > { %7360 = vmatprep.mubr.msk.bf16.mxu0 %vm2721_vm6, %v2649_v8  ;;  %v2537_v51 = vmax.f32 %v2110_v56, 0.0 }
 0x1de   : > { %v7233_v25 = vpop.f32.mrf.mxu1  ;;  %7361 = vmatmul.mubr.msk.bf16.gmra.mxu0 %vm2721_vm6, %v2650_v44 }
 0x1df   : > { %v2540_v11 = vmax.f32 %v7233_v25, 0.0 }
 0x1e0   : > { %v2113_v26 = vpop.f32.mrf.mxu1 }
 0x1e1   : > { %v2538_v49 = vmax.f32 %v2113_v26, 0.0  ;;  %v2652_v13 = vpack.c.bf16 %v2540_v11, %v2539_v55 }
 0x1e2   : > { %v7236_v62 = vpop.f32.mrf.mxu1 }
 0x1e3   : > { %v2651_v47 = vpack.c.bf16 %v2538_v49, %v2537_v51  ;;  %v2543_v36 = vmax.f32 %v7236_v62, 0.0 }
 0x1e4   : > { %v2126_v2 = vpop.f32.mrf.mxu1 }
 0x1e5   : > { %7364 = vmatprep.mubr.msk.bf16.mxu0 %vm2721_vm6, %v2651_v47  ;;  %v2541_v5 = vmax.f32 %v2126_v2, 0.0 }
 0x1e6   : > { %v7237_v15 = vpop.f32.mrf.mxu1  ;;  %7365 = vmatmul.mubr.msk.bf16.gmra.mxu0 %vm2721_vm6, %v2652_v13 }
 0x1e7   : > { %v2544_v22 = vmax.f32 %v7237_v15, 0.0 }
 0x1e8   : > { %v2129_v53 = vpop.f32.mrf.mxu1 }
 0x1e9   : > { %v2542_v41 = vmax.f32 %v2129_v53, 0.0  ;;  %v2654_v16 = vpack.c.bf16 %v2544_v22, %v2543_v36 }
 0x1ea   : > { %v7240_v0 = vpop.f32.mrf.mxu1 }
 0x1eb   : > { %v2653_v7 = vpack.c.bf16 %v2542_v41, %v2541_v5  ;;  %v2547_v61 = vmax.f32 %v7240_v0, 0.0 }
 0x1ec   : > { %v2142_v28 = vpop.f32.mrf.mxu1 }
 0x1ed   : > { %7368 = vmatprep.mubr.msk.bf16.mxu0 %vm2721_vm6, %v2653_v7  ;;  %v2545_v1 = vmax.f32 %v2142_v28, 0.0 }
 0x1ee   : > { %v7241_v24 = vpop.f32.mrf.mxu1  ;;  %7369 = vmatmul.mubr.msk.bf16.gmra.mxu0 %vm2721_vm6, %v2654_v16 }
 0x1ef   : > { %v2548_v40 = vmax.f32 %v7241_v24, 0.0 }
 0x1f0   : > { %v2145_v21 = vpop.f32.mrf.mxu1 }
 0x1f1   : > { %v2546_v46 = vmax.f32 %v2145_v21, 0.0  ;;  %v2656_v30 = vpack.c.bf16 %v2548_v40, %v2547_v61 }
 0x1f2   : > { %v7244_v3 = vpop.f32.mrf.mxu1 }
 0x1f3   : > { %v2655_v29 = vpack.c.bf16 %v2546_v46, %v2545_v1  ;;  %v2551_v20 = vmax.f32 %v7244_v3, 0.0 }
 0x1f4   : > { %v2158_v12 = vpop.f32.mrf.mxu1 }
 0x1f5   : > { %7372 = vmatprep.mubr.msk.bf16.mxu0 %vm2721_vm6, %v2655_v29  ;;  %v2549_v34 = vmax.f32 %v2158_v12, 0.0 }
 0x1f6   : > { %v7245_v14 = vpop.f32.mrf.mxu1  ;;  %7373 = vmatmul.mubr.msk.bf16.gmra.mxu0 %vm2721_vm6, %v2656_v30 }
 0x1f7   : > { %v2552_v58 = vmax.f32 %v7245_v14, 0.0 }
 0x1f8   : > { %v2161_v19 = vpop.f32.mrf.mxu1 }
 0x1f9   : > { %v2550_v38 = vmax.f32 %v2161_v19, 0.0  ;;  %v2658_v32 = vpack.c.bf16 %v2552_v58, %v2551_v20 }
 0x1fa   : > { %v7248_v45 = vpop.f32.mrf.mxu1 }
 0x1fb   : > { %v2657_v54 = vpack.c.bf16 %v2550_v38, %v2549_v34  ;;  %v2555_v57 = vmax.f32 %v7248_v45, 0.0 }
 0x1fc   : > { %v2174_v39 = vpop.f32.mrf.mxu1 }
 0x1fd   : > { %7376 = vmatprep.mubr.msk.bf16.mxu0 %vm2721_vm6, %v2657_v54  ;;  %v2553_v52 = vmax.f32 %v2174_v39, 0.0 }
 0x1fe   : > { %v7249_v31 = vpop.f32.mrf.mxu1  ;;  %7377 = vmatmul.mubr.msk.bf16.gmra.mxu0 %vm2721_vm6, %v2658_v32 }
 0x1ff   : > { %v2556_v50 = vmax.f32 %v7249_v31, 0.0 }
 0x200   : > { %v2177_v35 = vpop.f32.mrf.mxu1 }
 0x201   : > { %v2554_v59 = vmax.f32 %v2177_v35, 0.0  ;;  %v2660_v27 = vpack.c.bf16 %v2556_v50, %v2555_v57 }
 0x202   : > { %v7252_v23 = vpop.f32.mrf.mxu1 }
 0x203   : > { %v2659_v6 = vpack.c.bf16 %v2554_v59, %v2553_v52  ;;  %v2559_v4 = vmax.f32 %v7252_v23, 0.0 }
 0x204   : > { %v2190_v18 = vpop.f32.mrf.mxu1 }
 0x205   : > { %7380 = vmatprep.mubr.msk.bf16.mxu0 %vm2721_vm6, %v2659_v6  ;;  %v2557_v60 = vmax.f32 %v2190_v18, 0.0 }
 0x206   : > { %v7253_v33 = vpop.f32.mrf.mxu1  ;;  %7381 = vmatmul.mubr.msk.bf16.gmra.mxu0 %vm2721_vm6, %v2660_v27 }
 0x207   : > { %v2560_v10 = vmax.f32 %v7253_v33, 0.0 }
 0x208   : > { %v2193_v37 = vpop.f32.mrf.mxu1 }
 0x209   : > { %v2558_v9 = vmax.f32 %v2193_v37, 0.0  ;;  %v2662_v63 = vpack.c.bf16 %v2560_v10, %v2559_v4 }
 0x20a   : > { %v7256_v43 = vpop.f32.mrf.mxu1 }
 0x20b   : > { %v2661_v17 = vpack.c.bf16 %v2558_v9, %v2557_v60  ;;  %v2563_v11 = vmax.f32 %v7256_v43, 0.0 }
 0x20c   : > { %v2206_v48 = vpop.f32.mrf.mxu1 }
 0x20d   : > { %7384 = vmatprep.mubr.msk.bf16.mxu0 %vm2721_vm6, %v2661_v17  ;;  %v2561_v56 = vmax.f32 %v2206_v48, 0.0 }
 0x20e   : > { %v7257_v42 = vpop.f32.mrf.mxu1  ;;  %7385 = vmatmul.mubr.msk.bf16.gmra.mxu0 %vm2721_vm6, %v2662_v63 }
 0x20f   : > { %v2564_v8 = vmax.f32 %v7257_v42, 0.0 }
 0x210   : > { %v2209_v44 = vpop.f32.mrf.mxu1 }
 0x211   : > { %v2562_v25 = vmax.f32 %v2209_v44, 0.0  ;;  %v2664_v49 = vpack.c.bf16 %v2564_v8, %v2563_v11 }
 0x212   : > { %v7260_v26 = vpop.f32.mrf.mxu1 }
 0x213   : > { %v2663_v51 = vpack.c.bf16 %v2562_v25, %v2561_v56  ;;  %v2567_v22 = vmax.f32 %v7260_v26, 0.0 }
 0x214   : > { %v2222_v55 = vpop.f32.mrf.mxu1 }
 0x215   : > { %7388 = vmatprep.mubr.msk.bf16.mxu0 %vm2721_vm6, %v2663_v51  ;;  %v2565_v2 = vmax.f32 %v2222_v55, 0.0 }
 0x216   : > { %v7261_v62 = vpop.f32.mrf.mxu1  ;;  %7389 = vmatmul.mubr.msk.bf16.gmra.mxu0 %vm2721_vm6, %v2664_v49 }
 0x217   : > { %v2568_v47 = vmax.f32 %v7261_v62, 0.0 }
 0x218   : > { %v2225_v13 = vpop.f32.mrf.mxu1 }
 0x219   : > { %v2566_v15 = vmax.f32 %v2225_v13, 0.0  ;;  %v2666_v41 = vpack.c.bf16 %v2568_v47, %v2567_v22 }
 0x21a   : > { %v7264_v53 = vpop.f32.mrf.mxu1 }
 0x21b   : > { %v2665_v5 = vpack.c.bf16 %v2566_v15, %v2565_v2  ;;  %v2571_v40 = vmax.f32 %v7264_v53, 0.0 }
 0x21c   : > { %v2238_v36 = vpop.f32.mrf.mxu1 }
 0x21d   : > { %7392 = vmatprep.mubr.msk.bf16.mxu0 %vm2721_vm6, %v2665_v5  ;;  %v2569_v28 = vmax.f32 %v2238_v36, 0.0 }
 0x21e   : > { %v7265_v0 = vpop.f32.mrf.mxu1  ;;  %7393 = vmatmul.mubr.msk.bf16.gmra.mxu0 %vm2721_vm6, %v2666_v41 }
 0x21f   : > { %v2572_v7 = vmax.f32 %v7265_v0, 0.0 }
 0x220   : > { %v2241_v16 = vpop.f32.mrf.mxu1 }
 0x221   : > { %v2570_v24 = vmax.f32 %v2241_v16, 0.0  ;;  %v2668_v46 = vpack.c.bf16 %v2572_v7, %v2571_v40 }
 0x222   : > { %v7268_v21 = vpop.f32.mrf.mxu1 }
 0x223   : > { %v2667_v1 = vpack.c.bf16 %v2570_v24, %v2569_v28  ;;  %v2575_v58 = vmax.f32 %v7268_v21, 0.0 }
 0x224   : > { %v2254_v61 = vpop.f32.mrf.mxu1 }
 0x225   : > { %7396 = vmatprep.mubr.msk.bf16.mxu0 %vm2721_vm6, %v2667_v1  ;;  %v2573_v12 = vmax.f32 %v2254_v61, 0.0 }
 0x226   : > { %v7269_v3 = vpop.f32.mrf.mxu1  ;;  %7397 = vmatmul.mubr.msk.bf16.gmra.mxu0 %vm2721_vm6, %v2668_v46 }
 0x227   : > { %v2576_v29 = vmax.f32 %v7269_v3, 0.0 }
 0x228   : > { %v2257_v30 = vpop.f32.mrf.mxu1 }
 0x229   : > { %v2574_v14 = vmax.f32 %v2257_v30, 0.0  ;;  %v2670_v38 = vpack.c.bf16 %v2576_v29, %v2575_v58 }
 0x22a   : > { %v7272_v19 = vpop.f32.mrf.mxu1 }
 0x22b   : > { %v2669_v34 = vpack.c.bf16 %v2574_v14, %v2573_v12  ;;  %v2579_v50 = vmax.f32 %v7272_v19, 0.0 }
 0x22c   : > { %v2270_v20 = vpop.f32.mrf.mxu1 }
 0x22d   : > { %7400 = vmatprep.mubr.msk.bf16.mxu0 %vm2721_vm6, %v2669_v34  ;;  %v2577_v39 = vmax.f32 %v2270_v20, 0.0 }
 0x22e   : > { %v7273_v45 = vpop.f32.mrf.mxu1  ;;  %7401 = vmatmul.mubr.msk.bf16.gmra.mxu0 %vm2721_vm6, %v2670_v38 }
 0x22f   : > { %v2580_v54 = vmax.f32 %v7273_v45, 0.0 }
 0x230   : > { %v2273_v32 = vpop.f32.mrf.mxu1 }
 0x231   : > { %v2578_v31 = vmax.f32 %v2273_v32, 0.0  ;;  %v2672_v59 = vpack.c.bf16 %v2580_v54, %v2579_v50 }
 0x232   : > { %v7276_v35 = vpop.f32.mrf.mxu1 }
 0x233   : > { %v2671_v52 = vpack.c.bf16 %v2578_v31, %v2577_v39  ;;  %v2583_v10 = vmax.f32 %v7276_v35, 0.0 }
 0x234   : > { %v2286_v57 = vpop.f32.mrf.mxu1 }
 0x235   : > { %7404 = vmatprep.mubr.msk.bf16.mxu0 %vm2721_vm6, %v2671_v52  ;;  %v2581_v18 = vmax.f32 %v2286_v57, 0.0 }
 0x236   : > { %v7277_v23 = vpop.f32.mrf.mxu1  ;;  %7405 = vmatmul.mubr.msk.bf16.gmra.mxu0 %vm2721_vm6, %v2672_v59 }
 0x237   : > { %v2584_v6 = vmax.f32 %v7277_v23, 0.0 }
 0x238   : > { %v2289_v27 = vpop.f32.mrf.mxu1 }
 0x239   : > { %v2582_v33 = vmax.f32 %v2289_v27, 0.0  ;;  %v2674_v9 = vpack.c.bf16 %v2584_v6, %v2583_v10 }
 0x23a   : > { %v7280_v37 = vpop.f32.mrf.mxu1 }
 0x23b   : > { %v2673_v60 = vpack.c.bf16 %v2582_v33, %v2581_v18  ;;  %v2587_v8 = vmax.f32 %v7280_v37, 0.0 }
 0x23c   : > { %v2302_v4 = vpop.f32.mrf.mxu1 }
 0x23d   : > { %7408 = vmatprep.mubr.msk.bf16.mxu0 %vm2721_vm6, %v2673_v60  ;;  %v2585_v48 = vmax.f32 %v2302_v4, 0.0 }
 0x23e   : > { %v7281_v43 = vpop.f32.mrf.mxu1  ;;  %7409 = vmatmul.mubr.msk.bf16.gmra.mxu0 %vm2721_vm6, %v2674_v9 }
 0x23f   : > { %v2588_v17 = vmax.f32 %v7281_v43, 0.0 }
 0x240   : > { %v2305_v63 = vpop.f32.mrf.mxu1 }
 0x241   : > { %v2586_v42 = vmax.f32 %v2305_v63, 0.0  ;;  %v2676_v25 = vpack.c.bf16 %v2588_v17, %v2587_v8 }
 0x242   : > { %v7284_v44 = vpop.f32.mrf.mxu1 }
 0x243   : > { %v2675_v56 = vpack.c.bf16 %v2586_v42, %v2585_v48  ;;  %v2591_v47 = vmax.f32 %v7284_v44, 0.0 }
 0x244   : > { %v2318_v11 = vpop.f32.mrf.mxu1 }
 0x245   : > { %7412 = vmatprep.mubr.msk.bf16.mxu0 %vm2721_vm6, %v2675_v56  ;;  %v2589_v55 = vmax.f32 %v2318_v11, 0.0 }
 0x246   : > { %v7285_v26 = vpop.f32.mrf.mxu1  ;;  %7413 = vmatmul.mubr.msk.bf16.gmra.mxu0 %vm2721_vm6, %v2676_v25 }
 0x247   : > { %v2592_v51 = vmax.f32 %v7285_v26, 0.0 }
 0x248   : > { %v2321_v49 = vpop.f32.mrf.mxu1 }
 0x249   : > { %v2590_v62 = vmax.f32 %v2321_v49, 0.0  ;;  %v2678_v15 = vpack.c.bf16 %v2592_v51, %v2591_v47 }
 0x24a   : > { %v7288_v13 = vpop.f32.mrf.mxu1 }
 0x24b   : > { %v2677_v2 = vpack.c.bf16 %v2590_v62, %v2589_v55  ;;  %v2595_v7 = vmax.f32 %v7288_v13, 0.0 }
 0x24c   : > { %v2334_v22 = vpop.f32.mrf.mxu1 }
 0x24d   : > { %7416 = vmatprep.mubr.msk.bf16.mxu0 %vm2721_vm6, %v2677_v2  ;;  %v2593_v36 = vmax.f32 %v2334_v22, 0.0 }
 0x24e   : > { %v7289_v53 = vpop.f32.mrf.mxu1  ;;  %7417 = vmatmul.mubr.msk.bf16.gmra.mxu0 %vm2721_vm6, %v2678_v15 }
 0x24f   : > { %v2596_v5 = vmax.f32 %v7289_v53, 0.0 }
 0x250   : > { %v2337_v41 = vpop.f32.mrf.mxu1 }
 0x251   : > { %v2594_v0 = vmax.f32 %v2337_v41, 0.0  ;;  %v2680_v24 = vpack.c.bf16 %v2596_v5, %v2595_v7 }
 0x252   : > { %v7292_v16 = vpop.f32.mrf.mxu1 }
 0x253   : > { %v2679_v28 = vpack.c.bf16 %v2594_v0, %v2593_v36  ;;  %v2599_v29 = vmax.f32 %v7292_v16, 0.0 }
 0x254   : > { %v2350_v40 = vpop.f32.mrf.mxu1 }
 0x255   : > { %7420 = vmatprep.mubr.msk.bf16.mxu0 %vm2721_vm6, %v2679_v28  ;;  %v2597_v61 = vmax.f32 %v2350_v40, 0.0 }
 0x256   : > { %v7293_v21 = vpop.f32.mrf.mxu1  ;;  %7421 = vmatmul.mubr.msk.bf16.gmra.mxu0 %vm2721_vm6, %v2680_v24 }
 0x257   : > { %v2600_v1 = vmax.f32 %v7293_v21, 0.0 }
 0x258   : > { %v2353_v46 = vpop.f32.mrf.mxu1 }
 0x259   : > { %v2598_v3 = vmax.f32 %v2353_v46, 0.0  ;;  %v2682_v14 = vpack.c.bf16 %v2600_v1, %v2599_v29 }
 0x25a   : > { %v7296_v30 = vpop.f32.mrf.mxu1 }
 0x25b   : > { %v2681_v12 = vpack.c.bf16 %v2598_v3, %v2597_v61  ;;  %v2603_v54 = vmax.f32 %v7296_v30, 0.0 }
 0x25c   : > { %v2366_v58 = vpop.f32.mrf.mxu1 }
 0x25d   : > { %7424 = vmatprep.mubr.msk.bf16.mxu0 %vm2721_vm6, %v2681_v12  ;;  %v2601_v20 = vmax.f32 %v2366_v58, 0.0 }
 0x25e   : > { %v7297_v19 = vpop.f32.mrf.mxu1  ;;  %7425 = vmatmul.mubr.msk.bf16.gmra.mxu0 %vm2721_vm6, %v2682_v14 }
 0x25f   : > { %v2604_v34 = vmax.f32 %v7297_v19, 0.0 }
 0x260   : > { %v2369_v38 = vpop.f32.mrf.mxu1 }
 0x261   : > { %v2602_v45 = vmax.f32 %v2369_v38, 0.0  ;;  %v2684_v31 = vpack.c.bf16 %v2604_v34, %v2603_v54 }
 0x262   : > { %v7300_v32 = vpop.f32.mrf.mxu1 }
 0x263   : > { %v2683_v39 = vpack.c.bf16 %v2602_v45, %v2601_v20  ;;  %v2607_v6 = vmax.f32 %v7300_v32, 0.0 }
 0x264   : > { %v2382_v50 = vpop.f32.mrf.mxu1 }
 0x265   : > { %7428 = vmatprep.mubr.msk.bf16.mxu0 %vm2721_vm6, %v2683_v39  ;;  %v2605_v57 = vmax.f32 %v2382_v50, 0.0 }
 0x266   : > { %v7301_v35 = vpop.f32.mrf.mxu1  ;;  %7429 = vmatmul.mubr.msk.bf16.gmra.mxu0 %vm2721_vm6, %v2684_v31 }
 0x267   : > { %v2608_v52 = vmax.f32 %v7301_v35, 0.0 }
 0x268   : > { %v2385_v59 = vpop.f32.mrf.mxu1 }
 0x269   : > { %v2606_v23 = vmax.f32 %v2385_v59, 0.0  ;;  %v2686_v33 = vpack.c.bf16 %v2608_v52, %v2607_v6 }
 0x26a   : > { %v7304_v27 = vpop.f32.mrf.mxu1 }
 0x26b   : > { %v2685_v18 = vpack.c.bf16 %v2606_v23, %v2605_v57  ;;  %v2611_v48 = vmax.f32 %v7304_v27, 0.0 }
 0x26c   : > { %v2398_v10 = vpop.f32.mrf.mxu1 }
 0x26d   : > { %7432 = vmatprep.mubr.msk.bf16.mxu0 %vm2721_vm6, %v2685_v18  ;;  %v2609_v17 = vmax.f32 %v2398_v10, 0.0 }
 0x26e   : > { %v7305_v37 = vpop.f32.mrf.mxu1  ;;  %v7338_v60 = vpop.f32.mrf.mxu0  ;;  %7433 = vmatmul.mubr.msk.bf16.gmra.mxu0 %vm2721_vm6, %v2686_v33 }
 0x26f   : > { %v2612_v9 = vmax.f32 %v7305_v37, 0.0  ;;  %v3467_v55 = vmax.f32 %v7338_v60, 0.0 }
 0x270   : > { %v2401_v4 = vpop.f32.mrf.mxu1  ;;  %v2954_v43 = vpop.f32.mrf.mxu0 }
 0x271   : > { %v2610_v63 = vmax.f32 %v2401_v4, 0.0  ;;  %v2688_v56 = vpack.c.bf16 %v2612_v9, %v2611_v48  ;;  %v3465_v51 = vmax.f32 %v2954_v43, 0.0 }
 0x272   : > { %v7308_v42 = vpop.f32.mrf.mxu1  ;;  %v7339_v8 = vpop.f32.mrf.mxu0 }
 0x273   : > { %v2687_v44 = vpack.c.bf16 %v2610_v63, %v2609_v17  ;;  %v3468_v25 = vmax.f32 %v7339_v8, 0.0  ;;  %v2615_v36 = vmax.f32 %v7308_v42, 0.0 }
 0x274   : > { %v2414_v11 = vpop.f32.mrf.mxu1  ;;  %v2957_v26 = vpop.f32.mrf.mxu0 }
 0x275   : > { %v3466_v49 = vmax.f32 %v2957_v26, 0.0  ;;  %7436 = vmatprep.mubr.msk.bf16.mxu0 %vm2721_vm6, %v2687_v44  ;;  %v3594_v2 = vpack.c.bf16 %v3468_v25, %v3467_v55  ;;  %v2613_v5 = vmax.f32 %v2414_v11, 0.0 }
 0x276   : > { %v7309_v62 = vpop.f32.mrf.mxu1  ;;  %v7342_v47 = vpop.f32.mrf.mxu0  ;;  %7437 = vmatmul.mubr.msk.bf16.gmra.mxu0 %vm2721_vm6, %v2688_v56 }
 0x277   : > { %v3593_v13 = vpack.c.bf16 %v3466_v49, %v3465_v51  ;;  %v2616_v15 = vmax.f32 %v7309_v62, 0.0  ;;  %v3471_v61 = vmax.f32 %v7342_v47, 0.0 }
 0x278   : > { %v2417_v22 = vpop.f32.mrf.mxu1  ;;  %v2970_v53 = vpop.f32.mrf.mxu0 }
 0x279   : > { %v2614_v41 = vmax.f32 %v2417_v22, 0.0  ;;  %7468 = vmatprep.mubr.msk.bf16.mxu1 %vm3669_vm9, %v3593_v13  ;;  %v2690_v28 = vpack.c.bf16 %v2616_v15, %v2615_v36  ;;  %v3469_v1 = vmax.f32 %v2970_v53, 0.0 }
 0x27a   : > { %v7312_v0 = vpop.f32.mrf.mxu1  ;;  %v7343_v7 = vpop.f32.mrf.mxu0  ;;  %7469 = vmatmul.mubr.msk.bf16.vlgmr.msra.gmra.mxu1 %vm3669_vm9, %v3594_v2 }
 0x27b   : > { %v2689_v16 = vpack.c.bf16 %v2614_v41, %v2613_v5  ;;  %v3472_v24 = vmax.f32 %v7343_v7, 0.0  ;;  %v2619_v20 = vmax.f32 %v7312_v0, 0.0 }
 0x27c   : > { %v2430_v40 = vpop.f32.mrf.mxu1  ;;  %v2973_v21 = vpop.f32.mrf.mxu0 }
 0x27d   : > { %v3470_v46 = vmax.f32 %v2973_v21, 0.0  ;;  %7440 = vmatprep.mubr.msk.bf16.mxu0 %vm2721_vm6, %v2689_v16  ;;  %v3596_v12 = vpack.c.bf16 %v3472_v24, %v3471_v61  ;;  %v2617_v34 = vmax.f32 %v2430_v40, 0.0 }
 0x27e   : > { %v7313_v3 = vpop.f32.mrf.mxu1  ;;  %v7346_v29 = vpop.f32.mrf.mxu0  ;;  %7441 = vmatmul.mubr.msk.bf16.gmra.mxu0 %vm2721_vm6, %v2690_v28 }
 0x27f   : > { %v3595_v30 = vpack.c.bf16 %v3470_v46, %v3469_v1  ;;  %v2620_v14 = vmax.f32 %v7313_v3, 0.0  ;;  %v3475_v57 = vmax.f32 %v7346_v29, 0.0 }
 0x280   : > { %v2433_v58 = vpop.f32.mrf.mxu1  ;;  %v2986_v19 = vpop.f32.mrf.mxu0 }
 0x281   : > { %v2618_v38 = vmax.f32 %v2433_v58, 0.0  ;;  %7472 = vmatprep.mubr.msk.bf16.mxu1 %vm3669_vm9, %v3595_v30  ;;  %v2692_v39 = vpack.c.bf16 %v2620_v14, %v2619_v20  ;;  %v3473_v52 = vmax.f32 %v2986_v19, 0.0 }
 0x282   : > { %v7316_v45 = vpop.f32.mrf.mxu1  ;;  %v7347_v54 = vpop.f32.mrf.mxu0  ;;  %7473 = vmatmul.mubr.msk.bf16.gmra.mxu1 %vm3669_vm9, %v3596_v12 }
 0x283   : > { %v2691_v32 = vpack.c.bf16 %v2618_v38, %v2617_v34  ;;  %v3476_v31 = vmax.f32 %v7347_v54, 0.0  ;;  %v2623_v4 = vmax.f32 %v7316_v45, 0.0 }
 0x284   : > { %v2446_v50 = vpop.f32.mrf.mxu1  ;;  %v2989_v35 = vpop.f32.mrf.mxu0 }
 0x285   : > { %v3474_v59 = vmax.f32 %v2989_v35, 0.0  ;;  %7444 = vmatprep.mubr.msk.bf16.mxu0 %vm2721_vm6, %v2691_v32  ;;  %v3598_v18 = vpack.c.bf16 %v3476_v31, %v3475_v57  ;;  %v2621_v60 = vmax.f32 %v2446_v50, 0.0 }
 0x286   : > { %v7317_v23 = vpop.f32.mrf.mxu1  ;;  %v7350_v6 = vpop.f32.mrf.mxu0  ;;  %7445 = vmatmul.mubr.msk.bf16.gmra.mxu0 %vm2721_vm6, %v2692_v39 }
 0x287   : > { %v3597_v27 = vpack.c.bf16 %v3474_v59, %v3473_v52  ;;  %v2624_v33 = vmax.f32 %v7317_v23, 0.0  ;;  %v3479_v11 = vmax.f32 %v7350_v6, 0.0 }
 0x288   : > { %v2449_v10 = vpop.f32.mrf.mxu1  ;;  %v3002_v37 = vpop.f32.mrf.mxu0 }
 0x289   : > { %v2622_v9 = vmax.f32 %v2449_v10, 0.0  ;;  %7476 = vmatprep.mubr.msk.bf16.mxu1 %vm3669_vm9, %v3597_v27  ;;  %v2694_v48 = vpack.c.bf16 %v2624_v33, %v2623_v4  ;;  %v3477_v56 = vmax.f32 %v3002_v37, 0.0 }
 0x28a   : > { %v7320_v43 = vpop.f32.mrf.mxu1  ;;  %v7351_v17 = vpop.f32.mrf.mxu0  ;;  %7477 = vmatmul.mubr.msk.bf16.gmra.mxu1 %vm3669_vm9, %v3598_v18 }
 0x28b   : > { %v2693_v63 = vpack.c.bf16 %v2622_v9, %v2621_v60  ;;  %v3480_v42 = vmax.f32 %v7351_v17, 0.0  ;;  %v2627_v22 = vmax.f32 %v7320_v43, 0.0 }
 0x28c   : > { %v2462_v8 = vpop.f32.mrf.mxu1  ;;  %v3005_v44 = vpop.f32.mrf.mxu0 }
 0x28d   : > { %v3478_v25 = vmax.f32 %v3005_v44, 0.0  ;;  %7448 = vmatprep.mubr.msk.bf16.mxu0 %vm2721_vm6, %v2693_v63  ;;  %v3600_v55 = vpack.c.bf16 %v3480_v42, %v3479_v11  ;;  %v2625_v2 = vmax.f32 %v2462_v8, 0.0 }
 0x28e   : > { %v7321_v26 = vpop.f32.mrf.mxu1  ;;  %v7354_v51 = vpop.f32.mrf.mxu0  ;;  %7449 = vmatmul.mubr.msk.bf16.gmra.mxu0 %vm2721_vm6, %v2694_v48 }
 0x28f   : > { %v3599_v49 = vpack.c.bf16 %v3478_v25, %v3477_v56  ;;  %v2628_v62 = vmax.f32 %v7321_v26, 0.0  ;;  %v3483_v40 = vmax.f32 %v7354_v51, 0.0 }
 0x290   : > { %v2465_v47 = vpop.f32.mrf.mxu1  ;;  %v3018_v13 = vpop.f32.mrf.mxu0 }
 0x291   : > { %v2626_v15 = vmax.f32 %v2465_v47, 0.0  ;;  %7480 = vmatprep.mubr.msk.bf16.mxu1 %vm3669_vm9, %v3599_v49  ;;  %v2696_v36 = vpack.c.bf16 %v2628_v62, %v2627_v22  ;;  %v3481_v28 = vmax.f32 %v3018_v13, 0.0 }
 0x292   : > { %v7324_v53 = vpop.f32.mrf.mxu1  ;;  %v7355_v5 = vpop.f32.mrf.mxu0  ;;  %7481 = vmatmul.mubr.msk.bf16.gmra.mxu1 %vm3669_vm9, %v3600_v55 }
 0x293   : > { %v2695_v41 = vpack.c.bf16 %v2626_v15, %v2625_v2  ;;  %v3484_v0 = vmax.f32 %v7355_v5, 0.0  ;;  %v2631_v58 = vmax.f32 %v7324_v53, 0.0 }
 0x294   : > { %v2478_v7 = vpop.f32.mrf.mxu1  ;;  %v3021_v16 = vpop.f32.mrf.mxu0 }
 0x295   : > { %v3482_v24 = vmax.f32 %v3021_v16, 0.0  ;;  %7452 = vmatprep.mubr.msk.bf16.mxu0 %vm2721_vm6, %v2695_v41  ;;  %v3602_v61 = vpack.c.bf16 %v3484_v0, %v3483_v40  ;;  %v2629_v12 = vmax.f32 %v2478_v7, 0.0 }
 0x296   : > { %v7325_v21 = vpop.f32.mrf.mxu1  ;;  %v7358_v1 = vpop.f32.mrf.mxu0  ;;  %7453 = vmatmul.mubr.msk.bf16.gmra.mxu0 %vm2721_vm6, %v2696_v36 }
 0x297   : > { %v3601_v46 = vpack.c.bf16 %v3482_v24, %v3481_v28  ;;  %v2632_v3 = vmax.f32 %v7325_v21, 0.0  ;;  %v3487_v50 = vmax.f32 %v7358_v1, 0.0 }
 0x298   : > { %v2481_v29 = vpop.f32.mrf.mxu1  ;;  %v3034_v30 = vpop.f32.mrf.mxu0 }
 0x299   : > { %v2630_v14 = vmax.f32 %v2481_v29, 0.0  ;;  %7484 = vmatprep.mubr.msk.bf16.mxu1 %vm3669_vm9, %v3601_v46  ;;  %v2698_v20 = vpack.c.bf16 %v2632_v3, %v2631_v58  ;;  %v3485_v39 = vmax.f32 %v3034_v30, 0.0 }
 0x29a   : > { %v7328_v19 = vpop.f32.mrf.mxu1  ;;  %v7359_v34 = vpop.f32.mrf.mxu0  ;;  %7485 = vmatmul.mubr.msk.bf16.gmra.mxu1 %vm3669_vm9, %v3602_v61 }
 0x29b   : > { %v2697_v38 = vpack.c.bf16 %v2630_v14, %v2629_v12  ;;  %v3488_v45 = vmax.f32 %v7359_v34, 0.0  ;;  %v2635_v10 = vmax.f32 %v7328_v19, 0.0 }
 0x29c   : > { %v2494_v54 = vpop.f32.mrf.mxu1  ;;  %v3037_v32 = vpop.f32.mrf.mxu0 }
 0x29d   : > { %v3486_v31 = vmax.f32 %v3037_v32, 0.0  ;;  %7456 = vmatprep.mubr.msk.bf16.mxu0 %vm2721_vm6, %v2697_v38  ;;  %v3604_v57 = vpack.c.bf16 %v3488_v45, %v3487_v50  ;;  %v2633_v18 = vmax.f32 %v2494_v54, 0.0 }
 0x29e   : > { %v7329_v35 = vpop.f32.mrf.mxu1  ;;  %v7362_v52 = vpop.f32.mrf.mxu0  ;;  %7457 = vmatmul.mubr.msk.bf16.gmra.mxu0 %vm2721_vm6, %v2698_v20 }
 0x29f   : > { %v3603_v59 = vpack.c.bf16 %v3486_v31, %v3485_v39  ;;  %v2636_v23 = vmax.f32 %v7329_v35, 0.0  ;;  %v3491_v48 = vmax.f32 %v7362_v52, 0.0 }
 0x2a0   : > { %v2497_v6 = vpop.f32.mrf.mxu1  ;;  %v3050_v27 = vpop.f32.mrf.mxu0 }
 0x2a1   : > { %v2634_v33 = vmax.f32 %v2497_v6, 0.0  ;;  %7488 = vmatprep.mubr.msk.bf16.mxu1 %vm3669_vm9, %v3603_v59  ;;  %v2700_v9 = vpack.c.bf16 %v2636_v23, %v2635_v10  ;;  %v3489_v17 = vmax.f32 %v3050_v27, 0.0 }
 0x2a2   : > { %v7363_v37 = vpop.f32.mrf.mxu0  ;;  %7489 = vmatmul.mubr.msk.bf16.gmra.mxu1 %vm3669_vm9, %v3604_v57 }
 0x2a3   : > { %v2699_v60 = vpack.c.bf16 %v2634_v33, %v2633_v18  ;;  %v3492_v4 = vmax.f32 %v7363_v37, 0.0 }
 0x2a4   : > { %v3053_v43 = vpop.f32.mrf.mxu0 }
 0x2a5   : > { %v3490_v63 = vmax.f32 %v3053_v43, 0.0  ;;  %7460 = vmatprep.mubr.msk.bf16.mxu0 %vm2721_vm6, %v2699_v60  ;;  %v3606_v44 = vpack.c.bf16 %v3492_v4, %v3491_v48 }
 0x2a6   : > { %v7366_v42 = vpop.f32.mrf.mxu0  ;;  %7461 = vmatmul.mubr.msk.bf16.gmra.mxu0 %vm2721_vm6, %v2700_v9 }
 0x2a7   : > { %v3605_v8 = vpack.c.bf16 %v3490_v63, %v3489_v17  ;;  %v3495_v55 = vmax.f32 %v7366_v42, 0.0 }
 0x2a8   : > { %v3066_v56 = vpop.f32.mrf.mxu0 }
 0x2a9   : > { %7492 = vmatprep.mubr.msk.bf16.mxu1 %vm3669_vm9, %v3605_v8  ;;  %v3493_v51 = vmax.f32 %v3066_v56, 0.0 }
 0x2aa   : > { %v7367_v25 = vpop.f32.mrf.mxu0  ;;  %7493 = vmatmul.mubr.msk.bf16.gmra.mxu1 %vm3669_vm9, %v3606_v44 }
 0x2ab   : > { %v3496_v11 = vmax.f32 %v7367_v25, 0.0 }
 0x2ac   : > { %v3069_v26 = vpop.f32.mrf.mxu0 }
 0x2ad   : > { %v3494_v49 = vmax.f32 %v3069_v26, 0.0  ;;  %v3608_v13 = vpack.c.bf16 %v3496_v11, %v3495_v55 }
 0x2ae   : > { %v7370_v62 = vpop.f32.mrf.mxu0 }
 0x2af   : > { %v3607_v47 = vpack.c.bf16 %v3494_v49, %v3493_v51  ;;  %v3499_v36 = vmax.f32 %v7370_v62, 0.0 }
 0x2b0   : > { %v3082_v2 = vpop.f32.mrf.mxu0 }
 0x2b1   : > { %7496 = vmatprep.mubr.msk.bf16.mxu1 %vm3669_vm9, %v3607_v47  ;;  %v3497_v5 = vmax.f32 %v3082_v2, 0.0 }
 0x2b2   : > { %v7371_v15 = vpop.f32.mrf.mxu0  ;;  %7497 = vmatmul.mubr.msk.bf16.gmra.mxu1 %vm3669_vm9, %v3608_v13 }
 0x2b3   : > { %v3500_v22 = vmax.f32 %v7371_v15, 0.0 }
 0x2b4   : > { %v3085_v53 = vpop.f32.mrf.mxu0 }
 0x2b5   : > { %v3498_v41 = vmax.f32 %v3085_v53, 0.0  ;;  %v3610_v16 = vpack.c.bf16 %v3500_v22, %v3499_v36 }
 0x2b6   : > { %v7374_v0 = vpop.f32.mrf.mxu0 }
 0x2b7   : > { %v3609_v7 = vpack.c.bf16 %v3498_v41, %v3497_v5  ;;  %v3503_v61 = vmax.f32 %v7374_v0, 0.0 }
 0x2b8   : > { %v3098_v28 = vpop.f32.mrf.mxu0 }
 0x2b9   : > { %7500 = vmatprep.mubr.msk.bf16.mxu1 %vm3669_vm9, %v3609_v7  ;;  %v3501_v1 = vmax.f32 %v3098_v28, 0.0 }
 0x2ba   : > { %v7375_v24 = vpop.f32.mrf.mxu0  ;;  %7501 = vmatmul.mubr.msk.bf16.gmra.mxu1 %vm3669_vm9, %v3610_v16 }
 0x2bb   : > { %v3504_v40 = vmax.f32 %v7375_v24, 0.0 }
 0x2bc   : > { %v3101_v21 = vpop.f32.mrf.mxu0 }
 0x2bd   : > { %v3502_v46 = vmax.f32 %v3101_v21, 0.0  ;;  %v3612_v30 = vpack.c.bf16 %v3504_v40, %v3503_v61 }
 0x2be   : > { %v7378_v3 = vpop.f32.mrf.mxu0 }
 0x2bf   : > { %v3611_v29 = vpack.c.bf16 %v3502_v46, %v3501_v1  ;;  %v3507_v20 = vmax.f32 %v7378_v3, 0.0 }
 0x2c0   : > { %v3114_v12 = vpop.f32.mrf.mxu0 }
 0x2c1   : > { %7504 = vmatprep.mubr.msk.bf16.mxu1 %vm3669_vm9, %v3611_v29  ;;  %v3505_v34 = vmax.f32 %v3114_v12, 0.0 }
 0x2c2   : > { %v7379_v14 = vpop.f32.mrf.mxu0  ;;  %7505 = vmatmul.mubr.msk.bf16.gmra.mxu1 %vm3669_vm9, %v3612_v30 }
 0x2c3   : > { %v3508_v58 = vmax.f32 %v7379_v14, 0.0 }
 0x2c4   : > { %v3117_v19 = vpop.f32.mrf.mxu0 }
 0x2c5   : > { %v3506_v38 = vmax.f32 %v3117_v19, 0.0  ;;  %v3614_v32 = vpack.c.bf16 %v3508_v58, %v3507_v20 }
 0x2c6   : > { %v7382_v45 = vpop.f32.mrf.mxu0 }
 0x2c7   : > { %v3613_v54 = vpack.c.bf16 %v3506_v38, %v3505_v34  ;;  %v3511_v57 = vmax.f32 %v7382_v45, 0.0 }
 0x2c8   : > { %v3130_v39 = vpop.f32.mrf.mxu0 }
 0x2c9   : > { %7508 = vmatprep.mubr.msk.bf16.mxu1 %vm3669_vm9, %v3613_v54  ;;  %v3509_v52 = vmax.f32 %v3130_v39, 0.0 }
 0x2ca   : > { %v7383_v31 = vpop.f32.mrf.mxu0  ;;  %7509 = vmatmul.mubr.msk.bf16.gmra.mxu1 %vm3669_vm9, %v3614_v32 }
 0x2cb   : > { %v3512_v50 = vmax.f32 %v7383_v31, 0.0 }
 0x2cc   : > { %v3133_v35 = vpop.f32.mrf.mxu0 }
 0x2cd   : > { %v3510_v59 = vmax.f32 %v3133_v35, 0.0  ;;  %v3616_v27 = vpack.c.bf16 %v3512_v50, %v3511_v57 }
 0x2ce   : > { %v7386_v23 = vpop.f32.mrf.mxu0 }
 0x2cf   : > { %v3615_v6 = vpack.c.bf16 %v3510_v59, %v3509_v52  ;;  %v3515_v4 = vmax.f32 %v7386_v23, 0.0 }
 0x2d0   : > { %v3146_v18 = vpop.f32.mrf.mxu0 }
 0x2d1   : > { %7512 = vmatprep.mubr.msk.bf16.mxu1 %vm3669_vm9, %v3615_v6  ;;  %v3513_v60 = vmax.f32 %v3146_v18, 0.0 }
 0x2d2   : > { %v7387_v33 = vpop.f32.mrf.mxu0  ;;  %7513 = vmatmul.mubr.msk.bf16.gmra.mxu1 %vm3669_vm9, %v3616_v27 }
 0x2d3   : > { %v3516_v10 = vmax.f32 %v7387_v33, 0.0 }
 0x2d4   : > { %v3149_v37 = vpop.f32.mrf.mxu0 }
 0x2d5   : > { %v3514_v9 = vmax.f32 %v3149_v37, 0.0  ;;  %v3618_v63 = vpack.c.bf16 %v3516_v10, %v3515_v4 }
 0x2d6   : > { %v7390_v43 = vpop.f32.mrf.mxu0 }
 0x2d7   : > { %v3617_v17 = vpack.c.bf16 %v3514_v9, %v3513_v60  ;;  %v3519_v11 = vmax.f32 %v7390_v43, 0.0 }
 0x2d8   : > { %v3162_v48 = vpop.f32.mrf.mxu0 }
 0x2d9   : > { %7516 = vmatprep.mubr.msk.bf16.mxu1 %vm3669_vm9, %v3617_v17  ;;  %v3517_v56 = vmax.f32 %v3162_v48, 0.0 }
 0x2da   : > { %v7391_v42 = vpop.f32.mrf.mxu0  ;;  %7517 = vmatmul.mubr.msk.bf16.gmra.mxu1 %vm3669_vm9, %v3618_v63 }
 0x2db   : > { %v3520_v8 = vmax.f32 %v7391_v42, 0.0 }
 0x2dc   : > { %v3165_v44 = vpop.f32.mrf.mxu0 }
 0x2dd   : > { %v3518_v25 = vmax.f32 %v3165_v44, 0.0  ;;  %v3620_v49 = vpack.c.bf16 %v3520_v8, %v3519_v11 }
 0x2de   : > { %v7394_v26 = vpop.f32.mrf.mxu0 }
 0x2df   : > { %v3619_v51 = vpack.c.bf16 %v3518_v25, %v3517_v56  ;;  %v3523_v22 = vmax.f32 %v7394_v26, 0.0 }
 0x2e0   : > { %v3178_v55 = vpop.f32.mrf.mxu0 }
 0x2e1   : > { %7520 = vmatprep.mubr.msk.bf16.mxu1 %vm3669_vm9, %v3619_v51  ;;  %v3521_v2 = vmax.f32 %v3178_v55, 0.0 }
 0x2e2   : > { %v7395_v62 = vpop.f32.mrf.mxu0  ;;  %7521 = vmatmul.mubr.msk.bf16.gmra.mxu1 %vm3669_vm9, %v3620_v49 }
 0x2e3   : > { %v3524_v47 = vmax.f32 %v7395_v62, 0.0 }
 0x2e4   : > { %v3181_v13 = vpop.f32.mrf.mxu0 }
 0x2e5   : > { %v3522_v15 = vmax.f32 %v3181_v13, 0.0  ;;  %v3622_v41 = vpack.c.bf16 %v3524_v47, %v3523_v22 }
 0x2e6   : > { %v7398_v53 = vpop.f32.mrf.mxu0 }
 0x2e7   : > { %v3621_v5 = vpack.c.bf16 %v3522_v15, %v3521_v2  ;;  %v3527_v40 = vmax.f32 %v7398_v53, 0.0 }
 0x2e8   : > { %v3194_v36 = vpop.f32.mrf.mxu0 }
 0x2e9   : > { %7524 = vmatprep.mubr.msk.bf16.mxu1 %vm3669_vm9, %v3621_v5  ;;  %v3525_v28 = vmax.f32 %v3194_v36, 0.0 }
 0x2ea   : > { %v7399_v0 = vpop.f32.mrf.mxu0  ;;  %7525 = vmatmul.mubr.msk.bf16.gmra.mxu1 %vm3669_vm9, %v3622_v41 }
 0x2eb   : > { %v3528_v7 = vmax.f32 %v7399_v0, 0.0 }
 0x2ec   : > { %v3197_v16 = vpop.f32.mrf.mxu0 }
 0x2ed   : > { %v3526_v24 = vmax.f32 %v3197_v16, 0.0  ;;  %v3624_v46 = vpack.c.bf16 %v3528_v7, %v3527_v40 }
 0x2ee   : > { %v7402_v21 = vpop.f32.mrf.mxu0 }
 0x2ef   : > { %v3623_v1 = vpack.c.bf16 %v3526_v24, %v3525_v28  ;;  %v3531_v58 = vmax.f32 %v7402_v21, 0.0 }
 0x2f0   : > { %v3210_v61 = vpop.f32.mrf.mxu0 }
 0x2f1   : > { %7528 = vmatprep.mubr.msk.bf16.mxu1 %vm3669_vm9, %v3623_v1  ;;  %v3529_v12 = vmax.f32 %v3210_v61, 0.0 }
 0x2f2   : > { %v7403_v3 = vpop.f32.mrf.mxu0  ;;  %7529 = vmatmul.mubr.msk.bf16.gmra.mxu1 %vm3669_vm9, %v3624_v46 }
 0x2f3   : > { %v3532_v29 = vmax.f32 %v7403_v3, 0.0 }
 0x2f4   : > { %v3213_v30 = vpop.f32.mrf.mxu0 }
 0x2f5   : > { %v3530_v14 = vmax.f32 %v3213_v30, 0.0  ;;  %v3626_v38 = vpack.c.bf16 %v3532_v29, %v3531_v58 }
 0x2f6   : > { %v7406_v19 = vpop.f32.mrf.mxu0 }
 0x2f7   : > { %v3625_v34 = vpack.c.bf16 %v3530_v14, %v3529_v12  ;;  %v3535_v50 = vmax.f32 %v7406_v19, 0.0 }
 0x2f8   : > { %v3226_v20 = vpop.f32.mrf.mxu0 }
 0x2f9   : > { %7532 = vmatprep.mubr.msk.bf16.mxu1 %vm3669_vm9, %v3625_v34  ;;  %v3533_v39 = vmax.f32 %v3226_v20, 0.0 }
 0x2fa   : > { %v7407_v45 = vpop.f32.mrf.mxu0  ;;  %7533 = vmatmul.mubr.msk.bf16.gmra.mxu1 %vm3669_vm9, %v3626_v38 }
 0x2fb   : > { %v3536_v54 = vmax.f32 %v7407_v45, 0.0 }
 0x2fc   : > { %v3229_v32 = vpop.f32.mrf.mxu0 }
 0x2fd   : > { %v3534_v31 = vmax.f32 %v3229_v32, 0.0  ;;  %v3628_v59 = vpack.c.bf16 %v3536_v54, %v3535_v50 }
 0x2fe   : > { %v7410_v35 = vpop.f32.mrf.mxu0 }
 0x2ff   : > { %v3627_v52 = vpack.c.bf16 %v3534_v31, %v3533_v39  ;;  %v3539_v10 = vmax.f32 %v7410_v35, 0.0 }
 0x300   : > { %v3242_v57 = vpop.f32.mrf.mxu0 }
 0x301   : > { %7536 = vmatprep.mubr.msk.bf16.mxu1 %vm3669_vm9, %v3627_v52  ;;  %v3537_v18 = vmax.f32 %v3242_v57, 0.0 }
 0x302   : > { %v7411_v23 = vpop.f32.mrf.mxu0  ;;  %7537 = vmatmul.mubr.msk.bf16.gmra.mxu1 %vm3669_vm9, %v3628_v59 }
 0x303   : > { %v3540_v6 = vmax.f32 %v7411_v23, 0.0 }
 0x304   : > { %v3245_v27 = vpop.f32.mrf.mxu0 }
 0x305   : > { %v3538_v33 = vmax.f32 %v3245_v27, 0.0  ;;  %v3630_v9 = vpack.c.bf16 %v3540_v6, %v3539_v10 }
 0x306   : > { %v7414_v37 = vpop.f32.mrf.mxu0 }
 0x307   : > { %v3629_v60 = vpack.c.bf16 %v3538_v33, %v3537_v18  ;;  %v3543_v8 = vmax.f32 %v7414_v37, 0.0 }
 0x308   : > { %v3258_v4 = vpop.f32.mrf.mxu0 }
 0x309   : > { %7540 = vmatprep.mubr.msk.bf16.mxu1 %vm3669_vm9, %v3629_v60  ;;  %v3541_v48 = vmax.f32 %v3258_v4, 0.0 }
 0x30a   : > { %v7415_v43 = vpop.f32.mrf.mxu0  ;;  %7541 = vmatmul.mubr.msk.bf16.gmra.mxu1 %vm3669_vm9, %v3630_v9 }
 0x30b   : > { %v3544_v17 = vmax.f32 %v7415_v43, 0.0 }
 0x30c   : > { %v3261_v63 = vpop.f32.mrf.mxu0 }
 0x30d   : > { %v3542_v42 = vmax.f32 %v3261_v63, 0.0  ;;  %v3632_v25 = vpack.c.bf16 %v3544_v17, %v3543_v8 }
 0x30e   : > { %v7418_v44 = vpop.f32.mrf.mxu0 }
 0x30f   : > { %v3631_v56 = vpack.c.bf16 %v3542_v42, %v3541_v48  ;;  %v3547_v47 = vmax.f32 %v7418_v44, 0.0 }
 0x310   : > { %v3274_v11 = vpop.f32.mrf.mxu0 }
 0x311   : > { %7544 = vmatprep.mubr.msk.bf16.mxu1 %vm3669_vm9, %v3631_v56  ;;  %v3545_v55 = vmax.f32 %v3274_v11, 0.0 }
 0x312   : > { %v7419_v26 = vpop.f32.mrf.mxu0  ;;  %7545 = vmatmul.mubr.msk.bf16.gmra.mxu1 %vm3669_vm9, %v3632_v25 }
 0x313   : > { %v3548_v51 = vmax.f32 %v7419_v26, 0.0 }
 0x314   : > { %v3277_v49 = vpop.f32.mrf.mxu0 }
 0x315   : > { %v3546_v62 = vmax.f32 %v3277_v49, 0.0  ;;  %v3634_v15 = vpack.c.bf16 %v3548_v51, %v3547_v47 }
 0x316   : > { %v7422_v13 = vpop.f32.mrf.mxu0 }
 0x317   : > { %v3633_v2 = vpack.c.bf16 %v3546_v62, %v3545_v55  ;;  %v3551_v7 = vmax.f32 %v7422_v13, 0.0 }
 0x318   : > { %v3290_v22 = vpop.f32.mrf.mxu0 }
 0x319   : > { %7548 = vmatprep.mubr.msk.bf16.mxu1 %vm3669_vm9, %v3633_v2  ;;  %v3549_v36 = vmax.f32 %v3290_v22, 0.0 }
 0x31a   : > { %v7423_v53 = vpop.f32.mrf.mxu0  ;;  %7549 = vmatmul.mubr.msk.bf16.gmra.mxu1 %vm3669_vm9, %v3634_v15 }
 0x31b   : > { %v3552_v5 = vmax.f32 %v7423_v53, 0.0 }
 0x31c   : > { %v3293_v41 = vpop.f32.mrf.mxu0 }
 0x31d   : > { %v3550_v0 = vmax.f32 %v3293_v41, 0.0  ;;  %v3636_v24 = vpack.c.bf16 %v3552_v5, %v3551_v7 }
 0x31e   : > { %v7426_v16 = vpop.f32.mrf.mxu0 }
 0x31f   : > { %v3635_v28 = vpack.c.bf16 %v3550_v0, %v3549_v36  ;;  %v3555_v29 = vmax.f32 %v7426_v16, 0.0 }
 0x320   : > { %v3306_v40 = vpop.f32.mrf.mxu0 }
 0x321   : > { %7552 = vmatprep.mubr.msk.bf16.mxu1 %vm3669_vm9, %v3635_v28  ;;  %v3553_v61 = vmax.f32 %v3306_v40, 0.0 }
 0x322   : > { %v7427_v21 = vpop.f32.mrf.mxu0  ;;  %7553 = vmatmul.mubr.msk.bf16.gmra.mxu1 %vm3669_vm9, %v3636_v24 }
 0x323   : > { %v3556_v1 = vmax.f32 %v7427_v21, 0.0 }
 0x324   : > { %v3309_v46 = vpop.f32.mrf.mxu0 }
 0x325   : > { %v3554_v3 = vmax.f32 %v3309_v46, 0.0  ;;  %v3638_v14 = vpack.c.bf16 %v3556_v1, %v3555_v29 }
 0x326   : > { %v7430_v30 = vpop.f32.mrf.mxu0 }
 0x327   : > { %v3637_v12 = vpack.c.bf16 %v3554_v3, %v3553_v61  ;;  %v3559_v54 = vmax.f32 %v7430_v30, 0.0 }
 0x328   : > { %v3322_v58 = vpop.f32.mrf.mxu0 }
 0x329   : > { %7556 = vmatprep.mubr.msk.bf16.mxu1 %vm3669_vm9, %v3637_v12  ;;  %v3557_v20 = vmax.f32 %v3322_v58, 0.0 }
 0x32a   : > { %v7431_v19 = vpop.f32.mrf.mxu0  ;;  %7557 = vmatmul.mubr.msk.bf16.gmra.mxu1 %vm3669_vm9, %v3638_v14 }
 0x32b   : > { %v3560_v34 = vmax.f32 %v7431_v19, 0.0 }
 0x32c   : > { %v3325_v38 = vpop.f32.mrf.mxu0 }
 0x32d   : > { %v3558_v45 = vmax.f32 %v3325_v38, 0.0  ;;  %v3640_v31 = vpack.c.bf16 %v3560_v34, %v3559_v54 }
 0x32e   : > { %v7434_v32 = vpop.f32.mrf.mxu0 }
 0x32f   : > { %v3639_v39 = vpack.c.bf16 %v3558_v45, %v3557_v20  ;;  %v3563_v6 = vmax.f32 %v7434_v32, 0.0 }
 0x330   : > { %v3338_v50 = vpop.f32.mrf.mxu0 }
 0x331   : > { %7560 = vmatprep.mubr.msk.bf16.mxu1 %vm3669_vm9, %v3639_v39  ;;  %v3561_v57 = vmax.f32 %v3338_v50, 0.0 }
 0x332   : > { %v7435_v35 = vpop.f32.mrf.mxu0  ;;  %7561 = vmatmul.mubr.msk.bf16.gmra.mxu1 %vm3669_vm9, %v3640_v31 }
 0x333   : > { %v3564_v52 = vmax.f32 %v7435_v35, 0.0 }
 0x334   : > { %v3341_v59 = vpop.f32.mrf.mxu0 }
 0x335   : > { %v3562_v23 = vmax.f32 %v3341_v59, 0.0  ;;  %v3642_v33 = vpack.c.bf16 %v3564_v52, %v3563_v6 }
 0x336   : > { %v7438_v27 = vpop.f32.mrf.mxu0 }
 0x337   : > { %v3641_v18 = vpack.c.bf16 %v3562_v23, %v3561_v57  ;;  %v3567_v48 = vmax.f32 %v7438_v27, 0.0 }
 0x338   : > { %v3354_v10 = vpop.f32.mrf.mxu0 }
 0x339   : > { %7564 = vmatprep.mubr.msk.bf16.mxu1 %vm3669_vm9, %v3641_v18  ;;  %v3565_v17 = vmax.f32 %v3354_v10, 0.0 }
 0x33a   : > { %v7439_v37 = vpop.f32.mrf.mxu0  ;;  %v7470_v60 = vpop.f32.mrf.mxu1  ;;  %7565 = vmatmul.mubr.msk.bf16.gmra.mxu1 %vm3669_vm9, %v3642_v33 }
 0x33b   : > { %v3568_v9 = vmax.f32 %v7439_v37, 0.0  ;;  %v4414_v55 = vmax.f32 %v7470_v60, 0.0 }
 0x33c   : > { %v3357_v4 = vpop.f32.mrf.mxu0  ;;  %v3901_v43 = vpop.f32.mrf.mxu1 }
 0x33d   : > { %v3566_v63 = vmax.f32 %v3357_v4, 0.0  ;;  %v3644_v56 = vpack.c.bf16 %v3568_v9, %v3567_v48  ;;  %v4412_v51 = vmax.f32 %v3901_v43, 0.0 }
 0x33e   : > { %v7442_v42 = vpop.f32.mrf.mxu0  ;;  %v7471_v8 = vpop.f32.mrf.mxu1 }
 0x33f   : > { %v3643_v44 = vpack.c.bf16 %v3566_v63, %v3565_v17  ;;  %v4415_v25 = vmax.f32 %v7471_v8, 0.0  ;;  %v3571_v36 = vmax.f32 %v7442_v42, 0.0 }
 0x340   : > { %v3370_v11 = vpop.f32.mrf.mxu0  ;;  %v3904_v26 = vpop.f32.mrf.mxu1 }
 0x341   : > { %v4413_v49 = vmax.f32 %v3904_v26, 0.0  ;;  %7568 = vmatprep.mubr.msk.bf16.mxu1 %vm3669_vm9, %v3643_v44  ;;  %v4541_v2 = vpack.c.bf16 %v4415_v25, %v4414_v55  ;;  %v3569_v5 = vmax.f32 %v3370_v11, 0.0 }
 0x342   : > { %v7443_v62 = vpop.f32.mrf.mxu0  ;;  %v7474_v47 = vpop.f32.mrf.mxu1  ;;  %7569 = vmatmul.mubr.msk.bf16.gmra.mxu1 %vm3669_vm9, %v3644_v56 }
 0x343   : > { %v4540_v13 = vpack.c.bf16 %v4413_v49, %v4412_v51  ;;  %v3572_v15 = vmax.f32 %v7443_v62, 0.0  ;;  %v4418_v61 = vmax.f32 %v7474_v47, 0.0 }
 0x344   : > { %v3373_v22 = vpop.f32.mrf.mxu0  ;;  %v3917_v53 = vpop.f32.mrf.mxu1 }
 0x345   : > { %v3570_v41 = vmax.f32 %v3373_v22, 0.0  ;;  %7598 = vmatprep.mubr.msk.bf16.mxu0 %vm4611_vm10, %v4540_v13  ;;  %v3646_v28 = vpack.c.bf16 %v3572_v15, %v3571_v36  ;;  %v4416_v1 = vmax.f32 %v3917_v53, 0.0 }
 0x346   : > { %v7446_v0 = vpop.f32.mrf.mxu0  ;;  %v7475_v7 = vpop.f32.mrf.mxu1  ;;  %7599 = vmatmul.mubr.msk.bf16.vlgmr.msra.gmra.mxu0 %vm4611_vm10, %v4541_v2 }
 0x347   : > { %v3645_v16 = vpack.c.bf16 %v3570_v41, %v3569_v5  ;;  %v4419_v24 = vmax.f32 %v7475_v7, 0.0  ;;  %v3575_v20 = vmax.f32 %v7446_v0, 0.0 }
 0x348   : > { %v3386_v40 = vpop.f32.mrf.mxu0  ;;  %v3920_v21 = vpop.f32.mrf.mxu1 }
 0x349   : > { %v4417_v46 = vmax.f32 %v3920_v21, 0.0  ;;  %7572 = vmatprep.mubr.msk.bf16.mxu1 %vm3669_vm9, %v3645_v16  ;;  %v4543_v12 = vpack.c.bf16 %v4419_v24, %v4418_v61  ;;  %v3573_v34 = vmax.f32 %v3386_v40, 0.0 }
 0x34a   : > { %v7447_v3 = vpop.f32.mrf.mxu0  ;;  %v7478_v29 = vpop.f32.mrf.mxu1  ;;  %7573 = vmatmul.mubr.msk.bf16.gmra.mxu1 %vm3669_vm9, %v3646_v28 }
 0x34b   : > { %v4542_v30 = vpack.c.bf16 %v4417_v46, %v4416_v1  ;;  %v3576_v14 = vmax.f32 %v7447_v3, 0.0  ;;  %v4422_v57 = vmax.f32 %v7478_v29, 0.0 }
 0x34c   : > { %v3389_v58 = vpop.f32.mrf.mxu0  ;;  %v3933_v19 = vpop.f32.mrf.mxu1 }
 0x34d   : > { %v3574_v38 = vmax.f32 %v3389_v58, 0.0  ;;  %7602 = vmatprep.mubr.msk.bf16.mxu0 %vm4611_vm10, %v4542_v30  ;;  %v3648_v39 = vpack.c.bf16 %v3576_v14, %v3575_v20  ;;  %v4420_v52 = vmax.f32 %v3933_v19, 0.0 }
 0x34e   : > { %v7450_v45 = vpop.f32.mrf.mxu0  ;;  %v7479_v54 = vpop.f32.mrf.mxu1  ;;  %7603 = vmatmul.mubr.msk.bf16.gmra.mxu0 %vm4611_vm10, %v4543_v12 }
 0x34f   : > { %v3647_v32 = vpack.c.bf16 %v3574_v38, %v3573_v34  ;;  %v4423_v31 = vmax.f32 %v7479_v54, 0.0  ;;  %v3579_v4 = vmax.f32 %v7450_v45, 0.0 }
 0x350   : > { %v3402_v50 = vpop.f32.mrf.mxu0  ;;  %v3936_v35 = vpop.f32.mrf.mxu1 }
 0x351   : > { %v4421_v59 = vmax.f32 %v3936_v35, 0.0  ;;  %7576 = vmatprep.mubr.msk.bf16.mxu1 %vm3669_vm9, %v3647_v32  ;;  %v4545_v18 = vpack.c.bf16 %v4423_v31, %v4422_v57  ;;  %v3577_v60 = vmax.f32 %v3402_v50, 0.0 }
 0x352   : > { %v7451_v23 = vpop.f32.mrf.mxu0  ;;  %v7482_v6 = vpop.f32.mrf.mxu1  ;;  %7577 = vmatmul.mubr.msk.bf16.gmra.mxu1 %vm3669_vm9, %v3648_v39 }
 0x353   : > { %v4544_v27 = vpack.c.bf16 %v4421_v59, %v4420_v52  ;;  %v3580_v33 = vmax.f32 %v7451_v23, 0.0  ;;  %v4426_v11 = vmax.f32 %v7482_v6, 0.0 }
 0x354   : > { %v3405_v10 = vpop.f32.mrf.mxu0  ;;  %v3949_v37 = vpop.f32.mrf.mxu1 }
 0x355   : > { %v3578_v9 = vmax.f32 %v3405_v10, 0.0  ;;  %7606 = vmatprep.mubr.msk.bf16.mxu0 %vm4611_vm10, %v4544_v27  ;;  %v3650_v48 = vpack.c.bf16 %v3580_v33, %v3579_v4  ;;  %v4424_v56 = vmax.f32 %v3949_v37, 0.0 }
 0x356   : > { %v7454_v43 = vpop.f32.mrf.mxu0  ;;  %v7483_v17 = vpop.f32.mrf.mxu1  ;;  %7607 = vmatmul.mubr.msk.bf16.gmra.mxu0 %vm4611_vm10, %v4545_v18 }
 0x357   : > { %v3649_v63 = vpack.c.bf16 %v3578_v9, %v3577_v60  ;;  %v4427_v42 = vmax.f32 %v7483_v17, 0.0  ;;  %v3583_v22 = vmax.f32 %v7454_v43, 0.0 }
 0x358   : > { %v3418_v8 = vpop.f32.mrf.mxu0  ;;  %v3952_v44 = vpop.f32.mrf.mxu1 }
 0x359   : > { %v4425_v25 = vmax.f32 %v3952_v44, 0.0  ;;  %7580 = vmatprep.mubr.msk.bf16.mxu1 %vm3669_vm9, %v3649_v63  ;;  %v4547_v55 = vpack.c.bf16 %v4427_v42, %v4426_v11  ;;  %v3581_v2 = vmax.f32 %v3418_v8, 0.0 }
 0x35a   : > { %v7455_v26 = vpop.f32.mrf.mxu0  ;;  %v7486_v51 = vpop.f32.mrf.mxu1  ;;  %7581 = vmatmul.mubr.msk.bf16.gmra.mxu1 %vm3669_vm9, %v3650_v48 }
 0x35b   : > { %v4546_v49 = vpack.c.bf16 %v4425_v25, %v4424_v56  ;;  %v3584_v62 = vmax.f32 %v7455_v26, 0.0  ;;  %v4430_v40 = vmax.f32 %v7486_v51, 0.0 }
 0x35c   : > { %v3421_v47 = vpop.f32.mrf.mxu0  ;;  %v3965_v13 = vpop.f32.mrf.mxu1 }
 0x35d   : > { %v3582_v15 = vmax.f32 %v3421_v47, 0.0  ;;  %7610 = vmatprep.mubr.msk.bf16.mxu0 %vm4611_vm10, %v4546_v49  ;;  %v3652_v36 = vpack.c.bf16 %v3584_v62, %v3583_v22  ;;  %v4428_v28 = vmax.f32 %v3965_v13, 0.0 }
 0x35e   : > { %v7458_v53 = vpop.f32.mrf.mxu0  ;;  %v7487_v5 = vpop.f32.mrf.mxu1  ;;  %7611 = vmatmul.mubr.msk.bf16.gmra.mxu0 %vm4611_vm10, %v4547_v55 }
 0x35f   : > { %v3651_v41 = vpack.c.bf16 %v3582_v15, %v3581_v2  ;;  %v4431_v0 = vmax.f32 %v7487_v5, 0.0  ;;  %v3587_v58 = vmax.f32 %v7458_v53, 0.0 }
 0x360   : > { %v3434_v7 = vpop.f32.mrf.mxu0  ;;  %v3968_v16 = vpop.f32.mrf.mxu1 }
 0x361   : > { %v4429_v24 = vmax.f32 %v3968_v16, 0.0  ;;  %7584 = vmatprep.mubr.msk.bf16.mxu1 %vm3669_vm9, %v3651_v41  ;;  %v4549_v61 = vpack.c.bf16 %v4431_v0, %v4430_v40  ;;  %v3585_v12 = vmax.f32 %v3434_v7, 0.0 }
 0x362   : > { %v7459_v21 = vpop.f32.mrf.mxu0  ;;  %v7490_v1 = vpop.f32.mrf.mxu1  ;;  %7585 = vmatmul.mubr.msk.bf16.gmra.mxu1 %vm3669_vm9, %v3652_v36 }
 0x363   : > { %v4548_v46 = vpack.c.bf16 %v4429_v24, %v4428_v28  ;;  %v3588_v3 = vmax.f32 %v7459_v21, 0.0  ;;  %v4434_v50 = vmax.f32 %v7490_v1, 0.0 }
 0x364   : > { %v3437_v29 = vpop.f32.mrf.mxu0  ;;  %v3981_v30 = vpop.f32.mrf.mxu1 }
 0x365   : > { %v3586_v14 = vmax.f32 %v3437_v29, 0.0  ;;  %7614 = vmatprep.mubr.msk.bf16.mxu0 %vm4611_vm10, %v4548_v46  ;;  %v3654_v20 = vpack.c.bf16 %v3588_v3, %v3587_v58  ;;  %v4432_v39 = vmax.f32 %v3981_v30, 0.0 }
 0x366   : > { %v7462_v19 = vpop.f32.mrf.mxu0  ;;  %v7491_v34 = vpop.f32.mrf.mxu1  ;;  %7615 = vmatmul.mubr.msk.bf16.gmra.mxu0 %vm4611_vm10, %v4549_v61 }
 0x367   : > { %v3653_v38 = vpack.c.bf16 %v3586_v14, %v3585_v12  ;;  %v4435_v45 = vmax.f32 %v7491_v34, 0.0  ;;  %v3591_v10 = vmax.f32 %v7462_v19, 0.0 }
 0x368   : > { %v3450_v54 = vpop.f32.mrf.mxu0  ;;  %v3984_v32 = vpop.f32.mrf.mxu1 }
 0x369   : > { %v4433_v31 = vmax.f32 %v3984_v32, 0.0  ;;  %7588 = vmatprep.mubr.msk.bf16.mxu1 %vm3669_vm9, %v3653_v38  ;;  %v4551_v57 = vpack.c.bf16 %v4435_v45, %v4434_v50  ;;  %v3589_v18 = vmax.f32 %v3450_v54, 0.0 }
 0x36a   : > { %v7463_v35 = vpop.f32.mrf.mxu0  ;;  %v7494_v52 = vpop.f32.mrf.mxu1  ;;  %7589 = vmatmul.mubr.msk.bf16.gmra.mxu1 %vm3669_vm9, %v3654_v20 }
 0x36b   : > { %v4550_v59 = vpack.c.bf16 %v4433_v31, %v4432_v39  ;;  %v3592_v23 = vmax.f32 %v7463_v35, 0.0  ;;  %v4438_v48 = vmax.f32 %v7494_v52, 0.0 }
 0x36c   : > { %v3453_v6 = vpop.f32.mrf.mxu0  ;;  %v3997_v27 = vpop.f32.mrf.mxu1 }
 0x36d   : > { %v3590_v33 = vmax.f32 %v3453_v6, 0.0  ;;  %7618 = vmatprep.mubr.msk.bf16.mxu0 %vm4611_vm10, %v4550_v59  ;;  %v3656_v9 = vpack.c.bf16 %v3592_v23, %v3591_v10  ;;  %v4436_v17 = vmax.f32 %v3997_v27, 0.0 }
 0x36e   : > { %v7495_v37 = vpop.f32.mrf.mxu1  ;;  %7619 = vmatmul.mubr.msk.bf16.gmra.mxu0 %vm4611_vm10, %v4551_v57 }
 0x36f   : > { %v3655_v60 = vpack.c.bf16 %v3590_v33, %v3589_v18  ;;  %v4439_v4 = vmax.f32 %v7495_v37, 0.0 }
 0x370   : > { %v4000_v43 = vpop.f32.mrf.mxu1 }
 0x371   : > { %v4437_v63 = vmax.f32 %v4000_v43, 0.0  ;;  %7592 = vmatprep.mubr.msk.bf16.mxu1 %vm3669_vm9, %v3655_v60  ;;  %v4553_v44 = vpack.c.bf16 %v4439_v4, %v4438_v48 }
 0x372   : > { %v7498_v42 = vpop.f32.mrf.mxu1  ;;  %7593 = vmatmul.mubr.msk.bf16.gmra.mxu1 %vm3669_vm9, %v3656_v9 }
 0x373   : > { %v4552_v8 = vpack.c.bf16 %v4437_v63, %v4436_v17  ;;  %v4442_v55 = vmax.f32 %v7498_v42, 0.0 }
 0x374   : > { %v4013_v56 = vpop.f32.mrf.mxu1 }
 0x375   : > { %7622 = vmatprep.mubr.msk.bf16.mxu0 %vm4611_vm10, %v4552_v8  ;;  %v4440_v51 = vmax.f32 %v4013_v56, 0.0 }
 0x376   : > { %v7499_v25 = vpop.f32.mrf.mxu1  ;;  %7623 = vmatmul.mubr.msk.bf16.gmra.mxu0 %vm4611_vm10, %v4553_v44 }
 0x377   : > { %v4443_v11 = vmax.f32 %v7499_v25, 0.0 }
 0x378   : > { %v4016_v26 = vpop.f32.mrf.mxu1 }
 0x379   : > { %v4441_v49 = vmax.f32 %v4016_v26, 0.0  ;;  %v4555_v13 = vpack.c.bf16 %v4443_v11, %v4442_v55 }
 0x37a   : > { %v7502_v62 = vpop.f32.mrf.mxu1 }
 0x37b   : > { %v4554_v47 = vpack.c.bf16 %v4441_v49, %v4440_v51  ;;  %v4446_v36 = vmax.f32 %v7502_v62, 0.0 }
 0x37c   : > { %v4029_v2 = vpop.f32.mrf.mxu1 }
 0x37d   : > { %7626 = vmatprep.mubr.msk.bf16.mxu0 %vm4611_vm10, %v4554_v47  ;;  %v4444_v5 = vmax.f32 %v4029_v2, 0.0 }
 0x37e   : > { %v7503_v15 = vpop.f32.mrf.mxu1  ;;  %7627 = vmatmul.mubr.msk.bf16.gmra.mxu0 %vm4611_vm10, %v4555_v13 }
 0x37f   : > { %v4447_v22 = vmax.f32 %v7503_v15, 0.0 }
 0x380   : > { %v4032_v53 = vpop.f32.mrf.mxu1 }
 0x381   : > { %v4445_v41 = vmax.f32 %v4032_v53, 0.0  ;;  %v4557_v16 = vpack.c.bf16 %v4447_v22, %v4446_v36 }
 0x382   : > { %v7506_v0 = vpop.f32.mrf.mxu1 }
 0x383   : > { %v4556_v7 = vpack.c.bf16 %v4445_v41, %v4444_v5  ;;  %v4450_v61 = vmax.f32 %v7506_v0, 0.0 }
 0x384   : > { %v4045_v28 = vpop.f32.mrf.mxu1 }
 0x385   : > { %7630 = vmatprep.mubr.msk.bf16.mxu0 %vm4611_vm10, %v4556_v7  ;;  %v4448_v1 = vmax.f32 %v4045_v28, 0.0 }
 0x386   : > { %v7507_v24 = vpop.f32.mrf.mxu1  ;;  %7631 = vmatmul.mubr.msk.bf16.gmra.mxu0 %vm4611_vm10, %v4557_v16 }
 0x387   : > { %v4451_v40 = vmax.f32 %v7507_v24, 0.0 }
 0x388   : > { %v4048_v21 = vpop.f32.mrf.mxu1 }
 0x389   : > { %v4449_v46 = vmax.f32 %v4048_v21, 0.0  ;;  %v4559_v30 = vpack.c.bf16 %v4451_v40, %v4450_v61 }
 0x38a   : > { %v7510_v3 = vpop.f32.mrf.mxu1 }
 0x38b   : > { %v4558_v29 = vpack.c.bf16 %v4449_v46, %v4448_v1  ;;  %v4454_v20 = vmax.f32 %v7510_v3, 0.0 }
 0x38c   : > { %v4061_v12 = vpop.f32.mrf.mxu1 }
 0x38d   : > { %7634 = vmatprep.mubr.msk.bf16.mxu0 %vm4611_vm10, %v4558_v29  ;;  %v4452_v34 = vmax.f32 %v4061_v12, 0.0 }
 0x38e   : > { %v7511_v14 = vpop.f32.mrf.mxu1  ;;  %7635 = vmatmul.mubr.msk.bf16.gmra.mxu0 %vm4611_vm10, %v4559_v30 }
 0x38f   : > { %v4455_v58 = vmax.f32 %v7511_v14, 0.0 }
 0x390   : > { %v4064_v19 = vpop.f32.mrf.mxu1 }
 0x391   : > { %v4453_v38 = vmax.f32 %v4064_v19, 0.0  ;;  %v4561_v32 = vpack.c.bf16 %v4455_v58, %v4454_v20 }
 0x392   : > { %v7514_v45 = vpop.f32.mrf.mxu1 }
 0x393   : > { %v4560_v54 = vpack.c.bf16 %v4453_v38, %v4452_v34  ;;  %v4458_v57 = vmax.f32 %v7514_v45, 0.0 }
 0x394   : > { %v4077_v39 = vpop.f32.mrf.mxu1 }
 0x395   : > { %7638 = vmatprep.mubr.msk.bf16.mxu0 %vm4611_vm10, %v4560_v54  ;;  %v4456_v52 = vmax.f32 %v4077_v39, 0.0 }
 0x396   : > { %v7515_v31 = vpop.f32.mrf.mxu1  ;;  %7639 = vmatmul.mubr.msk.bf16.gmra.mxu0 %vm4611_vm10, %v4561_v32 }
 0x397   : > { %v4459_v50 = vmax.f32 %v7515_v31, 0.0 }
 0x398   : > { %v4080_v35 = vpop.f32.mrf.mxu1 }
 0x399   : > { %v4457_v59 = vmax.f32 %v4080_v35, 0.0  ;;  %v4563_v27 = vpack.c.bf16 %v4459_v50, %v4458_v57 }
 0x39a   : > { %v7518_v23 = vpop.f32.mrf.mxu1 }
 0x39b   : > { %v4562_v6 = vpack.c.bf16 %v4457_v59, %v4456_v52  ;;  %v4462_v4 = vmax.f32 %v7518_v23, 0.0 }
 0x39c   : > { %v4093_v18 = vpop.f32.mrf.mxu1 }
 0x39d   : > { %7642 = vmatprep.mubr.msk.bf16.mxu0 %vm4611_vm10, %v4562_v6  ;;  %v4460_v60 = vmax.f32 %v4093_v18, 0.0 }
 0x39e   : > { %v7519_v33 = vpop.f32.mrf.mxu1  ;;  %7643 = vmatmul.mubr.msk.bf16.gmra.mxu0 %vm4611_vm10, %v4563_v27 }
 0x39f   : > { %v4463_v10 = vmax.f32 %v7519_v33, 0.0 }
 0x3a0   : > { %v4096_v37 = vpop.f32.mrf.mxu1 }
 0x3a1   : > { %v4461_v9 = vmax.f32 %v4096_v37, 0.0  ;;  %v4565_v63 = vpack.c.bf16 %v4463_v10, %v4462_v4 }
 0x3a2   : > { %v7522_v43 = vpop.f32.mrf.mxu1 }
 0x3a3   : > { %v4564_v17 = vpack.c.bf16 %v4461_v9, %v4460_v60  ;;  %v4466_v11 = vmax.f32 %v7522_v43, 0.0 }
 0x3a4   : > { %v4109_v48 = vpop.f32.mrf.mxu1 }
 0x3a5   : > { %7646 = vmatprep.mubr.msk.bf16.mxu0 %vm4611_vm10, %v4564_v17  ;;  %v4464_v56 = vmax.f32 %v4109_v48, 0.0 }
 0x3a6   : > { %v7523_v42 = vpop.f32.mrf.mxu1  ;;  %7647 = vmatmul.mubr.msk.bf16.gmra.mxu0 %vm4611_vm10, %v4565_v63 }
 0x3a7   : > { %v4467_v8 = vmax.f32 %v7523_v42, 0.0 }
 0x3a8   : > { %v4112_v44 = vpop.f32.mrf.mxu1 }
 0x3a9   : > { %v4465_v25 = vmax.f32 %v4112_v44, 0.0  ;;  %v4567_v49 = vpack.c.bf16 %v4467_v8, %v4466_v11 }
 0x3aa   : > { %v7526_v26 = vpop.f32.mrf.mxu1 }
 0x3ab   : > { %v4566_v51 = vpack.c.bf16 %v4465_v25, %v4464_v56  ;;  %v4470_v22 = vmax.f32 %v7526_v26, 0.0 }
 0x3ac   : > { %v4125_v55 = vpop.f32.mrf.mxu1 }
 0x3ad   : > { %7650 = vmatprep.mubr.msk.bf16.mxu0 %vm4611_vm10, %v4566_v51  ;;  %v4468_v2 = vmax.f32 %v4125_v55, 0.0 }
 0x3ae   : > { %v7527_v62 = vpop.f32.mrf.mxu1  ;;  %7651 = vmatmul.mubr.msk.bf16.gmra.mxu0 %vm4611_vm10, %v4567_v49 }
 0x3af   : > { %v4471_v47 = vmax.f32 %v7527_v62, 0.0 }
 0x3b0   : > { %v4128_v13 = vpop.f32.mrf.mxu1 }
 0x3b1   : > { %v4469_v15 = vmax.f32 %v4128_v13, 0.0  ;;  %v4569_v41 = vpack.c.bf16 %v4471_v47, %v4470_v22 }
 0x3b2   : > { %v7530_v53 = vpop.f32.mrf.mxu1 }
 0x3b3   : > { %v4568_v5 = vpack.c.bf16 %v4469_v15, %v4468_v2  ;;  %v4474_v40 = vmax.f32 %v7530_v53, 0.0 }
 0x3b4   : > { %v4141_v36 = vpop.f32.mrf.mxu1 }
 0x3b5   : > { %7654 = vmatprep.mubr.msk.bf16.mxu0 %vm4611_vm10, %v4568_v5  ;;  %v4472_v28 = vmax.f32 %v4141_v36, 0.0 }
 0x3b6   : > { %v7531_v0 = vpop.f32.mrf.mxu1  ;;  %7655 = vmatmul.mubr.msk.bf16.gmra.mxu0 %vm4611_vm10, %v4569_v41 }
 0x3b7   : > { %v4475_v7 = vmax.f32 %v7531_v0, 0.0 }
 0x3b8   : > { %v4144_v16 = vpop.f32.mrf.mxu1 }
 0x3b9   : > { %v4473_v24 = vmax.f32 %v4144_v16, 0.0  ;;  %v4571_v46 = vpack.c.bf16 %v4475_v7, %v4474_v40 }
 0x3ba   : > { %v7534_v21 = vpop.f32.mrf.mxu1 }
 0x3bb   : > { %v4570_v1 = vpack.c.bf16 %v4473_v24, %v4472_v28  ;;  %v4478_v58 = vmax.f32 %v7534_v21, 0.0 }
 0x3bc   : > { %v4157_v61 = vpop.f32.mrf.mxu1 }
 0x3bd   : > { %7658 = vmatprep.mubr.msk.bf16.mxu0 %vm4611_vm10, %v4570_v1  ;;  %v4476_v12 = vmax.f32 %v4157_v61, 0.0 }
 0x3be   : > { %v7535_v3 = vpop.f32.mrf.mxu1  ;;  %7659 = vmatmul.mubr.msk.bf16.gmra.mxu0 %vm4611_vm10, %v4571_v46 }
 0x3bf   : > { %v4479_v29 = vmax.f32 %v7535_v3, 0.0 }
 0x3c0   : > { %v4160_v30 = vpop.f32.mrf.mxu1 }
 0x3c1   : > { %v4477_v14 = vmax.f32 %v4160_v30, 0.0  ;;  %v4573_v38 = vpack.c.bf16 %v4479_v29, %v4478_v58 }
 0x3c2   : > { %v7538_v19 = vpop.f32.mrf.mxu1 }
 0x3c3   : > { %v4572_v34 = vpack.c.bf16 %v4477_v14, %v4476_v12  ;;  %v4482_v50 = vmax.f32 %v7538_v19, 0.0 }
 0x3c4   : > { %v4173_v20 = vpop.f32.mrf.mxu1 }
 0x3c5   : > { %7662 = vmatprep.mubr.msk.bf16.mxu0 %vm4611_vm10, %v4572_v34  ;;  %v4480_v39 = vmax.f32 %v4173_v20, 0.0 }
 0x3c6   : > { %v7539_v45 = vpop.f32.mrf.mxu1  ;;  %7663 = vmatmul.mubr.msk.bf16.gmra.mxu0 %vm4611_vm10, %v4573_v38 }
 0x3c7   : > { %v4483_v54 = vmax.f32 %v7539_v45, 0.0 }
 0x3c8   : > { %v4176_v32 = vpop.f32.mrf.mxu1 }
 0x3c9   : > { %v4481_v31 = vmax.f32 %v4176_v32, 0.0  ;;  %v4575_v59 = vpack.c.bf16 %v4483_v54, %v4482_v50 }
 0x3ca   : > { %v7542_v35 = vpop.f32.mrf.mxu1 }
 0x3cb   : > { %v4574_v52 = vpack.c.bf16 %v4481_v31, %v4480_v39  ;;  %v4486_v10 = vmax.f32 %v7542_v35, 0.0 }
 0x3cc   : > { %v4189_v57 = vpop.f32.mrf.mxu1 }
 0x3cd   : > { %7666 = vmatprep.mubr.msk.bf16.mxu0 %vm4611_vm10, %v4574_v52  ;;  %v4484_v18 = vmax.f32 %v4189_v57, 0.0  ;;  %v9495_v57 = vld [vmem:[#allocation2_spill] sm:$0xff] }
 0x3ce   : > { %v7543_v23 = vpop.f32.mrf.mxu1  ;;  %7667 = vmatmul.mubr.msk.bf16.gmra.mxu0 %vm4611_vm10, %v4575_v59 }
 0x3cf   : > { %v4487_v6 = vmax.f32 %v7543_v23, 0.0  ;;  %v5486_v23 = vsub.s32 1, %v9495_v57 }
 0x3d0   : > { %v4192_v27 = vpop.f32.mrf.mxu1 }
 0x3d1   : > { %v4485_v33 = vmax.f32 %v4192_v27, 0.0  ;;  %v4577_v9 = vpack.c.bf16 %v4487_v6, %v4486_v10 }
 0x3d2   : > { %v7546_v37 = vpop.f32.mrf.mxu1 }
 0x3d3   : > { %v4576_v60 = vpack.c.bf16 %v4485_v33, %v4484_v18  ;;  %v4490_v8 = vmax.f32 %v7546_v37, 0.0 }
 0x3d4   : > { %v4205_v4 = vpop.f32.mrf.mxu1 }
 0x3d5   : > { %7670 = vmatprep.mubr.msk.bf16.mxu0 %vm4611_vm10, %v4576_v60  ;;  %v4488_v48 = vmax.f32 %v4205_v4, 0.0 }
 0x3d6   : > { %v7547_v43 = vpop.f32.mrf.mxu1  ;;  %7671 = vmatmul.mubr.msk.bf16.gmra.mxu0 %vm4611_vm10, %v4577_v9  ;;  %v7755_v9 = vld [vmem:[%s9488_s1 + $0x20] sm:$0xff] }
 0x3d7   : > { %v4491_v17 = vmax.f32 %v7547_v43, 0.0  ;;  %v8947_v4 = vrot.slane %v7755_v9, %v5486_v23 }
 0x3d8   : > { %v4208_v63 = vpop.f32.mrf.mxu1 }
 0x3d9   : > { %v4489_v42 = vmax.f32 %v4208_v63, 0.0  ;;  %v4579_v25 = vpack.c.bf16 %v4491_v17, %v4490_v8 }
 0x3da   : > { %v7550_v44 = vpop.f32.mrf.mxu1 }
 0x3db   : > { %v4578_v56 = vpack.c.bf16 %v4489_v42, %v4488_v48  ;;  %v4494_v47 = vmax.f32 %v7550_v44, 0.0 }
 0x3dc   : > { %v4221_v11 = vpop.f32.mrf.mxu1 }
 0x3dd   : > { %7674 = vmatprep.mubr.msk.bf16.mxu0 %vm4611_vm10, %v4578_v56  ;;  %v4492_v55 = vmax.f32 %v4221_v11, 0.0 }
 0x3de   : > { %v7551_v26 = vpop.f32.mrf.mxu1  ;;  %7675 = vmatmul.mubr.msk.bf16.gmra.mxu0 %vm4611_vm10, %v4579_v25 }
 0x3df   : > { %v4495_v51 = vmax.f32 %v7551_v26, 0.0 }
 0x3e0   : > { %v4224_v49 = vpop.f32.mrf.mxu1 }
 0x3e1   : > { %v4493_v62 = vmax.f32 %v4224_v49, 0.0  ;;  %v4581_v15 = vpack.c.bf16 %v4495_v51, %v4494_v47 }
 0x3e2   : > { %v7554_v13 = vpop.f32.mrf.mxu1 }
 0x3e3   : > { %v4580_v2 = vpack.c.bf16 %v4493_v62, %v4492_v55  ;;  %v4498_v7 = vmax.f32 %v7554_v13, 0.0 }
 0x3e4   : > { %v4237_v22 = vpop.f32.mrf.mxu1 }
 0x3e5   : > { %7678 = vmatprep.mubr.msk.bf16.mxu0 %vm4611_vm10, %v4580_v2  ;;  %v4496_v36 = vmax.f32 %v4237_v22, 0.0 }
 0x3e6   : > { %v7555_v53 = vpop.f32.mrf.mxu1  ;;  %7679 = vmatmul.mubr.msk.bf16.gmra.mxu0 %vm4611_vm10, %v4581_v15 }
 0x3e7   : > { %v4499_v5 = vmax.f32 %v7555_v53, 0.0 }
 0x3e8   : > { %v4240_v41 = vpop.f32.mrf.mxu1 }
 0x3e9   : > { %v4497_v0 = vmax.f32 %v4240_v41, 0.0  ;;  %v4583_v24 = vpack.c.bf16 %v4499_v5, %v4498_v7 }
 0x3ea   : > { %v7558_v16 = vpop.f32.mrf.mxu1 }
 0x3eb   : > { %v4582_v28 = vpack.c.bf16 %v4497_v0, %v4496_v36  ;;  %v4502_v29 = vmax.f32 %v7558_v16, 0.0 }
 0x3ec   : > { %v4253_v40 = vpop.f32.mrf.mxu1 }
 0x3ed   : > { %7682 = vmatprep.mubr.msk.bf16.mxu0 %vm4611_vm10, %v4582_v28  ;;  %v4500_v61 = vmax.f32 %v4253_v40, 0.0 }
 0x3ee   : > { %v7559_v21 = vpop.f32.mrf.mxu1  ;;  %7683 = vmatmul.mubr.msk.bf16.gmra.mxu0 %vm4611_vm10, %v4583_v24 }
 0x3ef   : > { %v4503_v1 = vmax.f32 %v7559_v21, 0.0 }
 0x3f0   : > { %v4256_v46 = vpop.f32.mrf.mxu1 }
 0x3f1   : > { %v4501_v3 = vmax.f32 %v4256_v46, 0.0  ;;  %v4585_v14 = vpack.c.bf16 %v4503_v1, %v4502_v29 }
 0x3f2   : > { %v7562_v30 = vpop.f32.mrf.mxu1 }
 0x3f3   : > { %v4584_v12 = vpack.c.bf16 %v4501_v3, %v4500_v61  ;;  %v4506_v54 = vmax.f32 %v7562_v30, 0.0 }
 0x3f4   : > { %v4269_v58 = vpop.f32.mrf.mxu1 }
 0x3f5   : > { %7686 = vmatprep.mubr.msk.bf16.mxu0 %vm4611_vm10, %v4584_v12  ;;  %v4504_v20 = vmax.f32 %v4269_v58, 0.0 }
 0x3f6   : > { %v7563_v19 = vpop.f32.mrf.mxu1  ;;  %7687 = vmatmul.mubr.msk.bf16.gmra.mxu0 %vm4611_vm10, %v4585_v14 }
 0x3f7   : > { %v4507_v34 = vmax.f32 %v7563_v19, 0.0 }
 0x3f8   : > { %v4272_v38 = vpop.f32.mrf.mxu1 }
 0x3f9   : > { %v4505_v45 = vmax.f32 %v4272_v38, 0.0  ;;  %v4587_v31 = vpack.c.bf16 %v4507_v34, %v4506_v54 }
 0x3fa   : > { %v7566_v32 = vpop.f32.mrf.mxu1 }
 0x3fb   : > { %v4586_v39 = vpack.c.bf16 %v4505_v45, %v4504_v20  ;;  %v4510_v18 = vmax.f32 %v7566_v32, 0.0 }
 0x3fc   : > { %v4285_v50 = vpop.f32.mrf.mxu1 }
 0x3fd   : > { %7690 = vmatprep.mubr.msk.bf16.mxu0 %vm4611_vm10, %v4586_v39  ;;  %v4508_v6 = vmax.f32 %v4285_v50, 0.0 }
 0x3fe   : > { %v7567_v35 = vpop.f32.mrf.mxu1  ;;  %7691 = vmatmul.mubr.msk.bf16.gmra.mxu0 %vm4611_vm10, %v4587_v31 }
 0x3ff   : > { %v4511_v52 = vmax.f32 %v7567_v35, 0.0 }
 0x400   : > { %v4288_v59 = vpop.f32.mrf.mxu1 }
 0x401   : > { %v4509_v27 = vmax.f32 %v4288_v59, 0.0  ;;  %v4589_v37 = vpack.c.bf16 %v4511_v52, %v4510_v18 }
 0x402   : > { %v7570_v33 = vpop.f32.mrf.mxu1 }
 0x403   : > { %v4588_v10 = vpack.c.bf16 %v4509_v27, %v4508_v6  ;;  %v4514_v26 = vmax.f32 %v7570_v33, 0.0 }
 0x404   : > { %v4301_v60 = vpop.f32.mrf.mxu1 }
 0x405   : > { %7694 = vmatprep.mubr.msk.bf16.mxu0 %vm4611_vm10, %v4588_v10  ;;  %v4512_v44 = vmax.f32 %v4301_v60, 0.0 }
 0x406   : > { %v7571_v43 = vpop.f32.mrf.mxu1  ;;  %v7600_v17 = vpop.f32.mrf.mxu0  ;;  %7695 = vmatmul.mubr.msk.bf16.gmra.mxu0 %vm4611_vm10, %v4589_v37 }
 0x407   : > { %v5358_v63 = vmax.f32 %v7600_v17, 0.0  ;;  %v4515_v48 = vmax.f32 %v7571_v43, 0.0 }
 0x408   : > { %v4304_v42 = vpop.f32.mrf.mxu1  ;;  %v4845_v8 = vpop.f32.mrf.mxu0 }
 0x409   : > { %v4513_v56 = vmax.f32 %v4304_v42, 0.0  ;;  %v5356_v25 = vmax.f32 %v4845_v8, 0.0  ;;  %v5490_v11 = vmul.f32 %v8947_v4, %v5358_v63  ;;  %v4591_v13 = vpack.c.bf16 %v4515_v48, %v4514_v26 }
 0x40a   : > { %v7574_v51 = vpop.f32.mrf.mxu1  ;;  %v7601_v49 = vpop.f32.mrf.mxu0 }
 0x40b   : > { %v4590_v55 = vpack.c.bf16 %v4513_v56, %v4512_v44  ;;  %v5359_v62 = vmax.f32 %v7601_v49, 0.0  ;;  %v5623_v47 = vsel %vm5616_vm11, %v5490_v11, 0.0  ;;  %v5488_v22 = vmul.f32 %v8947_v4, %v5356_v25 }
 0x40c   : > { %v4317_v2 = vpop.f32.mrf.mxu1  ;;  %5624 = vadd.xlane.f32.xlu1 %v5623_v47  ;;  %v4848_v15 = vpop.f32.mrf.mxu0  ;;  %v4518_v3 = vmax.f32 %v7574_v51, 0.0 }
 0x40d   : > { %v5357_v53 = vmax.f32 %v4848_v15, 0.0  ;;  %7698 = vmatprep.mubr.msk.bf16.mxu0 %vm4611_vm10, %v4590_v55  ;;  %v5491_v5 = vmul.f32 %v8947_v4, %v5359_v62  ;;  %v5617_v36 = vsel %vm5616_vm11, %v5488_v22, 0.0  ;;  %v4516_v1 = vmax.f32 %v4317_v2, 0.0 }
 0x40e   : > { %v7575_v41 = vpop.f32.mrf.mxu1  ;;  %7699 = vmatmul.mubr.msk.bf16.gmra.mxu0 %vm4611_vm10, %v4591_v13  ;;  %v7604_v0 = vpop.f32.mrf.mxu0  ;;  %5618 = vadd.xlane.f32.xlu0 %v5617_v36 }
 0x40f   : > { %v5362_v7 = vmax.f32 %v7604_v0, 0.0  ;;  %v5626_v16 = vsel %vm5616_vm11, %v5491_v5, 0.0  ;;  %v5489_v28 = vmul.f32 %v8947_v4, %v5357_v53  ;;  %v4519_v24 = vmax.f32 %v7575_v41, 0.0 }
 0x410   : > { %v4320_v40 = vpop.f32.mrf.mxu1  ;;  %5627 = vadd.xlane.f32.xlu1 %v5626_v16  ;;  %v4861_v21 = vpop.f32.mrf.mxu0 }
 0x411   : > { %v4517_v46 = vmax.f32 %v4320_v40, 0.0  ;;  %v5620_v61 = vsel %vm5616_vm11, %v5489_v28, 0.0  ;;  %v5360_v29 = vmax.f32 %v4861_v21, 0.0  ;;  %v5494_v14 = vmul.f32 %v8947_v4, %v5362_v7 }
 0x412   : > { %v7578_v30 = vpop.f32.mrf.mxu1  ;;  %v7605_v12 = vpop.f32.mrf.mxu0  ;;  %5621 = vadd.xlane.f32.xlu0 %v5620_v61  ;;  %v4593_v34 = vpack.c.bf16 %v4519_v24, %v4518_v3 }
 0x413   : > { %v4592_v58 = vpack.c.bf16 %v4517_v46, %v4516_v1  ;;  %v5363_v19 = vmax.f32 %v7605_v12, 0.0  ;;  %v5635_v39 = vsel %vm5616_vm11, %v5494_v14, 0.0  ;;  %v5492_v50 = vmul.f32 %v8947_v4, %v5360_v29 }
 0x414   : > { %v4333_v38 = vpop.f32.mrf.mxu1  ;;  %v4864_v20 = vpop.f32.mrf.mxu0  ;;  %v4522_v33 = vmax.f32 %v7578_v30, 0.0 }
 0x415   : > { %v5361_v45 = vmax.f32 %v4864_v20, 0.0  ;;  %7702 = vmatprep.mubr.msk.bf16.mxu0 %vm4611_vm10, %v4592_v58  ;;  %v5495_v54 = vmul.f32 %v8947_v4, %v5363_v19  ;;  %v4520_v27 = vmax.f32 %v4333_v38, 0.0  ;;  %v5629_v60 = vsel %vm5616_vm11, %v5492_v50, 0.0 }
 0x416   : > { %v7579_v32 = vpop.f32.mrf.mxu1  ;;  %7703 = vmatmul.mubr.msk.bf16.gmra.mxu0 %vm4611_vm10, %v4593_v34  ;;  %v7608_v31 = vpop.f32.mrf.mxu0  ;;  %5636 = vadd.xlane.f32.xlu0 %v5635_v39 }
 0x417   : > { %v5366_v35 = vmax.f32 %v7608_v31, 0.0  ;;  %v5638_v52 = vsel %vm5616_vm11, %v5495_v54, 0.0  ;;  %v5493_v59 = vmul.f32 %v8947_v4, %v5361_v45  ;;  %v4523_v57 = vmax.f32 %v7579_v32, 0.0 }
 0x418   : > { %v4336_v23 = vpop.f32.mrf.mxu1  ;;  %5639 = vadd.xlane.f32.xlu1 %v5638_v52  ;;  %v4877_v6 = vpop.f32.mrf.mxu0 }
 0x419   : > { %v4521_v18 = vmax.f32 %v4336_v23, 0.0  ;;  %v5364_v10 = vmax.f32 %v4877_v6, 0.0  ;;  %v5498_v43 = vmul.f32 %v8947_v4, %v5366_v35  ;;  %v5632_v48 = vsel %vm5616_vm11, %v5493_v59, 0.0 }
 0x41a   : > { %v7582_v37 = vpop.f32.mrf.mxu1  ;;  %v7609_v9 = vpop.f32.mrf.mxu0  ;;  %5630 = vadd.xlane.f32.xlu0 %v5629_v60  ;;  %v4595_v42 = vpack.c.bf16 %v4523_v57, %v4522_v33 }
 0x41b   : > { %v4594_v17 = vpack.c.bf16 %v4521_v18, %v4520_v27  ;;  %v5367_v63 = vmax.f32 %v7609_v9, 0.0  ;;  %v5647_v26 = vsel %vm5616_vm11, %v5498_v43, 0.0  ;;  %v5496_v49 = vmul.f32 %v8947_v4, %v5364_v10 }
 0x41c   : > { %v4349_v8 = vpop.f32.mrf.mxu1  ;;  %5633 = vadd.xlane.f32.xlu1 %v5632_v48  ;;  %v4880_v44 = vpop.f32.mrf.mxu0  ;;  %v4526_v5 = vmax.f32 %v7582_v37, 0.0 }
 0x41d   : > { %v5365_v56 = vmax.f32 %v4880_v44, 0.0  ;;  %7706 = vmatprep.mubr.msk.bf16.mxu0 %vm4611_vm10, %v4594_v17  ;;  %v5499_v25 = vmul.f32 %v8947_v4, %v5367_v63  ;;  %v4524_v22 = vmax.f32 %v4349_v8, 0.0  ;;  %v5641_v0 = vsel %vm5616_vm11, %v5496_v49, 0.0 }
 0x41e   : > { %v7583_v11 = vpop.f32.mrf.mxu1  ;;  %7707 = vmatmul.mubr.msk.bf16.gmra.mxu0 %vm4611_vm10, %v4595_v42  ;;  %v7612_v51 = vpop.f32.mrf.mxu0  ;;  %5648 = vadd.xlane.f32.xlu0 %v5647_v26 }
 0x41f   : > { %v5370_v55 = vmax.f32 %v7612_v51, 0.0  ;;  %v5650_v62 = vsel %vm5616_vm11, %v5499_v25, 0.0  ;;  %v5497_v47 = vmul.f32 %v8947_v4, %v5365_v56  ;;  %v4527_v13 = vmax.f32 %v7583_v11, 0.0 }
 0x420   : > { %v4352_v2 = vpop.f32.mrf.mxu1  ;;  %5651 = vadd.xlane.f32.xlu1 %v5650_v62  ;;  %v4893_v15 = vpop.f32.mrf.mxu0 }
 0x421   : > { %v4525_v53 = vmax.f32 %v4352_v2, 0.0  ;;  %v5368_v41 = vmax.f32 %v4893_v15, 0.0  ;;  %v5502_v16 = vmul.f32 %v8947_v4, %v5370_v55  ;;  %v5644_v40 = vsel %vm5616_vm11, %v5497_v47, 0.0 }
 0x422   : > { %v7586_v36 = vpop.f32.mrf.mxu1  ;;  %v7613_v7 = vpop.f32.mrf.mxu0  ;;  %5642 = vadd.xlane.f32.xlu0 %v5641_v0  ;;  %v4597_v21 = vpack.c.bf16 %v4527_v13, %v4526_v5 }
 0x423   : > { %v4596_v28 = vpack.c.bf16 %v4525_v53, %v4524_v22  ;;  %v5371_v24 = vmax.f32 %v7613_v7, 0.0  ;;  %v5659_v30 = vsel %vm5616_vm11, %v5502_v16, 0.0  ;;  %v5500_v14 = vmul.f32 %v8947_v4, %v5368_v41 }
 0x424   : > { %v4365_v1 = vpop.f32.mrf.mxu1  ;;  %5645 = vadd.xlane.f32.xlu1 %v5644_v40  ;;  %v4896_v46 = vpop.f32.mrf.mxu0  ;;  %v4530_v39 = vmax.f32 %v7586_v36, 0.0 }
 0x425   : > { %v5369_v61 = vmax.f32 %v4896_v46, 0.0  ;;  %7710 = vmatprep.mubr.msk.bf16.mxu0 %vm4611_vm10, %v4596_v28  ;;  %v5503_v3 = vmul.f32 %v8947_v4, %v5371_v24  ;;  %v4528_v54 = vmax.f32 %v4365_v1, 0.0  ;;  %v5653_v35 = vsel %vm5616_vm11, %v5500_v14, 0.0 }
 0x426   : > { %v7587_v29 = vpop.f32.mrf.mxu1  ;;  %7711 = vmatmul.mubr.msk.bf16.gmra.mxu0 %vm4611_vm10, %v4597_v21  ;;  %v7616_v12 = vpop.f32.mrf.mxu0  ;;  %5660 = vadd.xlane.f32.xlu0 %v5659_v30 }
 0x427   : > { %v5374_v58 = vmax.f32 %v7616_v12, 0.0  ;;  %v5662_v19 = vsel %vm5616_vm11, %v5503_v3, 0.0  ;;  %v5501_v34 = vmul.f32 %v8947_v4, %v5369_v61  ;;  %v4531_v38 = vmax.f32 %v7587_v29, 0.0 }
 0x428   : > { %v4368_v20 = vpop.f32.mrf.mxu1  ;;  %5663 = vadd.xlane.f32.xlu1 %v5662_v19  ;;  %v4909_v45 = vpop.f32.mrf.mxu0 }
 0x429   : > { %v4529_v32 = vmax.f32 %v4368_v20, 0.0  ;;  %v5372_v31 = vmax.f32 %v4909_v45, 0.0  ;;  %v5506_v59 = vmul.f32 %v8947_v4, %v5374_v58  ;;  %v5656_v6 = vsel %vm5616_vm11, %v5501_v34, 0.0 }
 0x42a   : > { %v7590_v50 = vpop.f32.mrf.mxu1  ;;  %v7617_v52 = vpop.f32.mrf.mxu0  ;;  %5654 = vadd.xlane.f32.xlu0 %v5653_v35  ;;  %v4599_v27 = vpack.c.bf16 %v4531_v38, %v4530_v39 }
 0x42b   : > { %v4598_v57 = vpack.c.bf16 %v4529_v32, %v4528_v54  ;;  %v5375_v23 = vmax.f32 %v7617_v52, 0.0  ;;  %v5671_v9 = vsel %vm5616_vm11, %v5506_v59, 0.0  ;;  %v5504_v17 = vmul.f32 %v8947_v4, %v5372_v31 }
 0x42c   : > { %v4381_v18 = vpop.f32.mrf.mxu1  ;;  %5657 = vadd.xlane.f32.xlu1 %v5656_v6  ;;  %v4912_v33 = vpop.f32.mrf.mxu0  ;;  %v4534_v26 = vmax.f32 %v7590_v50, 0.0 }
 0x42d   : > { %v5373_v10 = vmax.f32 %v4912_v33, 0.0  ;;  %7714 = vmatprep.mubr.msk.bf16.mxu0 %vm4611_vm10, %v4598_v57  ;;  %v5507_v37 = vmul.f32 %v8947_v4, %v5375_v23  ;;  %v4532_v25 = vmax.f32 %v4381_v18, 0.0  ;;  %v5665_v49 = vsel %vm5616_vm11, %v5504_v17, 0.0 }
 0x42e   : > { %v7591_v60 = vpop.f32.mrf.mxu1  ;;  %7715 = vmatmul.mubr.msk.bf16.gmra.mxu0 %vm4611_vm10, %v4599_v27  ;;  %v7620_v43 = vpop.f32.mrf.mxu0  ;;  %5672 = vadd.xlane.f32.xlu0 %v5671_v9 }
 0x42f   : > { %v5378_v63 = vmax.f32 %v7620_v43, 0.0  ;;  %v5674_v48 = vsel %vm5616_vm11, %v5507_v37, 0.0  ;;  %v5505_v42 = vmul.f32 %v8947_v4, %v5373_v10  ;;  %v4535_v8 = vmax.f32 %v7591_v60, 0.0 }
 0x430   : > { %v4384_v44 = vpop.f32.mrf.mxu1  ;;  %5675 = vadd.xlane.f32.xlu1 %v5674_v48  ;;  %v4925_v56 = vpop.f32.mrf.mxu0 }
 0x431   : > { %v4533_v11 = vmax.f32 %v4384_v44, 0.0  ;;  %v5376_v51 = vmax.f32 %v4925_v56, 0.0  ;;  %v5510_v47 = vmul.f32 %v8947_v4, %v5378_v63  ;;  %v5668_v15 = vsel %vm5616_vm11, %v5505_v42, 0.0 }
 0x432   : > { %v7594_v55 = vpop.f32.mrf.mxu1  ;;  %v7621_v62 = vpop.f32.mrf.mxu0  ;;  %5666 = vadd.xlane.f32.xlu0 %v5665_v49  ;;  %v4601_v22 = vpack.c.bf16 %v4535_v8, %v4534_v26 }
 0x433   : > { %v4600_v13 = vpack.c.bf16 %v4533_v11, %v4532_v25  ;;  %v5379_v2 = vmax.f32 %v7621_v62, 0.0  ;;  %v5683_v0 = vsel %vm5616_vm11, %v5510_v47, 0.0  ;;  %v5508_v28 = vmul.f32 %v8947_v4, %v5376_v51 }
 0x434   : > { %5669 = vadd.xlane.f32.xlu1 %v5668_v15  ;;  %v4397_v53 = vpop.f32.mrf.mxu1  ;;  %v4928_v5 = vpop.f32.mrf.mxu0  ;;  %v4538_v30 = vmax.f32 %v7594_v55, 0.0 }
 0x435   : > { %v5377_v41 = vmax.f32 %v4928_v5, 0.0  ;;  %7718 = vmatprep.mubr.msk.bf16.mxu0 %vm4611_vm10, %v4600_v13  ;;  %v5511_v36 = vmul.f32 %v8947_v4, %v5379_v2  ;;  %v4536_v3 = vmax.f32 %v4397_v53, 0.0  ;;  %v5677_v14 = vsel %vm5616_vm11, %v5508_v28, 0.0 }
 0x436   : > { %7719 = vmatmul.mubr.msk.bf16.gmra.mxu0 %vm4611_vm10, %v4601_v22  ;;  %v7595_v7 = vpop.f32.mrf.mxu1  ;;  %v7624_v16 = vpop.f32.mrf.mxu0  ;;  %5684 = vadd.xlane.f32.xlu0 %v5683_v0 }
 0x437   : > { %v5382_v24 = vmax.f32 %v7624_v16, 0.0  ;;  %v5686_v40 = vsel %vm5616_vm11, %v5511_v36, 0.0  ;;  %v5509_v21 = vmul.f32 %v8947_v4, %v5377_v41  ;;  %v4539_v1 = vmax.f32 %v7595_v7, 0.0 }
 0x438   : > { %5687 = vadd.xlane.f32.xlu1 %v5686_v40  ;;  %v4400_v46 = vpop.f32.mrf.mxu1  ;;  %v4941_v61 = vpop.f32.mrf.mxu0 }
 0x439   : > { %v4537_v29 = vmax.f32 %v4400_v46, 0.0  ;;  %v5380_v12 = vmax.f32 %v4941_v61, 0.0  ;;  %v5514_v19 = vmul.f32 %v8947_v4, %v5382_v24  ;;  %v5680_v20 = vsel %vm5616_vm11, %v5509_v21, 0.0 }
 0x43a   : > { %v7625_v58 = vpop.f32.mrf.mxu0  ;;  %5678 = vadd.xlane.f32.xlu0 %v5677_v14  ;;  %v4603_v45 = vpack.c.bf16 %v4539_v1, %v4538_v30 }
 0x43b   : > { %v4602_v34 = vpack.c.bf16 %v4537_v29, %v4536_v3  ;;  %v5383_v38 = vmax.f32 %v7625_v58, 0.0  ;;  %v5695_v31 = vsel %vm5616_vm11, %v5514_v19, 0.0  ;;  %v5512_v35 = vmul.f32 %v8947_v4, %v5380_v12 }
 0x43c   : > { %5681 = vadd.xlane.f32.xlu1 %v5680_v20  ;;  %v4944_v54 = vpop.f32.mrf.mxu0 }
 0x43d   : > { %v5381_v32 = vmax.f32 %v4944_v54, 0.0  ;;  %7722 = vmatprep.mubr.msk.bf16.mxu0 %vm4611_vm10, %v4602_v34  ;;  %v5515_v39 = vmul.f32 %v8947_v4, %v5383_v38  ;;  %v5689_v27 = vsel %vm5616_vm11, %v5512_v35, 0.0 }
 0x43e   : > { %v7628_v50 = vpop.f32.mrf.mxu0  ;;  %7723 = vmatmul.mubr.msk.bf16.gmra.mxu0 %vm4611_vm10, %v4603_v45  ;;  %5696 = vadd.xlane.f32.xlu0 %v5695_v31 }
 0x43f   : > { %v5386_v52 = vmax.f32 %v7628_v50, 0.0  ;;  %v5698_v59 = vsel %vm5616_vm11, %v5515_v39, 0.0  ;;  %v5513_v57 = vmul.f32 %v8947_v4, %v5381_v32 }
 0x440   : > { %5699 = vadd.xlane.f32.xlu1 %v5698_v59  ;;  %v4957_v23 = vpop.f32.mrf.mxu0 }
 0x441   : > { %v5384_v6 = vmax.f32 %v4957_v23, 0.0  ;;  %v5518_v33 = vmul.f32 %v8947_v4, %v5386_v52  ;;  %v5692_v37 = vsel %vm5616_vm11, %v5513_v57, 0.0 }
 0x442   : > { %v7629_v18 = vpop.f32.mrf.mxu0  ;;  %5690 = vadd.xlane.f32.xlu0 %v5689_v27 }
 0x443   : > { %v5387_v10 = vmax.f32 %v7629_v18, 0.0  ;;  %v5707_v17 = vsel %vm5616_vm11, %v5518_v33, 0.0  ;;  %v5516_v48 = vmul.f32 %v8947_v4, %v5384_v6 }
 0x444   : > { %5693 = vadd.xlane.f32.xlu1 %v5692_v37  ;;  %v4960_v60 = vpop.f32.mrf.mxu0 }
 0x445   : > { %v5385_v9 = vmax.f32 %v4960_v60, 0.0  ;;  %v5519_v43 = vmul.f32 %v8947_v4, %v5387_v10  ;;  %v5701_v11 = vsel %vm5616_vm11, %v5516_v48, 0.0 }
 0x446   : > { %v7632_v63 = vpop.f32.mrf.mxu0  ;;  %5708 = vadd.xlane.f32.xlu0 %v5707_v17 }
 0x447   : > { %v5390_v42 = vmax.f32 %v7632_v63, 0.0  ;;  %v5710_v8 = vsel %vm5616_vm11, %v5519_v43, 0.0  ;;  %v5517_v44 = vmul.f32 %v8947_v4, %v5385_v9 }
 0x448   : > { %5711 = vadd.xlane.f32.xlu1 %v5710_v8  ;;  %v4973_v56 = vpop.f32.mrf.mxu0 }
 0x449   : > { %v5388_v25 = vmax.f32 %v4973_v56, 0.0  ;;  %v5522_v51 = vmul.f32 %v8947_v4, %v5390_v42  ;;  %v5704_v55 = vsel %vm5616_vm11, %v5517_v44, 0.0 }
 0x44a   : > { %v7633_v26 = vpop.f32.mrf.mxu0  ;;  %5702 = vadd.xlane.f32.xlu0 %v5701_v11 }
 0x44b   : > { %v5391_v49 = vmax.f32 %v7633_v26, 0.0  ;;  %v5719_v2 = vsel %vm5616_vm11, %v5522_v51, 0.0  ;;  %v5520_v22 = vmul.f32 %v8947_v4, %v5388_v25 }
 0x44c   : > { %5705 = vadd.xlane.f32.xlu1 %v5704_v55  ;;  %v4976_v62 = vpop.f32.mrf.mxu0 }
 0x44d   : > { %v5389_v47 = vmax.f32 %v4976_v62, 0.0  ;;  %v5523_v13 = vmul.f32 %v8947_v4, %v5391_v49  ;;  %v5713_v7 = vsel %vm5616_vm11, %v5520_v22, 0.0 }
 0x44e   : > { %v7636_v15 = vpop.f32.mrf.mxu0  ;;  %5720 = vadd.xlane.f32.xlu0 %v5719_v2 }
 0x44f   : > { %v5394_v53 = vmax.f32 %v7636_v15, 0.0  ;;  %v5722_v5 = vsel %vm5616_vm11, %v5523_v13, 0.0  ;;  %v5521_v41 = vmul.f32 %v8947_v4, %v5389_v47 }
 0x450   : > { %5723 = vadd.xlane.f32.xlu1 %v5722_v5  ;;  %v4989_v36 = vpop.f32.mrf.mxu0 }
 0x451   : > { %v5392_v0 = vmax.f32 %v4989_v36, 0.0  ;;  %v5526_v28 = vmul.f32 %v8947_v4, %v5394_v53  ;;  %v5716_v40 = vsel %vm5616_vm11, %v5521_v41, 0.0 }
 0x452   : > { %v7637_v16 = vpop.f32.mrf.mxu0  ;;  %5714 = vadd.xlane.f32.xlu0 %v5713_v7 }
 0x453   : > { %v5395_v24 = vmax.f32 %v7637_v16, 0.0  ;;  %v5731_v61 = vsel %vm5616_vm11, %v5526_v28, 0.0  ;;  %v5524_v29 = vmul.f32 %v8947_v4, %v5392_v0 }
 0x454   : > { %5717 = vadd.xlane.f32.xlu1 %v5716_v40  ;;  %v4992_v21 = vpop.f32.mrf.mxu0 }
 0x455   : > { %v5393_v1 = vmax.f32 %v4992_v21, 0.0  ;;  %v5527_v46 = vmul.f32 %v8947_v4, %v5395_v24  ;;  %v5725_v34 = vsel %vm5616_vm11, %v5524_v29, 0.0 }
 0x456   : > { %v7640_v3 = vpop.f32.mrf.mxu0  ;;  %5732 = vadd.xlane.f32.xlu0 %v5731_v61 }
 0x457   : > { %v5398_v30 = vmax.f32 %v7640_v3, 0.0  ;;  %v5734_v12 = vsel %vm5616_vm11, %v5527_v46, 0.0  ;;  %v5525_v14 = vmul.f32 %v8947_v4, %v5393_v1 }
 0x458   : > { %5735 = vadd.xlane.f32.xlu1 %v5734_v12  ;;  %v5005_v58 = vpop.f32.mrf.mxu0 }
 0x459   : > { %v5396_v19 = vmax.f32 %v5005_v58, 0.0  ;;  %v5530_v20 = vmul.f32 %v8947_v4, %v5398_v30  ;;  %v5728_v54 = vsel %vm5616_vm11, %v5525_v14, 0.0 }
 0x45a   : > { %v7641_v38 = vpop.f32.mrf.mxu0  ;;  %5726 = vadd.xlane.f32.xlu0 %v5725_v34 }
 0x45b   : > { %v5399_v45 = vmax.f32 %v7641_v38, 0.0  ;;  %v5743_v50 = vsel %vm5616_vm11, %v5530_v20, 0.0  ;;  %v5528_v52 = vmul.f32 %v8947_v4, %v5396_v19 }
 0x45c   : > { %5729 = vadd.xlane.f32.xlu1 %v5728_v54  ;;  %v5008_v32 = vpop.f32.mrf.mxu0 }
 0x45d   : > { %v5397_v39 = vmax.f32 %v5008_v32, 0.0  ;;  %v5531_v31 = vmul.f32 %v8947_v4, %v5399_v45  ;;  %v5737_v18 = vsel %vm5616_vm11, %v5528_v52, 0.0 }
 0x45e   : > { %v7644_v35 = vpop.f32.mrf.mxu0  ;;  %5744 = vadd.xlane.f32.xlu0 %v5743_v50 }
 0x45f   : > { %v5402_v59 = vmax.f32 %v7644_v35, 0.0  ;;  %v5746_v57 = vsel %vm5616_vm11, %v5531_v31, 0.0  ;;  %v5529_v23 = vmul.f32 %v8947_v4, %v5397_v39 }
 0x460   : > { %5747 = vadd.xlane.f32.xlu1 %v5746_v57  ;;  %v5021_v6 = vpop.f32.mrf.mxu0 }
 0x461   : > { %v5400_v27 = vmax.f32 %v5021_v6, 0.0  ;;  %v5534_v10 = vmul.f32 %v8947_v4, %v5402_v59  ;;  %v5740_v60 = vsel %vm5616_vm11, %v5529_v23, 0.0 }
 0x462   : > { %v7645_v33 = vpop.f32.mrf.mxu0  ;;  %5738 = vadd.xlane.f32.xlu0 %v5737_v18 }
 0x463   : > { %v5403_v37 = vmax.f32 %v7645_v33, 0.0  ;;  %v5755_v63 = vsel %vm5616_vm11, %v5534_v10, 0.0  ;;  %v5532_v42 = vmul.f32 %v8947_v4, %v5400_v27 }
 0x464   : > { %5741 = vadd.xlane.f32.xlu1 %v5740_v60  ;;  %v5024_v9 = vpop.f32.mrf.mxu0 }
 0x465   : > { %v5401_v43 = vmax.f32 %v5024_v9, 0.0  ;;  %v5535_v17 = vmul.f32 %v8947_v4, %v5403_v37  ;;  %v5749_v26 = vsel %vm5616_vm11, %v5532_v42, 0.0 }
 0x466   : > { %v7648_v48 = vpop.f32.mrf.mxu0  ;;  %5756 = vadd.xlane.f32.xlu0 %v5755_v63 }
 0x467   : > { %v5406_v8 = vmax.f32 %v7648_v48, 0.0  ;;  %v5758_v44 = vsel %vm5616_vm11, %v5535_v17, 0.0  ;;  %v5533_v56 = vmul.f32 %v8947_v4, %v5401_v43 }
 0x468   : > { %5759 = vadd.xlane.f32.xlu1 %v5758_v44  ;;  %v5037_v25 = vpop.f32.mrf.mxu0 }
 0x469   : > { %v5404_v11 = vmax.f32 %v5037_v25, 0.0  ;;  %v5538_v49 = vmul.f32 %v8947_v4, %v5406_v8  ;;  %v5752_v62 = vsel %vm5616_vm11, %v5533_v56, 0.0 }
 0x46a   : > { %v7649_v51 = vpop.f32.mrf.mxu0  ;;  %5750 = vadd.xlane.f32.xlu0 %v5749_v26 }
 0x46b   : > { %v5407_v55 = vmax.f32 %v7649_v51, 0.0  ;;  %v5767_v15 = vsel %vm5616_vm11, %v5538_v49, 0.0  ;;  %v5536_v53 = vmul.f32 %v8947_v4, %v5404_v11 }
 0x46c   : > { %5753 = vadd.xlane.f32.xlu1 %v5752_v62  ;;  %v5040_v47 = vpop.f32.mrf.mxu0 }
 0x46d   : > { %v5405_v13 = vmax.f32 %v5040_v47, 0.0  ;;  %v5539_v2 = vmul.f32 %v8947_v4, %v5407_v55  ;;  %v5761_v16 = vsel %vm5616_vm11, %v5536_v53, 0.0 }
 0x46e   : > { %v7652_v22 = vpop.f32.mrf.mxu0  ;;  %5768 = vadd.xlane.f32.xlu0 %v5767_v15 }
 0x46f   : > { %v5410_v5 = vmax.f32 %v7652_v22, 0.0  ;;  %v5770_v41 = vsel %vm5616_vm11, %v5539_v2, 0.0  ;;  %v5537_v36 = vmul.f32 %v8947_v4, %v5405_v13 }
 0x470   : > { %5771 = vadd.xlane.f32.xlu1 %v5770_v41  ;;  %v5053_v0 = vpop.f32.mrf.mxu0 }
 0x471   : > { %v5408_v7 = vmax.f32 %v5053_v0, 0.0  ;;  %v5542_v24 = vmul.f32 %v8947_v4, %v5410_v5  ;;  %v5764_v21 = vsel %vm5616_vm11, %v5537_v36, 0.0 }
 0x472   : > { %v7653_v28 = vpop.f32.mrf.mxu0  ;;  %5762 = vadd.xlane.f32.xlu0 %v5761_v16 }
 0x473   : > { %v5411_v40 = vmax.f32 %v7653_v28, 0.0  ;;  %v5779_v3 = vsel %vm5616_vm11, %v5542_v24, 0.0  ;;  %v5540_v30 = vmul.f32 %v8947_v4, %v5408_v7 }
 0x474   : > { %5765 = vadd.xlane.f32.xlu1 %v5764_v21  ;;  %v5056_v1 = vpop.f32.mrf.mxu0 }
 0x475   : > { %v5409_v46 = vmax.f32 %v5056_v1, 0.0  ;;  %v5543_v61 = vmul.f32 %v8947_v4, %v5411_v40  ;;  %v5773_v38 = vsel %vm5616_vm11, %v5540_v30, 0.0 }
 0x476   : > { %v7656_v29 = vpop.f32.mrf.mxu0  ;;  %5780 = vadd.xlane.f32.xlu0 %v5779_v3 }
 0x477   : > { %v5414_v12 = vmax.f32 %v7656_v29, 0.0  ;;  %v5782_v14 = vsel %vm5616_vm11, %v5543_v61, 0.0  ;;  %v5541_v58 = vmul.f32 %v8947_v4, %v5409_v46 }
 0x478   : > { %5783 = vadd.xlane.f32.xlu1 %v5782_v14  ;;  %v5069_v19 = vpop.f32.mrf.mxu0 }
 0x479   : > { %v5412_v34 = vmax.f32 %v5069_v19, 0.0  ;;  %v5546_v45 = vmul.f32 %v8947_v4, %v5414_v12  ;;  %v5776_v32 = vsel %vm5616_vm11, %v5541_v58, 0.0 }
 0x47a   : > { %v7657_v20 = vpop.f32.mrf.mxu0  ;;  %5774 = vadd.xlane.f32.xlu0 %v5773_v38 }
 0x47b   : > { %v5415_v54 = vmax.f32 %v7657_v20, 0.0  ;;  %v5791_v35 = vsel %vm5616_vm11, %v5546_v45, 0.0  ;;  %v5544_v59 = vmul.f32 %v8947_v4, %v5412_v34 }
 0x47c   : > { %5777 = vadd.xlane.f32.xlu1 %v5776_v32  ;;  %v5072_v39 = vpop.f32.mrf.mxu0 }
 0x47d   : > { %v5413_v31 = vmax.f32 %v5072_v39, 0.0  ;;  %v5547_v50 = vmul.f32 %v8947_v4, %v5415_v54  ;;  %v5785_v33 = vsel %vm5616_vm11, %v5544_v59, 0.0 }
 0x47e   : > { %v7660_v52 = vpop.f32.mrf.mxu0  ;;  %5792 = vadd.xlane.f32.xlu0 %v5791_v35 }
 0x47f   : > { %v5418_v57 = vmax.f32 %v7660_v52, 0.0  ;;  %v5794_v23 = vsel %vm5616_vm11, %v5547_v50, 0.0  ;;  %v5545_v6 = vmul.f32 %v8947_v4, %v5413_v31 }
 0x480   : > { %5795 = vadd.xlane.f32.xlu1 %v5794_v23  ;;  %v5085_v27 = vpop.f32.mrf.mxu0 }
 0x481   : > { %v5416_v18 = vmax.f32 %v5085_v27, 0.0  ;;  %v5550_v37 = vmul.f32 %v8947_v4, %v5418_v57  ;;  %v5788_v9 = vsel %vm5616_vm11, %v5545_v6, 0.0 }
 0x482   : > { %v7661_v10 = vpop.f32.mrf.mxu0  ;;  %5786 = vadd.xlane.f32.xlu0 %v5785_v33 }
 0x483   : > { %v5419_v60 = vmax.f32 %v7661_v10, 0.0  ;;  %v5803_v48 = vsel %vm5616_vm11, %v5550_v37, 0.0  ;;  %v5548_v8 = vmul.f32 %v8947_v4, %v5416_v18 }
 0x484   : > { %5789 = vadd.xlane.f32.xlu1 %v5788_v9  ;;  %v5088_v43 = vpop.f32.mrf.mxu0 }
 0x485   : > { %v5417_v17 = vmax.f32 %v5088_v43, 0.0  ;;  %v5551_v63 = vmul.f32 %v8947_v4, %v5419_v60  ;;  %v5797_v51 = vsel %vm5616_vm11, %v5548_v8, 0.0 }
 0x486   : > { %v7664_v42 = vpop.f32.mrf.mxu0  ;;  %5804 = vadd.xlane.f32.xlu0 %v5803_v48 }
 0x487   : > { %v5422_v44 = vmax.f32 %v7664_v42, 0.0  ;;  %v5806_v56 = vsel %vm5616_vm11, %v5551_v63, 0.0  ;;  %v5549_v25 = vmul.f32 %v8947_v4, %v5417_v17 }
 0x488   : > { %5807 = vadd.xlane.f32.xlu1 %v5806_v56  ;;  %v5101_v11 = vpop.f32.mrf.mxu0 }
 0x489   : > { %v5420_v26 = vmax.f32 %v5101_v11, 0.0  ;;  %v5554_v55 = vmul.f32 %v8947_v4, %v5422_v44  ;;  %v5800_v47 = vsel %vm5616_vm11, %v5549_v25, 0.0 }
 0x48a   : > { %v7665_v49 = vpop.f32.mrf.mxu0  ;;  %5798 = vadd.xlane.f32.xlu0 %v5797_v51 }
 0x48b   : > { %v5423_v62 = vmax.f32 %v7665_v49, 0.0  ;;  %v5815_v22 = vsel %vm5616_vm11, %v5554_v55, 0.0  ;;  %v5552_v5 = vmul.f32 %v8947_v4, %v5420_v26 }
 0x48c   : > { %5801 = vadd.xlane.f32.xlu1 %v5800_v47  ;;  %v5104_v13 = vpop.f32.mrf.mxu0 }
 0x48d   : > { %v5421_v2 = vmax.f32 %v5104_v13, 0.0  ;;  %v5555_v15 = vmul.f32 %v8947_v4, %v5423_v62  ;;  %v5809_v28 = vsel %vm5616_vm11, %v5552_v5, 0.0 }
 0x48e   : > { %v7668_v53 = vpop.f32.mrf.mxu0  ;;  %5816 = vadd.xlane.f32.xlu0 %v5815_v22 }
 0x48f   : > { %v5426_v41 = vmax.f32 %v7668_v53, 0.0  ;;  %v5818_v36 = vsel %vm5616_vm11, %v5555_v15, 0.0  ;;  %v5553_v0 = vmul.f32 %v8947_v4, %v5421_v2 }
 0x490   : > { %5819 = vadd.xlane.f32.xlu1 %v5818_v36  ;;  %v5117_v7 = vpop.f32.mrf.mxu0 }
 0x491   : > { %v5424_v16 = vmax.f32 %v5117_v7, 0.0  ;;  %v5558_v40 = vmul.f32 %v8947_v4, %v5426_v41  ;;  %v5812_v1 = vsel %vm5616_vm11, %v5553_v0, 0.0 }
 0x492   : > { %v7669_v24 = vpop.f32.mrf.mxu0  ;;  %5810 = vadd.xlane.f32.xlu0 %v5809_v28 }
 0x493   : > { %v5427_v21 = vmax.f32 %v7669_v24, 0.0  ;;  %v5827_v30 = vsel %vm5616_vm11, %v5558_v40, 0.0  ;;  %v5556_v14 = vmul.f32 %v8947_v4, %v5424_v16 }
 0x494   : > { %5813 = vadd.xlane.f32.xlu1 %v5812_v1  ;;  %v5120_v46 = vpop.f32.mrf.mxu0 }
 0x495   : > { %v5425_v61 = vmax.f32 %v5120_v46, 0.0  ;;  %v5625_v3 = vpop.xlane.xlu1 %5624  ;;  %v5559_v29 = vmul.f32 %v8947_v4, %v5427_v21  ;;  %v5821_v32 = vsel %vm5616_vm11, %v5556_v14, 0.0 }
 0x496   : > { %6004 = vst.msk [vmem:[%s9107_s4 + $0x10] sm:$0xff] %vm6001_vm12, %v5625_v3  ;;  %v7672_v12 = vpop.f32.mrf.mxu0  ;;  %5828 = vadd.xlane.f32.xlu0 %v5827_v30 }
 0x497   : > { %v5430_v58 = vmax.f32 %v7672_v12, 0.0  ;;  %v5830_v19 = vsel %vm5616_vm11, %v5559_v29, 0.0  ;;  %v5557_v34 = vmul.f32 %v8947_v4, %v5425_v61  ;;  %v5619_v38 = vpop.xlane.xlu0 %5618 }
 0x498   : > { %5831 = vadd.xlane.f32.xlu1 %v5830_v19  ;;  %v5133_v20 = vpop.f32.mrf.mxu0  ;;  %6002 = vst.msk [vmem:[%s9107_s4] sm:$0xff] %vm6001_vm12, %v5619_v38 }
 0x499   : > { %v5628_v45 = vpop.xlane.xlu1 %5627  ;;  %v5428_v54 = vmax.f32 %v5133_v20, 0.0  ;;  %v5562_v31 = vmul.f32 %v8947_v4, %v5430_v58  ;;  %v5824_v35 = vsel %vm5616_vm11, %v5557_v34, 0.0 }
 0x49a   : > { %6005 = vst.msk [vmem:[%s9107_s4 + $0x18] sm:$0xff] %vm6001_vm12, %v5628_v45  ;;  %v7673_v39 = vpop.f32.mrf.mxu0  ;;  %5822 = vadd.xlane.f32.xlu0 %v5821_v32 }
 0x49b   : > { %v5431_v50 = vmax.f32 %v7673_v39, 0.0  ;;  %v5622_v52 = vpop.xlane.xlu0 %5621  ;;  %v5839_v6 = vsel %vm5616_vm11, %v5562_v31, 0.0  ;;  %v5560_v18 = vmul.f32 %v8947_v4, %v5428_v54 }
 0x49c   : > { %5825 = vadd.xlane.f32.xlu1 %v5824_v35  ;;  %v5136_v59 = vpop.f32.mrf.mxu0  ;;  %6003 = vst.msk [vmem:[%s9107_s4 + $0x8] sm:$0xff] %vm6001_vm12, %v5622_v52 }
 0x49d   : > { %v5429_v57 = vmax.f32 %v5136_v59, 0.0  ;;  %v5563_v23 = vmul.f32 %v8947_v4, %v5431_v50  ;;  %v5833_v63 = vsel %vm5616_vm11, %v5560_v18, 0.0 }
 0x49e   : > { %v7676_v27 = vpop.f32.mrf.mxu0  ;;  %5840 = vadd.xlane.f32.xlu0 %v5839_v6 }
 0x49f   : > { %v5434_v33 = vmax.f32 %v7676_v27, 0.0  ;;  %v5842_v10 = vsel %vm5616_vm11, %v5563_v23, 0.0  ;;  %v5561_v37 = vmul.f32 %v8947_v4, %v5429_v57  ;;  %v5637_v60 = vpop.xlane.xlu0 %5636 }
 0x4a0   : > { %5843 = vadd.xlane.f32.xlu1 %v5842_v10  ;;  %v5149_v9 = vpop.f32.mrf.mxu0  ;;  %6008 = vst.msk [vmem:[%s9107_s4 + $0x30] sm:$0xff] %vm6001_vm12, %v5637_v60 }
 0x4a1   : > { %v5640_v43 = vpop.xlane.xlu1 %5639  ;;  %v5432_v17 = vmax.f32 %v5149_v9, 0.0  ;;  %v5566_v42 = vmul.f32 %v8947_v4, %v5434_v33  ;;  %v5836_v44 = vsel %vm5616_vm11, %v5561_v37, 0.0 }
 0x4a2   : > { %6009 = vst.msk [vmem:[%s9107_s4 + $0x38] sm:$0xff] %vm6001_vm12, %v5640_v43  ;;  %v7677_v48 = vpop.f32.mrf.mxu0  ;;  %5834 = vadd.xlane.f32.xlu0 %v5833_v63 }
 0x4a3   : > { %v5435_v8 = vmax.f32 %v7677_v48, 0.0  ;;  %v5631_v56 = vpop.xlane.xlu0 %5630  ;;  %v5851_v49 = vsel %vm5616_vm11, %v5566_v42, 0.0  ;;  %v5564_v62 = vmul.f32 %v8947_v4, %v5432_v17 }
 0x4a4   : > { %5837 = vadd.xlane.f32.xlu1 %v5836_v44  ;;  %v5152_v25 = vpop.f32.mrf.mxu0  ;;  %6006 = vst.msk [vmem:[%s9107_s4 + $0x20] sm:$0xff] %vm6001_vm12, %v5631_v56 }
 0x4a5   : > { %v5433_v11 = vmax.f32 %v5152_v25, 0.0  ;;  %v5634_v26 = vpop.xlane.xlu1 %5633  ;;  %v5567_v51 = vmul.f32 %v8947_v4, %v5435_v8  ;;  %v5845_v41 = vsel %vm5616_vm11, %v5564_v62, 0.0 }
 0x4a6   : > { %6007 = vst.msk [vmem:[%s9107_s4 + $0x28] sm:$0xff] %vm6001_vm12, %v5634_v26  ;;  %v7680_v55 = vpop.f32.mrf.mxu0  ;;  %5852 = vadd.xlane.f32.xlu0 %v5851_v49 }
 0x4a7   : > { %v5438_v47 = vmax.f32 %v7680_v55, 0.0  ;;  %v5854_v13 = vsel %vm5616_vm11, %v5567_v51, 0.0  ;;  %v5565_v2 = vmul.f32 %v8947_v4, %v5433_v11  ;;  %v5649_v15 = vpop.xlane.xlu0 %5648 }
 0x4a8   : > { %5855 = vadd.xlane.f32.xlu1 %v5854_v13  ;;  %v5165_v22 = vpop.f32.mrf.mxu0  ;;  %6012 = vst.msk [vmem:[%s9107_s4 + $0x50] sm:$0xff] %vm6001_vm12, %v5649_v15 }
 0x4a9   : > { %v5652_v53 = vpop.xlane.xlu1 %5651  ;;  %v5436_v5 = vmax.f32 %v5165_v22, 0.0  ;;  %v5570_v0 = vmul.f32 %v8947_v4, %v5438_v47  ;;  %v5848_v16 = vsel %vm5616_vm11, %v5565_v2, 0.0 }
 0x4aa   : > { %6013 = vst.msk [vmem:[%s9107_s4 + $0x58] sm:$0xff] %vm6001_vm12, %v5652_v53  ;;  %v7681_v36 = vpop.f32.mrf.mxu0  ;;  %5846 = vadd.xlane.f32.xlu0 %v5845_v41 }
 0x4ab   : > { %v5439_v7 = vmax.f32 %v7681_v36, 0.0  ;;  %v5643_v28 = vpop.xlane.xlu0 %5642  ;;  %v5863_v46 = vsel %vm5616_vm11, %v5570_v0, 0.0  ;;  %v5568_v3 = vmul.f32 %v8947_v4, %v5436_v5 }
 0x4ac   : > { %5849 = vadd.xlane.f32.xlu1 %v5848_v16  ;;  %v5168_v24 = vpop.f32.mrf.mxu0  ;;  %6010 = vst.msk [vmem:[%s9107_s4 + $0x40] sm:$0xff] %vm6001_vm12, %v5643_v28 }
 0x4ad   : > { %v5437_v40 = vmax.f32 %v5168_v24, 0.0  ;;  %v5646_v21 = vpop.xlane.xlu1 %5645  ;;  %v5571_v1 = vmul.f32 %v8947_v4, %v5439_v7  ;;  %v5857_v38 = vsel %vm5616_vm11, %v5568_v3, 0.0 }
 0x4ae   : > { %6011 = vst.msk [vmem:[%s9107_s4 + $0x48] sm:$0xff] %vm6001_vm12, %v5646_v21  ;;  %v7684_v61 = vpop.f32.mrf.mxu0  ;;  %5864 = vadd.xlane.f32.xlu0 %v5863_v46 }
 0x4af   : > { %v5442_v29 = vmax.f32 %v7684_v61, 0.0  ;;  %v5866_v30 = vsel %vm5616_vm11, %v5571_v1, 0.0  ;;  %v5569_v12 = vmul.f32 %v8947_v4, %v5437_v40  ;;  %v5661_v14 = vpop.xlane.xlu0 %5660 }
 0x4b0   : > { %5867 = vadd.xlane.f32.xlu1 %v5866_v30  ;;  %v5181_v58 = vpop.f32.mrf.mxu0  ;;  %6016 = vst.msk [vmem:[%s9107_s4 + $0x70] sm:$0xff] %vm6001_vm12, %v5661_v14 }
 0x4b1   : > { %v5664_v19 = vpop.xlane.xlu1 %5663  ;;  %v5440_v34 = vmax.f32 %v5181_v58, 0.0  ;;  %v5574_v45 = vmul.f32 %v8947_v4, %v5442_v29  ;;  %v5860_v32 = vsel %vm5616_vm11, %v5569_v12, 0.0 }
 0x4b2   : > { %6017 = vst.msk [vmem:[%s9107_s4 + $0x78] sm:$0xff] %vm6001_vm12, %v5664_v19  ;;  %v7685_v20 = vpop.f32.mrf.mxu0  ;;  %5858 = vadd.xlane.f32.xlu0 %v5857_v38 }
 0x4b3   : > { %v5443_v54 = vmax.f32 %v7685_v20, 0.0  ;;  %v5655_v39 = vpop.xlane.xlu0 %5654  ;;  %v5875_v59 = vsel %vm5616_vm11, %v5574_v45, 0.0  ;;  %v5572_v23 = vmul.f32 %v8947_v4, %v5440_v34 }
 0x4b4   : > { %5861 = vadd.xlane.f32.xlu1 %v5860_v32  ;;  %v5184_v31 = vpop.f32.mrf.mxu0  ;;  %6014 = vst.msk [vmem:[%s9107_s4 + $0x60] sm:$0xff] %vm6001_vm12, %v5655_v39 }
 0x4b5   : > { %v5441_v50 = vmax.f32 %v5184_v31, 0.0  ;;  %v5658_v35 = vpop.xlane.xlu1 %5657  ;;  %v5575_v52 = vmul.f32 %v8947_v4, %v5443_v54  ;;  %v5869_v9 = vsel %vm5616_vm11, %v5572_v23, 0.0 }
 0x4b6   : > { %6015 = vst.msk [vmem:[%s9107_s4 + $0x68] sm:$0xff] %vm6001_vm12, %v5658_v35  ;;  %v7688_v57 = vpop.f32.mrf.mxu0  ;;  %5876 = vadd.xlane.f32.xlu0 %v5875_v59 }
 0x4b7   : > { %v5446_v6 = vmax.f32 %v7688_v57, 0.0  ;;  %v5878_v27 = vsel %vm5616_vm11, %v5575_v52, 0.0  ;;  %v5573_v18 = vmul.f32 %v8947_v4, %v5441_v50  ;;  %v5673_v33 = vpop.xlane.xlu0 %5672 }
 0x4b8   : > { %5879 = vadd.xlane.f32.xlu1 %v5878_v27  ;;  %v5197_v10 = vpop.f32.mrf.mxu0  ;;  %6020 = vst.msk [vmem:[%s9107_s4 + $0x90] sm:$0xff] %vm6001_vm12, %v5673_v33 }
 0x4b9   : > { %v5676_v37 = vpop.xlane.xlu1 %5675  ;;  %v5444_v60 = vmax.f32 %v5197_v10, 0.0  ;;  %v5578_v17 = vmul.f32 %v8947_v4, %v5446_v6  ;;  %v5872_v48 = vsel %vm5616_vm11, %v5573_v18, 0.0 }
 0x4ba   : > { %6021 = vst.msk [vmem:[%s9107_s4 + $0x98] sm:$0xff] %vm6001_vm12, %v5676_v37  ;;  %v7689_v43 = vpop.f32.mrf.mxu0  ;;  %5870 = vadd.xlane.f32.xlu0 %v5869_v9 }
 0x4bb   : > { %v5447_v63 = vmax.f32 %v7689_v43, 0.0  ;;  %v5667_v42 = vpop.xlane.xlu0 %5666  ;;  %v5887_v11 = vsel %vm5616_vm11, %v5578_v17, 0.0  ;;  %v5576_v51 = vmul.f32 %v8947_v4, %v5444_v60 }
 0x4bc   : > { %5873 = vadd.xlane.f32.xlu1 %v5872_v48  ;;  %v5200_v8 = vpop.f32.mrf.mxu0  ;;  %6018 = vst.msk [vmem:[%s9107_s4 + $0x80] sm:$0xff] %vm6001_vm12, %v5667_v42 }
 0x4bd   : > { %v5445_v44 = vmax.f32 %v5200_v8, 0.0  ;;  %v5670_v56 = vpop.xlane.xlu1 %5669  ;;  %v5579_v25 = vmul.f32 %v8947_v4, %v5447_v63  ;;  %v5881_v22 = vsel %vm5616_vm11, %v5576_v51, 0.0 }
 0x4be   : > { %6019 = vst.msk [vmem:[%s9107_s4 + $0x88] sm:$0xff] %vm6001_vm12, %v5670_v56  ;;  %v7692_v26 = vpop.f32.mrf.mxu0  ;;  %5888 = vadd.xlane.f32.xlu0 %v5887_v11 }
 0x4bf   : > { %v5450_v49 = vmax.f32 %v7692_v26, 0.0  ;;  %v5890_v55 = vsel %vm5616_vm11, %v5579_v25, 0.0  ;;  %v5577_v62 = vmul.f32 %v8947_v4, %v5445_v44  ;;  %v5685_v47 = vpop.xlane.xlu0 %5684 }
 0x4c0   : > { %5891 = vadd.xlane.f32.xlu1 %v5890_v55  ;;  %v5213_v13 = vpop.f32.mrf.mxu0  ;;  %6024 = vst.msk [vmem:[%s9107_s4 + $0xb0] sm:$0xff] %vm6001_vm12, %v5685_v47 }
 0x4c1   : > { %v5688_v2 = vpop.xlane.xlu1 %5687  ;;  %v5448_v15 = vmax.f32 %v5213_v13, 0.0  ;;  %v5582_v5 = vmul.f32 %v8947_v4, %v5450_v49  ;;  %v5884_v36 = vsel %vm5616_vm11, %v5577_v62, 0.0 }
 0x4c2   : > { %6025 = vst.msk [vmem:[%s9107_s4 + $0xb8] sm:$0xff] %vm6001_vm12, %v5688_v2  ;;  %v7693_v53 = vpop.f32.mrf.mxu0  ;;  %5882 = vadd.xlane.f32.xlu0 %v5881_v22 }
 0x4c3   : > { %v5451_v41 = vmax.f32 %v7693_v53, 0.0  ;;  %v5679_v0 = vpop.xlane.xlu0 %5678  ;;  %v5899_v40 = vsel %vm5616_vm11, %v5582_v5, 0.0  ;;  %v5580_v1 = vmul.f32 %v8947_v4, %v5448_v15 }
 0x4c4   : > { %5885 = vadd.xlane.f32.xlu1 %v5884_v36  ;;  %v5216_v7 = vpop.f32.mrf.mxu0  ;;  %6022 = vst.msk [vmem:[%s9107_s4 + $0xa0] sm:$0xff] %vm6001_vm12, %v5679_v0 }
 0x4c5   : > { %v5449_v16 = vmax.f32 %v5216_v7, 0.0  ;;  %v5682_v28 = vpop.xlane.xlu1 %5681  ;;  %v5583_v24 = vmul.f32 %v8947_v4, %v5451_v41  ;;  %v5893_v58 = vsel %vm5616_vm11, %v5580_v1, 0.0 }
 0x4c6   : > { %6023 = vst.msk [vmem:[%s9107_s4 + $0xa8] sm:$0xff] %vm6001_vm12, %v5682_v28  ;;  %v7696_v21 = vpop.f32.mrf.mxu0  ;;  %5900 = vadd.xlane.f32.xlu0 %v5899_v40 }
 0x4c7   : > { %v5454_v46 = vmax.f32 %v7696_v21, 0.0  ;;  %v5902_v61 = vsel %vm5616_vm11, %v5583_v24, 0.0  ;;  %v5581_v3 = vmul.f32 %v8947_v4, %v5449_v16  ;;  %v5697_v29 = vpop.xlane.xlu0 %5696 }
 0x4c8   : > { %5903 = vadd.xlane.f32.xlu1 %v5902_v61  ;;  %v5229_v30 = vpop.f32.mrf.mxu0  ;;  %6028 = vst.msk [vmem:[%s9107_s4 + $0xd0] sm:$0xff] %vm6001_vm12, %v5697_v29 }
 0x4c9   : > { %v5700_v12 = vpop.xlane.xlu1 %5699  ;;  %v5452_v14 = vmax.f32 %v5229_v30, 0.0  ;;  %v5586_v34 = vmul.f32 %v8947_v4, %v5454_v46  ;;  %v5896_v20 = vsel %vm5616_vm11, %v5581_v3, 0.0 }
 0x4ca   : > { %6029 = vst.msk [vmem:[%s9107_s4 + $0xd8] sm:$0xff] %vm6001_vm12, %v5700_v12  ;;  %v7697_v19 = vpop.f32.mrf.mxu0  ;;  %5894 = vadd.xlane.f32.xlu0 %v5893_v58 }
 0x4cb   : > { %v5455_v38 = vmax.f32 %v7697_v19, 0.0  ;;  %v5691_v45 = vpop.xlane.xlu0 %5690  ;;  %v5584_v50 = vmul.f32 %v8947_v4, %v5452_v14  ;;  %v5911_v35 = vsel %vm5616_vm11, %v5586_v34, 0.0 }
 0x4cc   : > { %5897 = vadd.xlane.f32.xlu1 %v5896_v20  ;;  %v5232_v54 = vpop.f32.mrf.mxu0  ;;  %6026 = vst.msk [vmem:[%s9107_s4 + $0xc0] sm:$0xff] %vm6001_vm12, %v5691_v45 }
 0x4cd   : > { %v5453_v32 = vmax.f32 %v5232_v54, 0.0  ;;  %v5694_v39 = vpop.xlane.xlu1 %5693  ;;  %v5587_v31 = vmul.f32 %v8947_v4, %v5455_v38  ;;  %v5905_v37 = vsel %vm5616_vm11, %v5584_v50, 0.0 }
 0x4ce   : > { %6027 = vst.msk [vmem:[%s9107_s4 + $0xc8] sm:$0xff] %vm6001_vm12, %v5694_v39  ;;  %v7700_v52 = vpop.f32.mrf.mxu0  ;;  %5912 = vadd.xlane.f32.xlu0 %v5911_v35 }
 0x4cf   : > { %v5585_v59 = vmul.f32 %v8947_v4, %v5453_v32  ;;  %v5458_v57 = vmax.f32 %v7700_v52, 0.0  ;;  %v5914_v23 = vsel %vm5616_vm11, %v5587_v31, 0.0  ;;  %v5709_v6 = vpop.xlane.xlu0 %5708 }
 0x4d0   : > { %5915 = vadd.xlane.f32.xlu1 %v5914_v23  ;;  %v5245_v27 = vpop.f32.mrf.mxu0  ;;  %6032 = vst.msk [vmem:[%s9107_s4 + $0xf0] sm:$0xff] %vm6001_vm12, %v5709_v6 }
 0x4d1   : > { %v5712_v18 = vpop.xlane.xlu1 %5711  ;;  %v5590_v33 = vmul.f32 %v8947_v4, %v5458_v57  ;;  %v5456_v10 = vmax.f32 %v5245_v27, 0.0  ;;  %v5908_v43 = vsel %vm5616_vm11, %v5585_v59, 0.0 }
 0x4d2   : > { %6033 = vst.msk [vmem:[%s9107_s4 + $0xf8] sm:$0xff] %vm6001_vm12, %v5712_v18  ;;  %v7701_v60 = vpop.f32.mrf.mxu0  ;;  %5906 = vadd.xlane.f32.xlu0 %v5905_v37 }
 0x4d3   : > { %v5459_v9 = vmax.f32 %v7701_v60, 0.0  ;;  %v5703_v17 = vpop.xlane.xlu0 %5702  ;;  %v5588_v44 = vmul.f32 %v8947_v4, %v5456_v10  ;;  %v5923_v56 = vsel %vm5616_vm11, %v5590_v33, 0.0 }
 0x4d4   : > { %5909 = vadd.xlane.f32.xlu1 %v5908_v43  ;;  %v5248_v63 = vpop.f32.mrf.mxu0  ;;  %6030 = vst.msk [vmem:[%s9107_s4 + $0xe0] sm:$0xff] %vm6001_vm12, %v5703_v17 }
 0x4d5   : > { %v5591_v48 = vmul.f32 %v8947_v4, %v5459_v9  ;;  %v5457_v42 = vmax.f32 %v5248_v63, 0.0  ;;  %v5706_v8 = vpop.xlane.xlu1 %5705  ;;  %v5917_v2 = vsel %vm5616_vm11, %v5588_v44, 0.0 }
 0x4d6   : > { %6031 = vst.msk [vmem:[%s9107_s4 + $0xe8] sm:$0xff] %vm6001_vm12, %v5706_v8  ;;  %v7704_v25 = vpop.f32.mrf.mxu0  ;;  %5924 = vadd.xlane.f32.xlu0 %v5923_v56 }
 0x4d7   : > { %v5589_v11 = vmul.f32 %v8947_v4, %v5457_v42  ;;  %v5462_v26 = vmax.f32 %v7704_v25, 0.0  ;;  %v5926_v51 = vsel %vm5616_vm11, %v5591_v48, 0.0  ;;  %v5721_v49 = vpop.xlane.xlu0 %5720 }
 0x4d8   : > { %5927 = vadd.xlane.f32.xlu1 %v5926_v51  ;;  %v5261_v55 = vpop.f32.mrf.mxu0  ;;  %6036 = vst.msk [vmem:[%s9107_s4 + $0x110] sm:$0xff] %vm6001_vm12, %v5721_v49 }
 0x4d9   : > { %v5724_v62 = vpop.xlane.xlu1 %5723  ;;  %v5594_v47 = vmul.f32 %v8947_v4, %v5462_v26  ;;  %v5460_v13 = vmax.f32 %v5261_v55, 0.0  ;;  %v5920_v53 = vsel %vm5616_vm11, %v5589_v11, 0.0 }
 0x4da   : > { %6037 = vst.msk [vmem:[%s9107_s4 + $0x118] sm:$0xff] %vm6001_vm12, %v5724_v62  ;;  %v7705_v15 = vpop.f32.mrf.mxu0  ;;  %5918 = vadd.xlane.f32.xlu0 %v5917_v2 }
 0x4db   : > { %v5463_v22 = vmax.f32 %v7705_v15, 0.0  ;;  %v5715_v5 = vpop.xlane.xlu0 %5714  ;;  %v5592_v16 = vmul.f32 %v8947_v4, %v5460_v13  ;;  %v5935_v28 = vsel %vm5616_vm11, %v5594_v47, 0.0 }
 0x4dc   : > { %5921 = vadd.xlane.f32.xlu1 %v5920_v53  ;;  %v5264_v41 = vpop.f32.mrf.mxu0  ;;  %6034 = vst.msk [vmem:[%s9107_s4 + $0x100] sm:$0xff] %vm6001_vm12, %v5715_v5 }
 0x4dd   : > { %v5595_v36 = vmul.f32 %v8947_v4, %v5463_v22  ;;  %v5461_v0 = vmax.f32 %v5264_v41, 0.0  ;;  %v5718_v7 = vpop.xlane.xlu1 %5717  ;;  %v5929_v12 = vsel %vm5616_vm11, %v5592_v16, 0.0 }
 0x4de   : > { %6035 = vst.msk [vmem:[%s9107_s4 + $0x108] sm:$0xff] %vm6001_vm12, %v5718_v7  ;;  %v7708_v24 = vpop.f32.mrf.mxu0  ;;  %5936 = vadd.xlane.f32.xlu0 %v5935_v28 }
 0x4df   : > { %v5593_v40 = vmul.f32 %v8947_v4, %v5461_v0  ;;  %v5466_v21 = vmax.f32 %v7708_v24, 0.0  ;;  %v5938_v1 = vsel %vm5616_vm11, %v5595_v36, 0.0  ;;  %v5733_v46 = vpop.xlane.xlu0 %5732 }
 0x4e0   : > { %5939 = vadd.xlane.f32.xlu1 %v5938_v1  ;;  %v5277_v61 = vpop.f32.mrf.mxu0  ;;  %6040 = vst.msk [vmem:[%s9107_s4 + $0x130] sm:$0xff] %vm6001_vm12, %v5733_v46 }
 0x4e1   : > { %v5736_v3 = vpop.xlane.xlu1 %5735  ;;  %v5598_v29 = vmul.f32 %v8947_v4, %v5466_v21  ;;  %v5464_v30 = vmax.f32 %v5277_v61, 0.0  ;;  %v5932_v19 = vsel %vm5616_vm11, %v5593_v40, 0.0 }
 0x4e2   : > { %6041 = vst.msk [vmem:[%s9107_s4 + $0x138] sm:$0xff] %vm6001_vm12, %v5736_v3  ;;  %v7709_v14 = vpop.f32.mrf.mxu0  ;;  %5930 = vadd.xlane.f32.xlu0 %v5929_v12 }
 0x4e3   : > { %v5467_v58 = vmax.f32 %v7709_v14, 0.0  ;;  %v5727_v34 = vpop.xlane.xlu0 %5726  ;;  %v5596_v32 = vmul.f32 %v8947_v4, %v5464_v30  ;;  %v5947_v39 = vsel %vm5616_vm11, %v5598_v29, 0.0 }
 0x4e4   : > { %5933 = vadd.xlane.f32.xlu1 %v5932_v19  ;;  %v5280_v38 = vpop.f32.mrf.mxu0  ;;  %6038 = vst.msk [vmem:[%s9107_s4 + $0x120] sm:$0xff] %vm6001_vm12, %v5727_v34 }
 0x4e5   : > { %v5599_v20 = vmul.f32 %v8947_v4, %v5467_v58  ;;  %v5465_v45 = vmax.f32 %v5280_v38, 0.0  ;;  %v5730_v54 = vpop.xlane.xlu1 %5729  ;;  %v5941_v18 = vsel %vm5616_vm11, %v5596_v32, 0.0 }
 0x4e6   : > { %6039 = vst.msk [vmem:[%s9107_s4 + $0x128] sm:$0xff] %vm6001_vm12, %v5730_v54  ;;  %v7712_v31 = vpop.f32.mrf.mxu0  ;;  %5948 = vadd.xlane.f32.xlu0 %v5947_v39 }
 0x4e7   : > { %v5597_v50 = vmul.f32 %v8947_v4, %v5465_v45  ;;  %v5470_v35 = vmax.f32 %v7712_v31, 0.0  ;;  %v5950_v52 = vsel %vm5616_vm11, %v5599_v20, 0.0  ;;  %v5745_v59 = vpop.xlane.xlu0 %5744 }
 0x4e8   : > { %5951 = vadd.xlane.f32.xlu1 %v5950_v52  ;;  %v5293_v57 = vpop.f32.mrf.mxu0  ;;  %6044 = vst.msk [vmem:[%s9107_s4 + $0x150] sm:$0xff] %vm6001_vm12, %v5745_v59 }
 0x4e9   : > { %v5748_v23 = vpop.xlane.xlu1 %5747  ;;  %v5602_v6 = vmul.f32 %v8947_v4, %v5470_v35  ;;  %v5468_v27 = vmax.f32 %v5293_v57, 0.0  ;;  %v5944_v37 = vsel %vm5616_vm11, %v5597_v50, 0.0 }
 0x4ea   : > { %6045 = vst.msk [vmem:[%s9107_s4 + $0x158] sm:$0xff] %vm6001_vm12, %v5748_v23  ;;  %v7713_v33 = vpop.f32.mrf.mxu0  ;;  %5942 = vadd.xlane.f32.xlu0 %v5941_v18 }
 0x4eb   : > { %v5471_v10 = vmax.f32 %v7713_v33, 0.0  ;;  %v5739_v60 = vpop.xlane.xlu0 %5738  ;;  %v5600_v48 = vmul.f32 %v8947_v4, %v5468_v27  ;;  %v5959_v42 = vsel %vm5616_vm11, %v5602_v6, 0.0 }
 0x4ec   : > { %5945 = vadd.xlane.f32.xlu1 %v5944_v37  ;;  %v5296_v9 = vpop.f32.mrf.mxu0  ;;  %6042 = vst.msk [vmem:[%s9107_s4 + $0x140] sm:$0xff] %vm6001_vm12, %v5739_v60 }
 0x4ed   : > { %v5603_v43 = vmul.f32 %v8947_v4, %v5471_v10  ;;  %v5469_v17 = vmax.f32 %v5296_v9, 0.0  ;;  %v5742_v63 = vpop.xlane.xlu1 %5741  ;;  %v5953_v62 = vsel %vm5616_vm11, %v5600_v48, 0.0 }
 0x4ee   : > { %6043 = vst.msk [vmem:[%s9107_s4 + $0x148] sm:$0xff] %vm6001_vm12, %v5742_v63  ;;  %v7716_v8 = vpop.f32.mrf.mxu0  ;;  %5960 = vadd.xlane.f32.xlu0 %v5959_v42 }
 0x4ef   : > { %v5601_v44 = vmul.f32 %v8947_v4, %v5469_v17  ;;  %v5474_v56 = vmax.f32 %v7716_v8, 0.0  ;;  %v5962_v25 = vsel %vm5616_vm11, %v5603_v43, 0.0  ;;  %v5757_v11 = vpop.xlane.xlu0 %5756 }
 0x4f0   : > { %5963 = vadd.xlane.f32.xlu1 %v5962_v25  ;;  %v5309_v26 = vpop.f32.mrf.mxu0  ;;  %6048 = vst.msk [vmem:[%s9107_s4 + $0x170] sm:$0xff] %vm6001_vm12, %v5757_v11 }
 0x4f1   : > { %v5760_v51 = vpop.xlane.xlu1 %5759  ;;  %v5606_v49 = vmul.f32 %v8947_v4, %v5474_v56  ;;  %v5472_v55 = vmax.f32 %v5309_v26, 0.0  ;;  %v5956_v2 = vsel %vm5616_vm11, %v5601_v44, 0.0 }
 0x4f2   : > { %6049 = vst.msk [vmem:[%s9107_s4 + $0x178] sm:$0xff] %vm6001_vm12, %v5760_v51  ;;  %v7717_v47 = vpop.f32.mrf.mxu0  ;;  %5954 = vadd.xlane.f32.xlu0 %v5953_v62 }
 0x4f3   : > { %v5475_v13 = vmax.f32 %v7717_v47, 0.0  ;;  %v5751_v15 = vpop.xlane.xlu0 %5750  ;;  %v5604_v36 = vmul.f32 %v8947_v4, %v5472_v55  ;;  %v5971_v0 = vsel %vm5616_vm11, %v5606_v49, 0.0 }
 0x4f4   : > { %5957 = vadd.xlane.f32.xlu1 %v5956_v2  ;;  %v5312_v22 = vpop.f32.mrf.mxu0  ;;  %6046 = vst.msk [vmem:[%s9107_s4 + $0x160] sm:$0xff] %vm6001_vm12, %v5751_v15 }
 0x4f5   : > { %v5607_v53 = vmul.f32 %v8947_v4, %v5475_v13  ;;  %v5473_v5 = vmax.f32 %v5312_v22, 0.0  ;;  %v5754_v41 = vpop.xlane.xlu1 %5753  ;;  %v5965_v3 = vsel %vm5616_vm11, %v5604_v36, 0.0 }
 0x4f6   : > { %6047 = vst.msk [vmem:[%s9107_s4 + $0x168] sm:$0xff] %vm6001_vm12, %v5754_v41  ;;  %v7720_v7 = vpop.f32.mrf.mxu0  ;;  %5972 = vadd.xlane.f32.xlu0 %v5971_v0 }
 0x4f7   : > { %v5605_v16 = vmul.f32 %v8947_v4, %v5473_v5  ;;  %v5478_v28 = vmax.f32 %v7720_v7, 0.0  ;;  %v5974_v24 = vsel %vm5616_vm11, %v5607_v53, 0.0  ;;  %v5769_v40 = vpop.xlane.xlu0 %5768 }
 0x4f8   : > { %5975 = vadd.xlane.f32.xlu1 %v5974_v24  ;;  %v5325_v21 = vpop.f32.mrf.mxu0  ;;  %6052 = vst.msk [vmem:[%s9107_s4 + $0x190] sm:$0xff] %vm6001_vm12, %v5769_v40 }
 0x4f9   : > { %v5772_v1 = vpop.xlane.xlu1 %5771  ;;  %v5610_v46 = vmul.f32 %v8947_v4, %v5478_v28  ;;  %v5476_v61 = vmax.f32 %v5325_v21, 0.0  ;;  %v5968_v12 = vsel %vm5616_vm11, %v5605_v16, 0.0 }
 0x4fa   : > { %6053 = vst.msk [vmem:[%s9107_s4 + $0x198] sm:$0xff] %vm6001_vm12, %v5772_v1  ;;  %v7721_v29 = vpop.f32.mrf.mxu0  ;;  %5966 = vadd.xlane.f32.xlu0 %v5965_v3 }
 0x4fb   : > { %v5479_v30 = vmax.f32 %v7721_v29, 0.0  ;;  %v5763_v14 = vpop.xlane.xlu0 %5762  ;;  %v5608_v20 = vmul.f32 %v8947_v4, %v5476_v61  ;;  %v5983_v45 = vsel %vm5616_vm11, %v5610_v46, 0.0 }
 0x4fc   : > { %5969 = vadd.xlane.f32.xlu1 %v5968_v12  ;;  %v5328_v58 = vpop.f32.mrf.mxu0  ;;  %6050 = vst.msk [vmem:[%s9107_s4 + $0x180] sm:$0xff] %vm6001_vm12, %v5763_v14 }
 0x4fd   : > { %v5611_v19 = vmul.f32 %v8947_v4, %v5479_v30  ;;  %v5477_v34 = vmax.f32 %v5328_v58, 0.0  ;;  %v5766_v38 = vpop.xlane.xlu1 %5765  ;;  %v5977_v57 = vsel %vm5616_vm11, %v5608_v20, 0.0 }
 0x4fe   : > { %6051 = vst.msk [vmem:[%s9107_s4 + $0x188] sm:$0xff] %vm6001_vm12, %v5766_v38  ;;  %v7724_v54 = vpop.f32.mrf.mxu0  ;;  %5984 = vadd.xlane.f32.xlu0 %v5983_v45 }
 0x4ff   : > { %v5609_v32 = vmul.f32 %v8947_v4, %v5477_v34  ;;  %v5986_v39 = vsel %vm5616_vm11, %v5611_v19, 0.0  ;;  %v5781_v31 = vpop.xlane.xlu0 %5780  ;;  %v5482_v59 = vmax.f32 %v7724_v54, 0.0 }
 0x500   : > { %5987 = vadd.xlane.f32.xlu1 %v5986_v39  ;;  %v5341_v50 = vpop.f32.mrf.mxu0  ;;  %6056 = vst.msk [vmem:[%s9107_s4 + $0x1b0] sm:$0xff] %vm6001_vm12, %v5781_v31 }
 0x501   : > { %v5480_v35 = vmax.f32 %v5341_v50, 0.0  ;;  %v5784_v52 = vpop.xlane.xlu1 %5783  ;;  %v5980_v27 = vsel %vm5616_vm11, %v5609_v32, 0.0  ;;  %v5614_v43 = vmul.f32 %v8947_v4, %v5482_v59 }
 0x502   : > { %6057 = vst.msk [vmem:[%s9107_s4 + $0x1b8] sm:$0xff] %vm6001_vm12, %v5784_v52  ;;  %v7725_v23 = vpop.f32.mrf.mxu0  ;;  %5978 = vadd.xlane.f32.xlu0 %v5977_v57 }
 0x503   : > { %v5612_v6 = vmul.f32 %v8947_v4, %v5480_v35  ;;  %v5775_v18 = vpop.xlane.xlu0 %5774  ;;  %v5483_v10 = vmax.f32 %v7725_v23, 0.0  ;;  %v5995_v44 = vsel %vm5616_vm11, %v5614_v43, 0.0 }
 0x504   : > { %5981 = vadd.xlane.f32.xlu1 %v5980_v27  ;;  %v5344_v33 = vpop.f32.mrf.mxu0  ;;  %6054 = vst.msk [vmem:[%s9107_s4 + $0x1a0] sm:$0xff] %vm6001_vm12, %v5775_v18 }
 0x505   : > { %v5481_v37 = vmax.f32 %v5344_v33, 0.0  ;;  %v5778_v60 = vpop.xlane.xlu1 %5777  ;;  %v5989_v9 = vsel %vm5616_vm11, %v5612_v6, 0.0  ;;  %v5615_v48 = vmul.f32 %v8947_v4, %v5483_v10 }
 0x506   : > { %6055 = vst.msk [vmem:[%s9107_s4 + $0x1a8] sm:$0xff] %vm6001_vm12, %v5778_v60  ;;  %5990 = vadd.xlane.f32.xlu0 %v5989_v9 }
 0x507   : > { %v5613_v17 = vmul.f32 %v8947_v4, %v5481_v37  ;;  %v5793_v63 = vpop.xlane.xlu0 %5792  ;;  %v5998_v25 = vsel %vm5616_vm11, %v5615_v48, 0.0 }
 0x508   : > { %6060 = vst.msk [vmem:[%s9107_s4 + $0x1d0] sm:$0xff] %vm6001_vm12, %v5793_v63 }
 0x509   : > { %v5796_v42 = vpop.xlane.xlu1 %5795  ;;  %v5992_v8 = vsel %vm5616_vm11, %v5613_v17, 0.0 }
 0x50a   : > { %6061 = vst.msk [vmem:[%s9107_s4 + $0x1d8] sm:$0xff] %vm6001_vm12, %v5796_v42  ;;  %5993 = vadd.xlane.f32.xlu1 %v5992_v8  ;;  %5996 = vadd.xlane.f32.xlu0 %v5995_v44 }
 0x50b   : > { %v5787_v56 = vpop.xlane.xlu0 %5786 }
 0x50c   : > { %6058 = vst.msk [vmem:[%s9107_s4 + $0x1c0] sm:$0xff] %vm6001_vm12, %v5787_v56 }
 0x50d   : > { %v5790_v4 = vpop.xlane.xlu1 %5789 }
 0x50e   : > { %6059 = vst.msk [vmem:[%s9107_s4 + $0x1c8] sm:$0xff] %vm6001_vm12, %v5790_v4  ;;  %5999 = vadd.xlane.f32.xlu1 %v5998_v25 }
 0x50f   : > { %v5805_v11 = vpop.xlane.xlu0 %5804 }
 0x510   : > { %6064 = vst.msk [vmem:[%s9107_s4 + $0x1f0] sm:$0xff] %vm6001_vm12, %v5805_v11 }
 0x511   : > { %v5808_v26 = vpop.xlane.xlu1 %5807 }
 0x512   : > { %6065 = vst.msk [vmem:[%s9107_s4 + $0x1f8] sm:$0xff] %vm6001_vm12, %v5808_v26 }
 0x513   : > { %v5799_v51 = vpop.xlane.xlu0 %5798 }
 0x514   : > { %6062 = vst.msk [vmem:[%s9107_s4 + $0x1e0] sm:$0xff] %vm6001_vm12, %v5799_v51 }
 0x515   : > { %v5802_v49 = vpop.xlane.xlu1 %5801 }
 0x516   : > { %6063 = vst.msk [vmem:[%s9107_s4 + $0x1e8] sm:$0xff] %vm6001_vm12, %v5802_v49 }
 0x517   : > { %v5817_v55 = vpop.xlane.xlu0 %5816 }
 0x518   : > { %6068 = vst.msk [vmem:[%s9107_s4 + $0x210] sm:$0xff] %vm6001_vm12, %v5817_v55 }
 0x519   : > { %v5820_v62 = vpop.xlane.xlu1 %5819 }
 0x51a   : > { %6069 = vst.msk [vmem:[%s9107_s4 + $0x218] sm:$0xff] %vm6001_vm12, %v5820_v62 }
 0x51b   : > { %v5811_v47 = vpop.xlane.xlu0 %5810 }
 0x51c   : > { %6066 = vst.msk [vmem:[%s9107_s4 + $0x200] sm:$0xff] %vm6001_vm12, %v5811_v47 }
 0x51d   : > { %v5814_v13 = vpop.xlane.xlu1 %5813 }
 0x51e   : > { %6067 = vst.msk [vmem:[%s9107_s4 + $0x208] sm:$0xff] %vm6001_vm12, %v5814_v13 }
 0x51f   : > { %v5829_v2 = vpop.xlane.xlu0 %5828 }
 0x520   : > { %6072 = vst.msk [vmem:[%s9107_s4 + $0x230] sm:$0xff] %vm6001_vm12, %v5829_v2 }
 0x521   : > { %v5832_v15 = vpop.xlane.xlu1 %5831 }
 0x522   : > { %6073 = vst.msk [vmem:[%s9107_s4 + $0x238] sm:$0xff] %vm6001_vm12, %v5832_v15 }
 0x523   : > { %v5823_v22 = vpop.xlane.xlu0 %5822 }
 0x524   : > { %6070 = vst.msk [vmem:[%s9107_s4 + $0x220] sm:$0xff] %vm6001_vm12, %v5823_v22 }
 0x525   : > { %v5826_v53 = vpop.xlane.xlu1 %5825 }
 0x526   : > { %6071 = vst.msk [vmem:[%s9107_s4 + $0x228] sm:$0xff] %vm6001_vm12, %v5826_v53 }
 0x527   : > { %v5841_v5 = vpop.xlane.xlu0 %5840 }
 0x528   : > { %6076 = vst.msk [vmem:[%s9107_s4 + $0x250] sm:$0xff] %vm6001_vm12, %v5841_v5 }
 0x529   : > { %v5844_v41 = vpop.xlane.xlu1 %5843 }
 0x52a   : > { %6077 = vst.msk [vmem:[%s9107_s4 + $0x258] sm:$0xff] %vm6001_vm12, %v5844_v41 }
 0x52b   : > { %v5835_v36 = vpop.xlane.xlu0 %5834 }
 0x52c   : > { %6074 = vst.msk [vmem:[%s9107_s4 + $0x240] sm:$0xff] %vm6001_vm12, %v5835_v36 }
 0x52d   : > { %v5838_v0 = vpop.xlane.xlu1 %5837 }
 0x52e   : > { %6075 = vst.msk [vmem:[%s9107_s4 + $0x248] sm:$0xff] %vm6001_vm12, %v5838_v0 }
 0x52f   : > { %v5853_v7 = vpop.xlane.xlu0 %5852 }
 0x530   : > { %6080 = vst.msk [vmem:[%s9107_s4 + $0x270] sm:$0xff] %vm6001_vm12, %v5853_v7 }
 0x531   : > { %v5856_v16 = vpop.xlane.xlu1 %5855 }
 0x532   : > { %6081 = vst.msk [vmem:[%s9107_s4 + $0x278] sm:$0xff] %vm6001_vm12, %v5856_v16 }
 0x533   : > { %v5847_v28 = vpop.xlane.xlu0 %5846 }
 0x534   : > { %6078 = vst.msk [vmem:[%s9107_s4 + $0x260] sm:$0xff] %vm6001_vm12, %v5847_v28 }
 0x535   : > { %v5850_v24 = vpop.xlane.xlu1 %5849 }
 0x536   : > { %6079 = vst.msk [vmem:[%s9107_s4 + $0x268] sm:$0xff] %vm6001_vm12, %v5850_v24 }
 0x537   : > { %v5865_v40 = vpop.xlane.xlu0 %5864 }
 0x538   : > { %6084 = vst.msk [vmem:[%s9107_s4 + $0x290] sm:$0xff] %vm6001_vm12, %v5865_v40 }
 0x539   : > { %v5868_v21 = vpop.xlane.xlu1 %5867 }
 0x53a   : > { %6085 = vst.msk [vmem:[%s9107_s4 + $0x298] sm:$0xff] %vm6001_vm12, %v5868_v21 }
 0x53b   : > { %v5859_v1 = vpop.xlane.xlu0 %5858 }
 0x53c   : > { %6082 = vst.msk [vmem:[%s9107_s4 + $0x280] sm:$0xff] %vm6001_vm12, %v5859_v1 }
 0x53d   : > { %v5862_v46 = vpop.xlane.xlu1 %5861 }
 0x53e   : > { %6083 = vst.msk [vmem:[%s9107_s4 + $0x288] sm:$0xff] %vm6001_vm12, %v5862_v46 }
 0x53f   : > { %v5877_v61 = vpop.xlane.xlu0 %5876 }
 0x540   : > { %6088 = vst.msk [vmem:[%s9107_s4 + $0x2b0] sm:$0xff] %vm6001_vm12, %v5877_v61 }
 0x541   : > { %v5880_v3 = vpop.xlane.xlu1 %5879 }
 0x542   : > { %6089 = vst.msk [vmem:[%s9107_s4 + $0x2b8] sm:$0xff] %vm6001_vm12, %v5880_v3 }
 0x543   : > { %v5871_v29 = vpop.xlane.xlu0 %5870 }
 0x544   : > { %6086 = vst.msk [vmem:[%s9107_s4 + $0x2a0] sm:$0xff] %vm6001_vm12, %v5871_v29 }
 0x545   : > { %v5874_v30 = vpop.xlane.xlu1 %5873 }
 0x546   : > { %6087 = vst.msk [vmem:[%s9107_s4 + $0x2a8] sm:$0xff] %vm6001_vm12, %v5874_v30 }
 0x547   : > { %v5889_v12 = vpop.xlane.xlu0 %5888 }
 0x548   : > { %6092 = vst.msk [vmem:[%s9107_s4 + $0x2d0] sm:$0xff] %vm6001_vm12, %v5889_v12 }
 0x549   : > { %v5892_v14 = vpop.xlane.xlu1 %5891 }
 0x54a   : > { %6093 = vst.msk [vmem:[%s9107_s4 + $0x2d8] sm:$0xff] %vm6001_vm12, %v5892_v14 }
 0x54b   : > { %v5883_v58 = vpop.xlane.xlu0 %5882 }
 0x54c   : > { %6090 = vst.msk [vmem:[%s9107_s4 + $0x2c0] sm:$0xff] %vm6001_vm12, %v5883_v58 }
 0x54d   : > { %v5886_v19 = vpop.xlane.xlu1 %5885 }
 0x54e   : > { %6091 = vst.msk [vmem:[%s9107_s4 + $0x2c8] sm:$0xff] %vm6001_vm12, %v5886_v19 }
 0x54f   : > { %v5901_v34 = vpop.xlane.xlu0 %5900 }
 0x550   : > { %6096 = vst.msk [vmem:[%s9107_s4 + $0x2f0] sm:$0xff] %vm6001_vm12, %v5901_v34 }
 0x551   : > { %v5904_v38 = vpop.xlane.xlu1 %5903 }
 0x552   : > { %6097 = vst.msk [vmem:[%s9107_s4 + $0x2f8] sm:$0xff] %vm6001_vm12, %v5904_v38 }
 0x553   : > { %v5895_v20 = vpop.xlane.xlu0 %5894 }
 0x554   : > { %6094 = vst.msk [vmem:[%s9107_s4 + $0x2e0] sm:$0xff] %vm6001_vm12, %v5895_v20 }
 0x555   : > { %v5898_v45 = vpop.xlane.xlu1 %5897 }
 0x556   : > { %6095 = vst.msk [vmem:[%s9107_s4 + $0x2e8] sm:$0xff] %vm6001_vm12, %v5898_v45 }
 0x557   : > { %v5913_v54 = vpop.xlane.xlu0 %5912 }
 0x558   : > { %6100 = vst.msk [vmem:[%s9107_s4 + $0x310] sm:$0xff] %vm6001_vm12, %v5913_v54 }
 0x559   : > { %v5916_v32 = vpop.xlane.xlu1 %5915 }
 0x55a   : > { %6101 = vst.msk [vmem:[%s9107_s4 + $0x318] sm:$0xff] %vm6001_vm12, %v5916_v32 }
 0x55b   : > { %v5907_v39 = vpop.xlane.xlu0 %5906 }
 0x55c   : > { %6098 = vst.msk [vmem:[%s9107_s4 + $0x300] sm:$0xff] %vm6001_vm12, %v5907_v39 }
 0x55d   : > { %v5910_v31 = vpop.xlane.xlu1 %5909 }
 0x55e   : > { %6099 = vst.msk [vmem:[%s9107_s4 + $0x308] sm:$0xff] %vm6001_vm12, %v5910_v31 }
 0x55f   : > { %v5925_v50 = vpop.xlane.xlu0 %5924 }
 0x560   : > { %6104 = vst.msk [vmem:[%s9107_s4 + $0x330] sm:$0xff] %vm6001_vm12, %v5925_v50 }
 0x561   : > { %v5928_v35 = vpop.xlane.xlu1 %5927 }
 0x562   : > { %6105 = vst.msk [vmem:[%s9107_s4 + $0x338] sm:$0xff] %vm6001_vm12, %v5928_v35 }
 0x563   : > { %v5919_v52 = vpop.xlane.xlu0 %5918 }
 0x564   : > { %6102 = vst.msk [vmem:[%s9107_s4 + $0x320] sm:$0xff] %vm6001_vm12, %v5919_v52 }
 0x565   : > { %v5922_v59 = vpop.xlane.xlu1 %5921 }
 0x566   : > { %6103 = vst.msk [vmem:[%s9107_s4 + $0x328] sm:$0xff] %vm6001_vm12, %v5922_v59 }
 0x567   : > { %v5937_v57 = vpop.xlane.xlu0 %5936 }
 0x568   : > { %6108 = vst.msk [vmem:[%s9107_s4 + $0x350] sm:$0xff] %vm6001_vm12, %v5937_v57 }
 0x569   : > { %v5940_v23 = vpop.xlane.xlu1 %5939 }
 0x56a   : > { %6109 = vst.msk [vmem:[%s9107_s4 + $0x358] sm:$0xff] %vm6001_vm12, %v5940_v23 }
 0x56b   : > { %v5931_v6 = vpop.xlane.xlu0 %5930 }
 0x56c   : > { %6106 = vst.msk [vmem:[%s9107_s4 + $0x340] sm:$0xff] %vm6001_vm12, %v5931_v6 }
 0x56d   : > { %v5934_v27 = vpop.xlane.xlu1 %5933 }
 0x56e   : > { %6107 = vst.msk [vmem:[%s9107_s4 + $0x348] sm:$0xff] %vm6001_vm12, %v5934_v27 }
 0x56f   : > { %v5949_v18 = vpop.xlane.xlu0 %5948 }
 0x570   : > { %6112 = vst.msk [vmem:[%s9107_s4 + $0x370] sm:$0xff] %vm6001_vm12, %v5949_v18 }
 0x571   : > { %v5952_v33 = vpop.xlane.xlu1 %5951 }
 0x572   : > { %6113 = vst.msk [vmem:[%s9107_s4 + $0x378] sm:$0xff] %vm6001_vm12, %v5952_v33 }
 0x573   : > { %v5943_v10 = vpop.xlane.xlu0 %5942 }
 0x574   : > { %6110 = vst.msk [vmem:[%s9107_s4 + $0x360] sm:$0xff] %vm6001_vm12, %v5943_v10 }
 0x575   : > { %v5946_v37 = vpop.xlane.xlu1 %5945 }
 0x576   : > { %6111 = vst.msk [vmem:[%s9107_s4 + $0x368] sm:$0xff] %vm6001_vm12, %v5946_v37 }
 0x577   : > { %v5961_v60 = vpop.xlane.xlu0 %5960 }
 0x578   : > { %6116 = vst.msk [vmem:[%s9107_s4 + $0x390] sm:$0xff] %vm6001_vm12, %v5961_v60 }
 0x579   : > { %v5964_v9 = vpop.xlane.xlu1 %5963 }
 0x57a   : > { %6117 = vst.msk [vmem:[%s9107_s4 + $0x398] sm:$0xff] %vm6001_vm12, %v5964_v9 }
 0x57b   : > { %v5955_v43 = vpop.xlane.xlu0 %5954 }
 0x57c   : > { %6114 = vst.msk [vmem:[%s9107_s4 + $0x380] sm:$0xff] %vm6001_vm12, %v5955_v43 }
 0x57d   : > { %v5958_v17 = vpop.xlane.xlu1 %5957 }
 0x57e   : > { %6115 = vst.msk [vmem:[%s9107_s4 + $0x388] sm:$0xff] %vm6001_vm12, %v5958_v17 }
 0x57f   : > { %v5973_v63 = vpop.xlane.xlu0 %5972 }
 0x580   : > { %6120 = vst.msk [vmem:[%s9107_s4 + $0x3b0] sm:$0xff] %vm6001_vm12, %v5973_v63 }
 0x581   : > { %v5976_v48 = vpop.xlane.xlu1 %5975 }
 0x582   : > { %6121 = vst.msk [vmem:[%s9107_s4 + $0x3b8] sm:$0xff] %vm6001_vm12, %v5976_v48 }
 0x583   : > { %v5967_v42 = vpop.xlane.xlu0 %5966 }
 0x584   : > { %6118 = vst.msk [vmem:[%s9107_s4 + $0x3a0] sm:$0xff] %vm6001_vm12, %v5967_v42 }
 0x585   : > { %v5970_v8 = vpop.xlane.xlu1 %5969 }
 0x586   : > { %6119 = vst.msk [vmem:[%s9107_s4 + $0x3a8] sm:$0xff] %vm6001_vm12, %v5970_v8 }
 0x587   : > { %v5985_v44 = vpop.xlane.xlu0 %5984 }
 0x588   : > { %6124 = vst.msk [vmem:[%s9107_s4 + $0x3d0] sm:$0xff] %vm6001_vm12, %v5985_v44 }
 0x589   : > { %v5988_v56 = vpop.xlane.xlu1 %5987 }
 0x58a   : > { %6125 = vst.msk [vmem:[%s9107_s4 + $0x3d8] sm:$0xff] %vm6001_vm12, %v5988_v56 }
 0x58b   : > { %v5979_v4 = vpop.xlane.xlu0 %5978 }
 0x58c   : > { %6122 = vst.msk [vmem:[%s9107_s4 + $0x3c0] sm:$0xff] %vm6001_vm12, %v5979_v4 }
 0x58d   : > { %v5982_v25 = vpop.xlane.xlu1 %5981 }
 0x58e   : > { %6123 = vst.msk [vmem:[%s9107_s4 + $0x3c8] sm:$0xff] %vm6001_vm12, %v5982_v25 }
 0x58f   : > { %v5991_v11 = vpop.xlane.xlu0 %5990 }
 0x590   : > { %6126 = vst.msk [vmem:[%s9107_s4 + $0x3e0] sm:$0xff] %vm6001_vm12, %v5991_v11 }
 0x593   : > { %v5994_v26 = vpop.xlane.xlu1 %5993  ;;  %v5997_v51 = vpop.xlane.xlu0 %5996 }
 0x594   : > { %6127 = vst.msk [vmem:[%s9107_s4 + $0x3e8] sm:$0xff] %vm6001_vm12, %v5994_v26  ;;  %6128 = vst.msk [vmem:[%s9107_s4 + $0x3f0] sm:$0xff] %vm6001_vm12, %v5997_v51 }
 0x597   : > { %v6000_v49 = vpop.xlane.xlu1 %5999 }
 0x598   : > { %6129 = vst.msk [vmem:[%s9107_s4 + $0x3f8] sm:$0xff] %vm6001_vm12, %v6000_v49 }
 0x599 PF: > { %s13_s12 = sadd.s32 1, %s7762_s12  }
 0x59a   : > { %p10_p4 = scmp.ge.s32.totalorder %s13_s12, 6  }
 0x59c   :  { %12 = sbr.rel (!%p10_p4) target bundleno = 1 (0x1), region = 62 }

</bundles_post_ra>
